<compile_context>
chip_gen: v5e
topology: v5e:2x2
jax: 0.10.0
libtpu: 0.0.40
codegen_flags: <defaults>
</compile_context>

<pallas_src>
from functools import partial

import jax
import jax.numpy as jnp
from jax.experimental import pallas as pl
from jax.experimental.pallas import tpu as pltpu

EPS = 1e-5
EXPANSION = 2
LANE = 128


def _round_up(x, m):
    return (x + m - 1) // m * m


# ---------------------------------------------------------------- kernel ----

def _bottleneck_kernel(*refs, H, W, Ho, Wo, stride, has_proj):
    """Fully fused Bottleneck forward for one image (one grid step)."""
    if has_proj:
        (x_ref, w1_ref, s1_ref, b1_ref, w2_ref, s2_ref, b2_ref,
         w3_ref, s3_ref, b3_ref, wsc_ref, ssc_ref, bsc_ref,
         o_ref, pad_ref) = refs
    else:
        (x_ref, w1_ref, s1_ref, b1_ref, w2_ref, s2_ref, b2_ref,
         w3_ref, s3_ref, b3_ref, o_ref, pad_ref) = refs
        wsc_ref = ssc_ref = bsc_ref = None

    Cp = w1_ref.shape[1]          # padded 'planes'

    # ---- conv1 (1x1) + bn1 + relu  (bf16 matmul, f32 accumulate) -----------
    x_img = x_ref[0]                                  # (H, W, Cin_p) bf16
    x2d = x_img.reshape(H * W, x_img.shape[-1])
    y1 = jnp.dot(x2d, w1_ref[...], preferred_element_type=jnp.float32)
    y1 = jnp.maximum(y1 * s1_ref[...] + b1_ref[...], 0.0)   # (H*W, Cp) f32

    # ---- zero-padded conv1 activation kept in VMEM scratch (no HBM im2col) -
    pad_ref[...] = jnp.zeros_like(pad_ref)
    pad_ref[1:H + 1, 1:W + 1, :] = y1.reshape(H, W, Cp)

    # ---- conv2 (3x3, stride, pad=1) as ONE matmul with K = 9*Cp ------------
    taps = []
    for ky in range(3):
        for kx in range(3):
            if stride == 1:
                t = pad_ref[ky:ky + Ho, kx:kx + Wo, :]
            else:
                # strided window read straight from the VMEM scratch ref
                # (path not exercised by the bundled test, which uses stride=1)
                t = pad_ref[pl.ds(ky, Ho, stride), pl.ds(kx, Wo, stride), :]
            taps.append(t.reshape(Ho * Wo, Cp).astype(jnp.bfloat16))
    t9 = jnp.concatenate(taps, axis=-1)               # (Ho*Wo, 9*Cp) bf16
    y2 = jnp.dot(t9, w2_ref[...], preferred_element_type=jnp.float32)
    y2 = jnp.maximum(y2 * s2_ref[...] + b2_ref[...], 0.0)   # (Ho*Wo, Cp) f32

    # ---- conv3 (1x1) + bn3 --------------------------------------------------
    y3 = jnp.dot(y2.astype(jnp.bfloat16), w3_ref[...],
                 preferred_element_type=jnp.float32)
    y3 = y3 * s3_ref[...] + b3_ref[...]               # (Ho*Wo, Cout_p) f32

    # ---- shortcut ------------------------------------------------------------
    if has_proj:
        if stride == 1:
            xs = x2d
        else:
            xs = x_ref[0, pl.ds(0, Ho, stride), pl.ds(0, Wo, stride), :]
            xs = xs.reshape(Ho * Wo, xs.shape[-1])
        sc = jnp.dot(xs, wsc_ref[...], preferred_element_type=jnp.float32)
        sc = sc * ssc_ref[...] + bsc_ref[...]
    else:
        # identity shortcut: Cin_p == Cout_p, stride == 1
        sc = x2d.astype(jnp.float32)

    # ---- residual add + relu; lane-dense store (Cout_p % 128 == 0) ----------
    o_ref[0] = jnp.maximum(y3 + sc, 0.0)


# ------------------------------------------------------------ host helpers --

def _fold_bn(gamma, beta, mean, var, cpad):
    scale = gamma / jnp.sqrt(var + EPS)
    bias = beta - mean * scale
    scale = jnp.pad(scale, (0, cpad - scale.shape[0]))   # padded channels -> 0
    bias = jnp.pad(bias, (0, cpad - bias.shape[0]))
    return scale[None, :].astype(jnp.float32), bias[None, :].astype(jnp.float32)


def _pad2(w, rows, cols):
    return jnp.pad(w, ((0, rows - w.shape[0]), (0, cols - w.shape[1])))


def _resident_spec(shape):
    """BlockSpec for an operand that stays resident in VMEM across the grid."""
    nd = len(shape)
    return pl.BlockSpec(shape, lambda n: (0,) * nd)


# ----------------------------------------------------------- full forward ---

def bottleneck_forward(x_nchw, params, stride):
    """Pallas implementation of Bottleneck.forward.  x: NCHW float32."""
    N, Cin, H, W = x_nchw.shape
    planes = params["conv1_w"].shape[0]
    out_planes = EXPANSION * planes
    Ho = (H - 1) // stride + 1
    Wo = (W - 1) // stride + 1
    has_proj = (stride != 1) or (Cin != out_planes)

    Cin_p = _round_up(Cin, LANE)
    Cp = _round_up(planes, LANE)
    Cout_p = _round_up(out_planes, LANE)

    # activations: NCHW -> NHWC, channel-pad to a lane multiple, bf16 operands
    x = jnp.transpose(x_nchw, (0, 2, 3, 1)).astype(jnp.float32)
    x_p = jnp.pad(x, ((0, 0), (0, 0), (0, 0),
                      (0, Cin_p - Cin))).astype(jnp.bfloat16)

    # weights: PyTorch OIHW -> matmul layouts, channel-padded, bf16
    w1 = _pad2(jnp.transpose(params["conv1_w"][:, :, 0, 0]),
               Cin_p, Cp).astype(jnp.bfloat16)                      # (Cin_p, Cp)
    w2 = jnp.transpose(params["conv2_w"], (2, 3, 1, 0))             # (3,3,Ci,Co)
    w2 = jnp.pad(w2, ((0, 0), (0, 0), (0, Cp - planes), (0, Cp - planes)))
    w2 = w2.reshape(9 * Cp, Cp).astype(jnp.bfloat16)                # (9*Cp, Cp)
    w3 = _pad2(jnp.transpose(params["conv3_w"][:, :, 0, 0]),
               Cp, Cout_p).astype(jnp.bfloat16)                     # (Cp, Cout_p)

    s1, b1 = _fold_bn(*params["bn1"], Cp)
    s2, b2 = _fold_bn(*params["bn2"], Cp)
    s3, b3 = _fold_bn(*params["bn3"], Cout_p)

    operands = [x_p, w1, s1, b1, w2, s2, b2, w3, s3, b3]
    in_specs = [pl.BlockSpec((1, H, W, Cin_p), lambda n: (n, 0, 0, 0))]
    in_specs += [_resident_spec(a.shape) for a in operands[1:]]

    if has_proj:
        wsc = _pad2(jnp.transpose(params["sc_w"][:, :, 0, 0]),
                    Cin_p, Cout_p).astype(jnp.bfloat16)
        ssc, bsc = _fold_bn(*params["bn_sc"], Cout_p)
        operands += [wsc, ssc, bsc]
        in_specs += [_resident_spec(a.shape) for a in (wsc, ssc, bsc)]

    M_img = Ho * Wo
    kernel = partial(_bottleneck_kernel, H=H, W=W, Ho=Ho, Wo=Wo,
                     stride=stride, has_proj=has_proj)

    out = pl.pallas_call(
        kernel,
        out_shape=jax.ShapeDtypeStruct((N, M_img, Cout_p), jnp.float32),
        grid_spec=pltpu.PrefetchScalarGridSpec(
            num_scalar_prefetch=0,
            grid=(N,),
            in_specs=in_specs,
            out_specs=pl.BlockSpec((1, M_img, Cout_p), lambda n: (n, 0, 0)),
            scratch_shapes=[pltpu.VMEM((H + 2, W + 2, Cp), jnp.float32)],
        ),
        compiler_params=pltpu.CompilerParams(
            dimension_semantics=("parallel",),      # batch axis -> megacore
            vmem_limit_bytes=32 * 1024 * 1024,
        ),
    )(*operands)

    out = out.reshape(N, Ho, Wo, Cout_p)[:, :, :, :out_planes]
    return jnp.transpose(out, (0, 3, 1, 2))          # back to NCHW


# -------------------------------------------------- pure-JAX reference ------

def _torch_conv(x, w, stride=1, padding=0):
    return jax.lax.conv_general_dilated(
        x, w, (stride, stride), [(padding, padding), (padding, padding)],
        dimension_numbers=("NCHW", "OIHW", "NCHW"))


def _torch_bn(x, bn):
    gamma, beta, mean, var = bn
    s = gamma / jnp.sqrt(var + EPS)
    return x * s[None, :, None, None] + (beta - mean * s)[None, :, None, None]


def bottleneck_reference(x, params, stride):
    out = jax.nn.relu(_torch_bn(_torch_conv(x, params["conv1_w"]), params["bn1"]))
    out = jax.nn.relu(_torch_bn(
        _torch_conv(out, params["conv2_w"], stride=stride, padding=1), params["bn2"]))
    out = _torch_bn(_torch_conv(out, params["conv3_w"]), params["bn3"])
    in_planes = x.shape[1]
    out_planes = params["conv3_w"].shape[0]
    if stride != 1 or in_planes != out_planes:
        sc = _torch_bn(_torch_conv(x, params["sc_w"], stride=stride), params["bn_sc"])
    else:
        sc = x
    return jax.nn.relu(out + sc)


# --------------------------------------------------------------------- main -

def _init_params(key, in_planes, planes):
    out_planes = EXPANSION * planes
    ks = jax.random.split(key, 12)

    def bn_params(k, c):
        k0, k1, k2, k3 = jax.random.split(k, 4)
        gamma = jax.random.uniform(k0, (c,), jnp.float32, 0.5, 1.5)
        beta = 0.1 * jax.random.normal(k1, (c,), jnp.float32)
        mean = 0.1 * jax.random.normal(k2, (c,), jnp.float32)
        var = jax.random.uniform(k3, (c,), jnp.float32, 0.5, 1.5)
        return (gamma, beta, mean, var)

    return {
        "conv1_w": 0.2 * jax.random.normal(ks[0], (planes, in_planes, 1, 1), jnp.float32),
        "conv2_w": 0.1 * jax.random.normal(ks[1], (planes, planes, 3, 3), jnp.float32),
        "conv3_w": 0.2 * jax.random.normal(ks[2], (out_planes, planes, 1, 1), jnp.float32),
        "sc_w":    0.2 * jax.random.normal(ks[3], (out_planes, in_planes, 1, 1), jnp.float32),
        "bn1": bn_params(ks[4], planes),
        "bn2": bn_params(ks[5], planes),
        "bn3": bn_params(ks[6], out_planes),
        "bn_sc": bn_params(ks[7], out_planes),
    }


if __name__ == "__main__":
    key = jax.random.PRNGKey(0)

    # (N, in_planes, H, W, planes, stride):
    #   config 0 exercises the projection shortcut, config 1 the identity one.
    configs = [
        (2, 4, 16, 16, 8, 1),
        (2, 16, 16, 16, 8, 1),
    ]

    fwd = jax.jit(bottleneck_forward, static_argnums=2)

    for i, (N, cin, H, W, planes, stride) in enumerate(configs):
        kx, kp, key = jax.random.split(key, 3)
        x = jax.random.normal(kx, (N, cin, H, W), jnp.float32)
        params = _init_params(kp, cin, planes)

        out = jax.block_until_ready(fwd(x, params, stride))
        ref = bottleneck_reference(x, params, stride)

        Ho = (H - 1) // stride + 1
        Wo = (W - 1) // stride + 1
        assert out.shape == (N, EXPANSION * planes, Ho, Wo)
        err = float(jnp.max(jnp.abs(out - ref)))
        # bf16 matmul operands with f32 accumulation -> loosened tolerance
        assert jnp.allclose(out, ref, rtol=3e-2, atol=3e-2), (i, err)

    print("KERNEL_OK")
</pallas_src>

<mosaic_0001>
module attributes {stable_mosaic.version = 11 : i64} {
  func.func @_bottleneck_kernel(%arg0: i32, %arg1: memref<1x16x16x128xbf16, #tpu.memory_space<vmem>>, %arg2: memref<128x128xbf16, #tpu.memory_space<vmem>>, %arg3: memref<1x128xf32, #tpu.memory_space<vmem>>, %arg4: memref<1x128xf32, #tpu.memory_space<vmem>>, %arg5: memref<1152x128xbf16, #tpu.memory_space<vmem>>, %arg6: memref<1x128xf32, #tpu.memory_space<vmem>>, %arg7: memref<1x128xf32, #tpu.memory_space<vmem>>, %arg8: memref<128x128xbf16, #tpu.memory_space<vmem>>, %arg9: memref<1x128xf32, #tpu.memory_space<vmem>>, %arg10: memref<1x128xf32, #tpu.memory_space<vmem>>, %arg11: memref<128x128xbf16, #tpu.memory_space<vmem>>, %arg12: memref<1x128xf32, #tpu.memory_space<vmem>>, %arg13: memref<1x128xf32, #tpu.memory_space<vmem>>, %arg14: memref<1x256x128xf32, #tpu.memory_space<vmem>>, %arg15: memref<18x18x128xf32, #tpu.memory_space<vmem>>) attributes {dimension_semantics = [#tpu.dimension_semantics<parallel>], iteration_bounds = array<i64: 2>, scalar_prefetch = 0 : i64, scratch_operands = 1 : i64, tpu.core_type = #tpu.core_type<tc>, window_params = [{transform_indices = @transform_0, window_bounds = array<i64: 1, 16, 16, 128>}, {pipeline_mode = #tpu.pipeline_mode<synchronous>, transform_indices = @transform_1, window_bounds = array<i64: 128, 128>}, {pipeline_mode = #tpu.pipeline_mode<synchronous>, transform_indices = @transform_2, window_bounds = array<i64: 1, 128>}, {pipeline_mode = #tpu.pipeline_mode<synchronous>, transform_indices = @transform_3, window_bounds = array<i64: 1, 128>}, {pipeline_mode = #tpu.pipeline_mode<synchronous>, transform_indices = @transform_4, window_bounds = array<i64: 1152, 128>}, {pipeline_mode = #tpu.pipeline_mode<synchronous>, transform_indices = @transform_5, window_bounds = array<i64: 1, 128>}, {pipeline_mode = #tpu.pipeline_mode<synchronous>, transform_indices = @transform_6, window_bounds = array<i64: 1, 128>}, {pipeline_mode = #tpu.pipeline_mode<synchronous>, transform_indices = @transform_7, window_bounds = array<i64: 128, 128>}, {pipeline_mode = #tpu.pipeline_mode<synchronous>, transform_indices = @transform_8, window_bounds = array<i64: 1, 128>}, {pipeline_mode = #tpu.pipeline_mode<synchronous>, transform_indices = @transform_9, window_bounds = array<i64: 1, 128>}, {pipeline_mode = #tpu.pipeline_mode<synchronous>, transform_indices = @transform_10, window_bounds = array<i64: 128, 128>}, {pipeline_mode = #tpu.pipeline_mode<synchronous>, transform_indices = @transform_11, window_bounds = array<i64: 1, 128>}, {pipeline_mode = #tpu.pipeline_mode<synchronous>, transform_indices = @transform_12, window_bounds = array<i64: 1, 128>}, {transform_indices = @transform_13, window_bounds = array<i64: 1, 256, 128>}]} {
    %c0 = arith.constant 0 : index
    %c0_0 = arith.constant 0 : index
    %c0_1 = arith.constant 0 : index
    %c0_2 = arith.constant 0 : index
    %0 = vector.load %arg1[%c0, %c0_0, %c0_1, %c0_2] : memref<1x16x16x128xbf16, #tpu.memory_space<vmem>>, vector<1x16x16x128xbf16>
    %1 = vector.shape_cast %0 : vector<1x16x16x128xbf16> to vector<16x16x128xbf16>
    %2 = vector.shape_cast %1 : vector<16x16x128xbf16> to vector<256x128xbf16>
    %c0_3 = arith.constant 0 : index
    %c0_4 = arith.constant 0 : index
    %3 = vector.load %arg2[%c0_3, %c0_4] : memref<128x128xbf16, #tpu.memory_space<vmem>>, vector<128x128xbf16>
    %cst = arith.constant dense<0.000000e+00> : vector<256x128xf32>
    %4 = tpu.matmul %2, %3, %cst {dimension_numbers = #tpu.dot_dimension_numbers<[1], [0], [0], [1], [0, 0, 1, 1], [], []>} : vector<256x128xbf16>, vector<128x128xbf16>, vector<256x128xf32> -> vector<256x128xf32>
    %c0_5 = arith.constant 0 : index
    %c0_6 = arith.constant 0 : index
    %5 = vector.load %arg3[%c0_5, %c0_6] : memref<1x128xf32, #tpu.memory_space<vmem>>, vector<1x128xf32>
    %6 = vector.broadcast %5 : vector<1x128xf32> to vector<256x128xf32>
    %7 = arith.mulf %4, %6 : vector<256x128xf32>
    %c0_7 = arith.constant 0 : index
    %c0_8 = arith.constant 0 : index
    %8 = vector.load %arg4[%c0_7, %c0_8] : memref<1x128xf32, #tpu.memory_space<vmem>>, vector<1x128xf32>
    %9 = vector.broadcast %8 : vector<1x128xf32> to vector<256x128xf32>
    %10 = arith.addf %7, %9 : vector<256x128xf32>
    %cst_9 = arith.constant 0.000000e+00 : f32
    %11 = vector.broadcast %cst_9 : f32 to vector<256x128xf32>
    %12 = arith.maximumf %10, %11 : vector<256x128xf32>
    %cst_10 = arith.constant 0.000000e+00 : f32
    %13 = vector.broadcast %cst_10 : f32 to vector<18x18x128xf32>
    %c0_11 = arith.constant 0 : index
    %c0_12 = arith.constant 0 : index
    %c0_13 = arith.constant 0 : index
    %14 = vector.load %arg15[%c0_11, %c0_12, %c0_13] : memref<18x18x128xf32, #tpu.memory_space<vmem>>, vector<18x18x128xf32>
    tpu.vector_store %arg15[%c0_11, %c0_12, %c0_13], %13 {strides = array<i32>} : memref<18x18x128xf32, #tpu.memory_space<vmem>>, vector<18x18x128xf32>,
    %15 = vector.shape_cast %12 : vector<256x128xf32> to vector<16x16x128xf32>
    %c1 = arith.constant 1 : index
    %c1_14 = arith.constant 1 : index
    %c0_15 = arith.constant 0 : index
    %16 = vector.load %arg15[%c1, %c1_14, %c0_15] : memref<18x18x128xf32, #tpu.memory_space<vmem>>, vector<16x16x128xf32>
    tpu.vector_store %arg15[%c1, %c1_14, %c0_15], %15 {strides = array<i32>} : memref<18x18x128xf32, #tpu.memory_space<vmem>>, vector<16x16x128xf32>,
    %c0_16 = arith.constant 0 : index
    %c0_17 = arith.constant 0 : index
    %c0_18 = arith.constant 0 : index
    %17 = vector.load %arg15[%c0_16, %c0_17, %c0_18] : memref<18x18x128xf32, #tpu.memory_space<vmem>>, vector<16x16x128xf32>
    %18 = vector.shape_cast %17 : vector<16x16x128xf32> to vector<256x128xf32>
    %19 = arith.truncf %18 : vector<256x128xf32> to vector<256x128xbf16>
    %c0_19 = arith.constant 0 : index
    %c1_20 = arith.constant 1 : index
    %c0_21 = arith.constant 0 : index
    %20 = vector.load %arg15[%c0_19, %c1_20, %c0_21] : memref<18x18x128xf32, #tpu.memory_space<vmem>>, vector<16x16x128xf32>
    %21 = vector.shape_cast %20 : vector<16x16x128xf32> to vector<256x128xf32>
    %22 = arith.truncf %21 : vector<256x128xf32> to vector<256x128xbf16>
    %c0_22 = arith.constant 0 : index
    %c2 = arith.constant 2 : index
    %c0_23 = arith.constant 0 : index
    %23 = vector.load %arg15[%c0_22, %c2, %c0_23] : memref<18x18x128xf32, #tpu.memory_space<vmem>>, vector<16x16x128xf32>
    %24 = vector.shape_cast %23 : vector<16x16x128xf32> to vector<256x128xf32>
    %25 = arith.truncf %24 : vector<256x128xf32> to vector<256x128xbf16>
    %c1_24 = arith.constant 1 : index
    %c0_25 = arith.constant 0 : index
    %c0_26 = arith.constant 0 : index
    %26 = vector.load %arg15[%c1_24, %c0_25, %c0_26] : memref<18x18x128xf32, #tpu.memory_space<vmem>>, vector<16x16x128xf32>
    %27 = vector.shape_cast %26 : vector<16x16x128xf32> to vector<256x128xf32>
    %28 = arith.truncf %27 : vector<256x128xf32> to vector<256x128xbf16>
    %c1_27 = arith.constant 1 : index
    %c1_28 = arith.constant 1 : index
    %c0_29 = arith.constant 0 : index
    %29 = vector.load %arg15[%c1_27, %c1_28, %c0_29] : memref<18x18x128xf32, #tpu.memory_space<vmem>>, vector<16x16x128xf32>
    %30 = vector.shape_cast %29 : vector<16x16x128xf32> to vector<256x128xf32>
    %31 = arith.truncf %30 : vector<256x128xf32> to vector<256x128xbf16>
    %c1_30 = arith.constant 1 : index
    %c2_31 = arith.constant 2 : index
    %c0_32 = arith.constant 0 : index
    %32 = vector.load %arg15[%c1_30, %c2_31, %c0_32] : memref<18x18x128xf32, #tpu.memory_space<vmem>>, vector<16x16x128xf32>
    %33 = vector.shape_cast %32 : vector<16x16x128xf32> to vector<256x128xf32>
    %34 = arith.truncf %33 : vector<256x128xf32> to vector<256x128xbf16>
    %c2_33 = arith.constant 2 : index
    %c0_34 = arith.constant 0 : index
    %c0_35 = arith.constant 0 : index
    %35 = vector.load %arg15[%c2_33, %c0_34, %c0_35] : memref<18x18x128xf32, #tpu.memory_space<vmem>>, vector<16x16x128xf32>
    %36 = vector.shape_cast %35 : vector<16x16x128xf32> to vector<256x128xf32>
    %37 = arith.truncf %36 : vector<256x128xf32> to vector<256x128xbf16>
    %c2_36 = arith.constant 2 : index
    %c1_37 = arith.constant 1 : index
    %c0_38 = arith.constant 0 : index
    %38 = vector.load %arg15[%c2_36, %c1_37, %c0_38] : memref<18x18x128xf32, #tpu.memory_space<vmem>>, vector<16x16x128xf32>
    %39 = vector.shape_cast %38 : vector<16x16x128xf32> to vector<256x128xf32>
    %40 = arith.truncf %39 : vector<256x128xf32> to vector<256x128xbf16>
    %c2_39 = arith.constant 2 : index
    %c2_40 = arith.constant 2 : index
    %c0_41 = arith.constant 0 : index
    %41 = vector.load %arg15[%c2_39, %c2_40, %c0_41] : memref<18x18x128xf32, #tpu.memory_space<vmem>>, vector<16x16x128xf32>
    %42 = vector.shape_cast %41 : vector<16x16x128xf32> to vector<256x128xf32>
    %43 = arith.truncf %42 : vector<256x128xf32> to vector<256x128xbf16>
    %44 = tpu.concatenate %19, %22, %25, %28, %31, %34, %37, %40, %43 in 1 : vector<256x128xbf16>, vector<256x128xbf16>, vector<256x128xbf16>, vector<256x128xbf16>, vector<256x128xbf16>, vector<256x128xbf16>, vector<256x128xbf16>, vector<256x128xbf16>, vector<256x128xbf16> -> vector<256x1152xbf16>
    %c0_42 = arith.constant 0 : index
    %c0_43 = arith.constant 0 : index
    %45 = vector.load %arg5[%c0_42, %c0_43] : memref<1152x128xbf16, #tpu.memory_space<vmem>>, vector<1152x128xbf16>
    %cst_44 = arith.constant dense<0.000000e+00> : vector<256x128xf32>
    %46 = tpu.matmul %44, %45, %cst_44 {dimension_numbers = #tpu.dot_dimension_numbers<[1], [0], [0], [1], [0, 0, 1, 1], [], []>} : vector<256x1152xbf16>, vector<1152x128xbf16>, vector<256x128xf32> -> vector<256x128xf32>
    %c0_45 = arith.constant 0 : index
    %c0_46 = arith.constant 0 : index
    %47 = vector.load %arg6[%c0_45, %c0_46] : memref<1x128xf32, #tpu.memory_space<vmem>>, vector<1x128xf32>
    %48 = vector.broadcast %47 : vector<1x128xf32> to vector<256x128xf32>
    %49 = arith.mulf %46, %48 : vector<256x128xf32>
    %c0_47 = arith.constant 0 : index
    %c0_48 = arith.constant 0 : index
    %50 = vector.load %arg7[%c0_47, %c0_48] : memref<1x128xf32, #tpu.memory_space<vmem>>, vector<1x128xf32>
    %51 = vector.broadcast %50 : vector<1x128xf32> to vector<256x128xf32>
    %52 = arith.addf %49, %51 : vector<256x128xf32>
    %cst_49 = arith.constant 0.000000e+00 : f32
    %53 = vector.broadcast %cst_49 : f32 to vector<256x128xf32>
    %54 = arith.maximumf %52, %53 : vector<256x128xf32>
    %55 = arith.truncf %54 : vector<256x128xf32> to vector<256x128xbf16>
    %c0_50 = arith.constant 0 : index
    %c0_51 = arith.constant 0 : index
    %56 = vector.load %arg8[%c0_50, %c0_51] : memref<128x128xbf16, #tpu.memory_space<vmem>>, vector<128x128xbf16>
    %cst_52 = arith.constant dense<0.000000e+00> : vector<256x128xf32>
    %57 = tpu.matmul %55, %56, %cst_52 {dimension_numbers = #tpu.dot_dimension_numbers<[1], [0], [0], [1], [0, 0, 1, 1], [], []>} : vector<256x128xbf16>, vector<128x128xbf16>, vector<256x128xf32> -> vector<256x128xf32>
    %c0_53 = arith.constant 0 : index
    %c0_54 = arith.constant 0 : index
    %58 = vector.load %arg9[%c0_53, %c0_54] : memref<1x128xf32, #tpu.memory_space<vmem>>, vector<1x128xf32>
    %59 = vector.broadcast %58 : vector<1x128xf32> to vector<256x128xf32>
    %60 = arith.mulf %57, %59 : vector<256x128xf32>
    %c0_55 = arith.constant 0 : index
    %c0_56 = arith.constant 0 : index
    %61 = vector.load %arg10[%c0_55, %c0_56] : memref<1x128xf32, #tpu.memory_space<vmem>>, vector<1x128xf32>
    %62 = vector.broadcast %61 : vector<1x128xf32> to vector<256x128xf32>
    %63 = arith.addf %60, %62 : vector<256x128xf32>
    %c0_57 = arith.constant 0 : index
    %c0_58 = arith.constant 0 : index
    %64 = vector.load %arg11[%c0_57, %c0_58] : memref<128x128xbf16, #tpu.memory_space<vmem>>, vector<128x128xbf16>
    %cst_59 = arith.constant dense<0.000000e+00> : vector<256x128xf32>
    %65 = tpu.matmul %2, %64, %cst_59 {dimension_numbers = #tpu.dot_dimension_numbers<[1], [0], [0], [1], [0, 0, 1, 1], [], []>} : vector<256x128xbf16>, vector<128x128xbf16>, vector<256x128xf32> -> vector<256x128xf32>
    %c0_60 = arith.constant 0 : index
    %c0_61 = arith.constant 0 : index
    %66 = vector.load %arg12[%c0_60, %c0_61] : memref<1x128xf32, #tpu.memory_space<vmem>>, vector<1x128xf32>
    %67 = vector.broadcast %66 : vector<1x128xf32> to vector<256x128xf32>
    %68 = arith.mulf %65, %67 : vector<256x128xf32>
    %c0_62 = arith.constant 0 : index
    %c0_63 = arith.constant 0 : index
    %69 = vector.load %arg13[%c0_62, %c0_63] : memref<1x128xf32, #tpu.memory_space<vmem>>, vector<1x128xf32>
    %70 = vector.broadcast %69 : vector<1x128xf32> to vector<256x128xf32>
    %71 = arith.addf %68, %70 : vector<256x128xf32>
    %72 = arith.addf %63, %71 : vector<256x128xf32>
    %cst_64 = arith.constant 0.000000e+00 : f32
    %73 = vector.broadcast %cst_64 : f32 to vector<256x128xf32>
    %74 = arith.maximumf %72, %73 : vector<256x128xf32>
    %c0_65 = arith.constant 0 : index
    %c0_66 = arith.constant 0 : index
    %c0_67 = arith.constant 0 : index
    %75 = vector.load %arg14[%c0_65, %c0_66, %c0_67] : memref<1x256x128xf32, #tpu.memory_space<vmem>>, vector<1x256x128xf32>
    %76 = vector.shape_cast %75 : vector<1x256x128xf32> to vector<256x128xf32>
    %77 = vector.shape_cast %74 : vector<256x128xf32> to vector<1x256x128xf32>
    tpu.vector_store %arg14[%c0_65, %c0_66, %c0_67], %77 {strides = array<i32>} : memref<1x256x128xf32, #tpu.memory_space<vmem>>, vector<1x256x128xf32>,
    return
  }
  func.func @transform_0(%arg0: i32) -> (i32, i32, i32, i32) {
    %c0_i32 = arith.constant 0 : i32
    %c0_i32_0 = arith.constant 0 : i32
    %c0_i32_1 = arith.constant 0 : i32
    %c0_i32_2 = arith.constant 0 : i32
    return %arg0, %c0_i32, %c0_i32_0, %c0_i32_1 : i32, i32, i32, i32
  }
  func.func @transform_1(%arg0: i32) -> (i32, i32) {
    %c0_i32 = arith.constant 0 : i32
    %c0_i32_0 = arith.constant 0 : i32
    %c0_i32_1 = arith.constant 0 : i32
    return %c0_i32, %c0_i32_0 : i32, i32
  }
  func.func @transform_2(%arg0: i32) -> (i32, i32) {
    %c0_i32 = arith.constant 0 : i32
    %c0_i32_0 = arith.constant 0 : i32
    %c0_i32_1 = arith.constant 0 : i32
    return %c0_i32, %c0_i32_0 : i32, i32
  }
  func.func @transform_3(%arg0: i32) -> (i32, i32) {
    %c0_i32 = arith.constant 0 : i32
    %c0_i32_0 = arith.constant 0 : i32
    %c0_i32_1 = arith.constant 0 : i32
    return %c0_i32, %c0_i32_0 : i32, i32
  }
  func.func @transform_4(%arg0: i32) -> (i32, i32) {
    %c0_i32 = arith.constant 0 : i32
    %c0_i32_0 = arith.constant 0 : i32
    %c0_i32_1 = arith.constant 0 : i32
    return %c0_i32, %c0_i32_0 : i32, i32
  }
  func.func @transform_5(%arg0: i32) -> (i32, i32) {
    %c0_i32 = arith.constant 0 : i32
    %c0_i32_0 = arith.constant 0 : i32
    %c0_i32_1 = arith.constant 0 : i32
    return %c0_i32, %c0_i32_0 : i32, i32
  }
  func.func @transform_6(%arg0: i32) -> (i32, i32) {
    %c0_i32 = arith.constant 0 : i32
    %c0_i32_0 = arith.constant 0 : i32
    %c0_i32_1 = arith.constant 0 : i32
    return %c0_i32, %c0_i32_0 : i32, i32
  }
  func.func @transform_7(%arg0: i32) -> (i32, i32) {
    %c0_i32 = arith.constant 0 : i32
    %c0_i32_0 = arith.constant 0 : i32
    %c0_i32_1 = arith.constant 0 : i32
    return %c0_i32, %c0_i32_0 : i32, i32
  }
  func.func @transform_8(%arg0: i32) -> (i32, i32) {
    %c0_i32 = arith.constant 0 : i32
    %c0_i32_0 = arith.constant 0 : i32
    %c0_i32_1 = arith.constant 0 : i32
    return %c0_i32, %c0_i32_0 : i32, i32
  }
  func.func @transform_9(%arg0: i32) -> (i32, i32) {
    %c0_i32 = arith.constant 0 : i32
    %c0_i32_0 = arith.constant 0 : i32
    %c0_i32_1 = arith.constant 0 : i32
    return %c0_i32, %c0_i32_0 : i32, i32
  }
  func.func @transform_10(%arg0: i32) -> (i32, i32) {
    %c0_i32 = arith.constant 0 : i32
    %c0_i32_0 = arith.constant 0 : i32
    %c0_i32_1 = arith.constant 0 : i32
    return %c0_i32, %c0_i32_0 : i32, i32
  }
  func.func @transform_11(%arg0: i32) -> (i32, i32) {
    %c0_i32 = arith.constant 0 : i32
    %c0_i32_0 = arith.constant 0 : i32
    %c0_i32_1 = arith.constant 0 : i32
    return %c0_i32, %c0_i32_0 : i32, i32
  }
  func.func @transform_12(%arg0: i32) -> (i32, i32) {
    %c0_i32 = arith.constant 0 : i32
    %c0_i32_0 = arith.constant 0 : i32
    %c0_i32_1 = arith.constant 0 : i32
    return %c0_i32, %c0_i32_0 : i32, i32
  }
  func.func @transform_13(%arg0: i32) -> (i32, i32, i32) {
    %c0_i32 = arith.constant 0 : i32
    %c0_i32_0 = arith.constant 0 : i32
    %c0_i32_1 = arith.constant 0 : i32
    return %arg0, %c0_i32, %c0_i32_0 : i32, i32, i32
  }
}

</mosaic_0001>

<bundles_post_ra>
// kernel: bottleneck_forward.1
= control target key start
LH: loop header
LB: loop body
LE: loop exit
PB: predicated region body
PF: predicated region fallthrough
CT: control target
= control target key end

     0   :  { %s5141_s25 = smov 0   ;;  %s6442_s0 = inlined_call_operand.vmem [shape: bf16[2,16,16,128], index: 0, kind: input, shape index: {}]   ;;  %s6443_s1 = inlined_call_operand.vmem [shape: bf16[128,128], index: 1, kind: input, shape index: {}]   ;;  %s6444_s2 = inlined_call_operand.vmem [shape: f32[1,128], index: 2, kind: input, shape index: {}]   ;;  %s6445_s3 = inlined_call_operand.vmem [shape: f32[1,128], index: 3, kind: input, shape index: {}]   ;;  %s6446_s4 = inlined_call_operand.vmem [shape: bf16[1152,128], index: 4, kind: input, shape index: {}]   ;;  %s6447_s5 = inlined_call_operand.vmem [shape: f32[1,128], index: 5, kind: input, shape index: {}]   ;;  %s6448_s6 = inlined_call_operand.vmem [shape: f32[1,128], index: 6, kind: input, shape index: {}]   ;;  %s6449_s7 = inlined_call_operand.vmem [shape: bf16[128,128], index: 7, kind: input, shape index: {}]   ;;  %s6450_s8 = inlined_call_operand.vmem [shape: f32[1,128], index: 8, kind: input, shape index: {}]   ;;  %s6451_s9 = inlined_call_operand.vmem [shape: f32[1,128], index: 9, kind: input, shape index: {}]   ;;  %s6452_s10 = inlined_call_operand.vmem [shape: bf16[128,128], index: 10, kind: input, shape index: {}]   ;;  %s6453_s11 = inlined_call_operand.vmem [shape: f32[1,128], index: 11, kind: input, shape index: {}]   ;;  %s6454_s12 = inlined_call_operand.vmem [shape: f32[1,128], index: 12, kind: input, shape index: {}]   ;;  %s6455_s13 = inlined_call_operand.vmem [shape: f32[2,256,128], index: 13, kind: output, shape index: {}]  }
   0x1 LB: > { %s4452_s26 = sadd.s32 4294967295, %s5067_s25   ;;  %p4456_p0 = scmp.ge.s32.totalorder %s5067_s25, 1  ;;  %s5067_s25 = sphi %s5141_s25, %s23_s25  }
   0x2   : > { %p387_p1 = scmp.lt.s32.totalorder %s5067_s25, 3 }
   0x4   : > { %p388_p2 = pnand %p4456_p0, %p387_p1 }
   0x6   : > { %391 = sbr.rel (%p388_p2) target bundleno = 1226 (0x4ca), region = 72 }
   0xb   : > { %v4936_v0 = vld [vmem:[%s6443_s1 + $0x38] sm:$0xff]  ;;  %v4935_v1 = vld [vmem:[%s6443_s1 + $0x30] sm:$0xff]  ;;  %v4934_v2 = vld [vmem:[%s6443_s1 + $0x28] sm:$0xff]  ;;  %p431_p3 = scmp.lt.s32.totalorder %s4452_s26, 1  ;;  %v5069_v28 = vmov 0.0   ;;  %v5070_v54 = vmov 0.0|0.0  }
   0xc   : > { %633 = vmatpush.bf16.msra.mxu0 %v4936_v0  ;;  %v4933_v3 = vld [vmem:[%s6443_s1 + $0x20] sm:$0xff]  ;;  %v4932_v4 = vld [vmem:[%s6443_s1 + $0x18] sm:$0xff]  ;;  %v4931_v5 = vld [vmem:[%s6443_s1 + $0x10] sm:$0xff]  ;;  %826 = vst [vmem:[#allocation2] sm:$0xff] %v5069_v28  ;;  %v1522_v55 = vunpack.c.l.b16 %v5070_v54 }
   0xd   : > { %s6483_s26 = smov (!%p431_p3, %s4452_s26), 1  ;;  %v4930_v6 = vld [vmem:[%s6443_s1 + $0x8] sm:$0xff]  ;;  %v4929_v7 = vld [vmem:[%s6443_s1] sm:$0xff]  ;;  %v4952_v12 = vld [vmem:[%s6446_s4 + $0x78] sm:$0xff]  ;;  %827 = vst [vmem:[#allocation2 + $0x8] sm:$0xff] %v5069_v28 }
   0xe   : > { %s4911_s24 = sshll.u32 %s6483_s26, 7  ;;  %v4960_v13 = vld [vmem:[%s6446_s4 + $0xb8] sm:$0xff]  ;;  %3019 = vmatpush.bf16.msra.mxu2 %v4952_v12  ;;  %v4951_v15 = vld [vmem:[%s6446_s4 + $0x70] sm:$0xff]  ;;  %v4950_v18 = vld [vmem:[%s6446_s4 + $0x68] sm:$0xff]  ;;  %828 = vst [vmem:[#allocation2 + $0x10] sm:$0x3] %v5069_v28  ;;  %v1554_v56 = vpack.c.b16 %v1522_v55, %v1522_v55 }
   0xf   : > { %s5179_s14 = scalar_lea.vmem %s6442_s0, %s4911_s24  ;;  %3108 = vmatpush.bf16.msra.mxu3 %v4960_v13  ;;  %v4944_v16 = vld [vmem:[%s6446_s4 + $0x38] sm:$0xff]  ;;  %v4959_v17 = vld [vmem:[%s6446_s4 + $0xb0] sm:$0xff]  ;;  %v4958_v20 = vld [vmem:[%s6446_s4 + $0xa8] sm:$0xff]  ;;  %829 = vst [vmem:[#allocation2 + $0x18] sm:$0xff] %v5069_v28  ;;  %s4912_s15 = sshll.u32 %s6483_s26, 8 }
  0x10   : > { %634 = vmatpush.bf16.msra.mxu0 %v4935_v1  ;;  %v4913_v8 = vld [vmem:[%s5179_s14] sm:$0xff]  ;;  %v4914_v9 = vld [vmem:[%s5179_s14 + $0x8] sm:$0xff]  ;;  %v4915_v10 = vld [vmem:[%s5179_s14 + $0x10] sm:$0xff]  ;;  %2930 = vmatpush.bf16.msra.mxu1 %v4944_v16  ;;  %830 = vst [vmem:[#allocation2 + $0x20] sm:$0xff] %v5069_v28  ;;  %s6200_s18 = scalar_lea.vmem %s6455_s13, %s4912_s15 }
  0x11   : > { %v4916_v11 = vld [vmem:[%s5179_s14 + $0x18] sm:$0xff]  ;;  %v4917_v14 = vld [vmem:[%s5179_s14 + $0x20] sm:$0xff]  ;;  %v4943_v19 = vld [vmem:[%s6446_s4 + $0x30] sm:$0xff]  ;;  %831 = vst [vmem:[#allocation2 + $0x28] sm:$0x3] %v5069_v28 }
  0x12   : > { %3020 = vmatpush.bf16.msra.mxu2 %v4951_v15  ;;  %v4949_v21 = vld [vmem:[%s6446_s4 + $0x60] sm:$0xff]  ;;  %v4942_v22 = vld [vmem:[%s6446_s4 + $0x28] sm:$0xff]  ;;  %v4948_v24 = vld [vmem:[%s6446_s4 + $0x58] sm:$0xff]  ;;  %832 = vst [vmem:[#allocation2 + $0x30] sm:$0xff] %v5069_v28 }
  0x13   : > { %3109 = vmatpush.bf16.msra.mxu3 %v4959_v17  ;;  %v4957_v23 = vld [vmem:[%s6446_s4 + $0xa0] sm:$0xff]  ;;  %v4956_v26 = vld [vmem:[%s6446_s4 + $0x98] sm:$0xff]  ;;  %v4918_v27 = vld [vmem:[%s5179_s14 + $0x28] sm:$0xff]  ;;  %833 = vst [vmem:[#allocation2 + $0x38] sm:$0xff] %v5069_v28 }
  0x14   : > { %635 = vmatpush.bf16.msra.mxu0 %v4934_v2  ;;  %2931 = vmatpush.bf16.msra.mxu1 %v4943_v19  ;;  %v4941_v25 = vld [vmem:[%s6446_s4 + $0x20] sm:$0xff]  ;;  %v4947_v29 = vld [vmem:[%s6446_s4 + $0x50] sm:$0xff]  ;;  %v4940_v30 = vld [vmem:[%s6446_s4 + $0x18] sm:$0xff]  ;;  %834 = vst [vmem:[#allocation2 + $0x40] sm:$0x3] %v5069_v28 }
  0x15   : > { %v4955_v31 = vld [vmem:[%s6446_s4 + $0x90] sm:$0xff]  ;;  %v4946_v32 = vld [vmem:[%s6446_s4 + $0x48] sm:$0xff]  ;;  %v4945_v35 = vld [vmem:[%s6446_s4 + $0x40] sm:$0xff]  ;;  %835 = vst [vmem:[#allocation2 + $0x48] sm:$0xff] %v5069_v28 }
  0x16   : > { %3021 = vmatpush.bf16.msra.mxu2 %v4950_v18  ;;  %v4939_v33 = vld [vmem:[%s6446_s4 + $0x10] sm:$0xff]  ;;  %v4954_v34 = vld [vmem:[%s6446_s4 + $0x88] sm:$0xff]  ;;  %v4953_v37 = vld [vmem:[%s6446_s4 + $0x80] sm:$0xff]  ;;  %836 = vst [vmem:[#allocation2 + $0x50] sm:$0xff] %v5069_v28 }
  0x17   : > { %3110 = vmatpush.bf16.msra.mxu3 %v4958_v20  ;;  %v4938_v36 = vld [vmem:[%s6446_s4 + $0x8] sm:$0xff]  ;;  %837 = vst [vmem:[#allocation2 + $0x58] sm:$0x3] %v5069_v28  ;;  %v4919_v50 = vld [vmem:[%s5179_s14 + $0x30] sm:$0xff]  ;;  %v4937_v53 = vld [vmem:[%s6446_s4] sm:$0xff] }
  0x18   : > { %636 = vmatpush.bf16.msra.mxu0 %v4933_v3  ;;  %2932 = vmatpush.bf16.msra.mxu1 %v4942_v22  ;;  %v977_v38 = vld [vmem:[#allocation2 + $0x1] sm:$0xff]  ;;  %v978_v39 = vld [vmem:[#allocation2 + $0x9] sm:$0xff]  ;;  %838 = vst [vmem:[#allocation2 + $0x60] sm:$0xff] %v5069_v28  ;;  %v4920_v57 = vld [vmem:[%s5179_s14 + $0x38] sm:$0xff] }
  0x19   : > { %v1009_v40 = vpack.c.bf16 %v977_v38, %v977_v38  ;;  %v1041_v41 = vld [vmem:[#allocation2 + $0x2] sm:$0xff]  ;;  %v1042_v42 = vld [vmem:[#allocation2 + $0xa] sm:$0xff]  ;;  %v1010_v43 = vpack.c.bf16 %v978_v39, %v978_v39  ;;  %839 = vst [vmem:[#allocation2 + $0x68] sm:$0xff] %v5069_v28  ;;  %v4968_v58 = vld [vmem:[%s6446_s4 + $0xf8] sm:$0xff] }
  0x1a   : > { %3022 = vmatpush.bf16.msra.mxu2 %v4949_v21  ;;  %v1073_v44 = vpack.c.bf16 %v1041_v41, %v1041_v41  ;;  %v1074_v45 = vpack.c.bf16 %v1042_v42, %v1042_v42  ;;  %840 = vst [vmem:[#allocation2 + $0x70] sm:$0x3] %v5069_v28  ;;  %v4976_v59 = vld [vmem:[%s6446_s4 + $0x138] sm:$0xff]  ;;  %v5315_v60 = vld [vmem:[%s6444_s2] ss:$0 sm:$0xff]  ;;  %v4923_v38 = vld [vmem:[%s5179_s14 + $0x50] sm:$0xff] }
  0x1b   : > { %3111 = vmatpush.bf16.msra.mxu3 %v4957_v23  ;;  %v1618_v46 = vunpack.c.l.b16 %v1009_v40  ;;  %v1619_v47 = vunpack.c.l.b16 %v1010_v43  ;;  %841 = vst [vmem:[#allocation2 + $0x78] sm:$0xff] %v5069_v28  ;;  %v5322_v61 = vld [vmem:[%s6445_s3] ss:$0 sm:$0xff] }
  0x1c   : > { %637 = vmatpush.bf16.msra.mxu0 %v4932_v4  ;;  %2933 = vmatpush.bf16.msra.mxu1 %v4941_v25  ;;  %v1714_v48 = vunpack.c.l.b16 %v1073_v44  ;;  %v1715_v49 = vunpack.c.l.b16 %v1074_v45  ;;  %842 = vst [vmem:[#allocation2 + $0x80] sm:$0xff] %v5069_v28  ;;  %v4921_v62 = vld [vmem:[%s5179_s14 + $0x40] sm:$0xff] }
  0x1d   : > { %v1650_v51 = vpack.c.b16 %v1619_v47, %v1618_v46  ;;  %843 = vst [vmem:[#allocation2 + $0x88] sm:$0x3] %v5069_v28 }
  0x1e   : > { %3023 = vmatpush.bf16.msra.mxu2 %v4948_v24  ;;  %v1746_v52 = vpack.c.b16 %v1715_v49, %v1714_v48  ;;  %844 = vst [vmem:[#allocation2 + $0x90] sm:$0xff] %v5069_v28 }
  0x1f   : > { %3112 = vmatpush.bf16.msra.mxu3 %v4956_v26  ;;  %845 = vst [vmem:[#allocation2 + $0x98] sm:$0xff] %v5069_v28 }
  0x20   : > { %638 = vmatpush.bf16.msra.mxu0 %v4931_v5  ;;  %2934 = vmatpush.bf16.msra.mxu1 %v4940_v30  ;;  %846 = vst [vmem:[#allocation2 + $0xa0] sm:$0x3] %v5069_v28 }
  0x21   : > { %847 = vst [vmem:[#allocation2 + $0xa8] sm:$0xff] %v5069_v28 }
  0x22   : > { %3024 = vmatpush.bf16.msra.mxu2 %v4947_v29  ;;  %848 = vst [vmem:[#allocation2 + $0xb0] sm:$0xff] %v5069_v28 }
  0x23   : > { %3113 = vmatpush.bf16.msra.mxu3 %v4955_v31  ;;  %849 = vst [vmem:[#allocation2 + $0xb8] sm:$0x3] %v5069_v28 }
  0x24   : > { %639 = vmatpush.bf16.msra.mxu0 %v4930_v6  ;;  %2935 = vmatpush.bf16.msra.mxu1 %v4939_v33  ;;  %850 = vst [vmem:[#allocation2 + $0xc0] sm:$0xff] %v5069_v28 }
  0x25   : > { %851 = vst [vmem:[#allocation2 + $0xc8] sm:$0xff] %v5069_v28 }
  0x26   : > { %3025 = vmatpush.bf16.msra.mxu2 %v4946_v32  ;;  %852 = vst [vmem:[#allocation2 + $0xd0] sm:$0x3] %v5069_v28 }
  0x27   : > { %3114 = vmatpush.bf16.msra.mxu3 %v4954_v34  ;;  %853 = vst [vmem:[#allocation2 + $0xd8] sm:$0xff] %v5069_v28 }
  0x28   : > { %640 = vmatpush.bf16.msra.mxu0 %v4929_v7  ;;  %2936 = vmatpush.bf16.msra.mxu1 %v4938_v36  ;;  %854 = vst [vmem:[#allocation2 + $0xe0] sm:$0xff] %v5069_v28 }
  0x29   : > { %855 = vst [vmem:[#allocation2 + $0xe8] sm:$0x3] %v5069_v28 }
  0x2a   : > { %3026 = vmatpush.bf16.msra.mxu2 %v4945_v35  ;;  %856 = vst [vmem:[#allocation2 + $0xf0] sm:$0xff] %v5069_v28 }
  0x2b   : > { %641 = vmatmul.bf16.vlgmr.msra.gmra.mxu0 %v4913_v8  ;;  %3115 = vmatpush.bf16.msra.mxu3 %v4953_v37  ;;  %857 = vst [vmem:[#allocation2 + $0xf8] sm:$0xff] %v5069_v28  ;;  %v4922_v8 = vld [vmem:[%s5179_s14 + $0x48] sm:$0xff] }
  0x2c   : > { %2937 = vmatpush.bf16.msra.mxu1 %v4937_v53  ;;  %858 = vst [vmem:[#allocation2 + $0x100] sm:$0x3] %v5069_v28  ;;  %3197 = vmatpush.bf16.msrb.mxu0 %v4968_v58 }
  0x2d   : > { %3027 = vmatmul.bf16.vlgmr.msra.gmra.mxu2 %v1650_v51  ;;  %859 = vst [vmem:[#allocation2 + $0x108] sm:$0xff] %v5069_v28 }
  0x2e   : > { %3116 = vmatmul.bf16.vlgmr.msra.gmra.mxu3 %v1746_v52  ;;  %860 = vst [vmem:[#allocation2 + $0x110] sm:$0xff] %v5069_v28 }
  0x2f   : > { %2938 = vmatmul.bf16.vlgmr.msra.gmra.mxu1 %v1554_v56  ;;  %861 = vst [vmem:[#allocation2 + $0x118] sm:$0x3] %v5069_v28 }
  0x30   : > { %3286 = vmatpush.bf16.msrb.mxu1 %v4976_v59  ;;  %862 = vst [vmem:[#allocation2 + $0x120] sm:$0xff] %v5069_v28 }
  0x31   : > { %863 = vst [vmem:[#allocation2 + $0x128] sm:$0xff] %v5069_v28 }
  0x32   : > { %864 = vst [vmem:[#allocation2 + $0x130] sm:$0x3] %v5069_v28 }
  0x33   : > { %865 = vst [vmem:[#allocation2 + $0x138] sm:$0xff] %v5069_v28 }
  0x34   : > { %866 = vst [vmem:[#allocation2 + $0x140] sm:$0xff] %v5069_v28 }
  0x35   : > { %867 = vst [vmem:[#allocation2 + $0x148] sm:$0x3] %v5069_v28 }
  0x36   : > { %868 = vst [vmem:[#allocation2 + $0x150] sm:$0xff] %v5069_v28 }
  0x37   : > { %869 = vst [vmem:[#allocation2 + $0x158] sm:$0xff] %v5069_v28 }
  0x38   : > { %870 = vst [vmem:[#allocation2 + $0x160] sm:$0x3] %v5069_v28 }
  0x39   : > { %871 = vst [vmem:[#allocation2 + $0x168] sm:$0xff] %v5069_v28 }
  0x3a   : > { %872 = vst [vmem:[#allocation2 + $0x170] sm:$0xff] %v5069_v28 }
  0x3b   : > { %646 = vmatmul.bf16.gmra.mxu0 %v4914_v9  ;;  %873 = vst [vmem:[#allocation2 + $0x178] sm:$0x3] %v5069_v28 }
  0x3c   : > { %874 = vst [vmem:[#allocation2 + $0x180] sm:$0xff] %v5069_v28 }
  0x3d   : > { %875 = vst [vmem:[#allocation2 + $0x188] sm:$0xff] %v5069_v28 }
  0x3e   : > { %876 = vst [vmem:[#allocation2 + $0x190] sm:$0x3] %v5069_v28 }
  0x3f   : > { %877 = vst [vmem:[#allocation2 + $0x198] sm:$0xff] %v5069_v28 }
  0x40   : > { %878 = vst [vmem:[#allocation2 + $0x1a0] sm:$0xff] %v5069_v28 }
  0x41   : > { %879 = vst [vmem:[#allocation2 + $0x1a8] sm:$0x3] %v5069_v28 }
  0x4b   : > { %651 = vmatmul.bf16.gmra.mxu0 %v4915_v10  ;;  %v4967_v10 = vld [vmem:[%s6446_s4 + $0xf0] sm:$0xff] }
  0x4c   : > { %3198 = vmatpush.bf16.msrb.mxu0 %v4967_v10 }
  0x5b   : > { %656 = vmatmul.bf16.gmra.mxu0 %v4916_v11  ;;  %v4975_v11 = vld [vmem:[%s6446_s4 + $0x130] sm:$0xff] }
  0x5c   : > { %3287 = vmatpush.bf16.msrb.mxu1 %v4975_v11 }
  0x6b   : > { %661 = vmatmul.bf16.gmra.mxu0 %v4917_v14 }
  0x7b   : > { %666 = vmatmul.bf16.gmra.mxu0 %v4918_v27 }
  0x8b   : > { %671 = vmatmul.bf16.gmra.mxu0 %v4919_v50 }
  0x9b   : > { %676 = vmatmul.bf16.gmra.mxu0 %v4920_v57 }
  0xa8   : > { %v642_v63 = vpop.f32.mrf.mxu0 }
  0xa9   : > { %v726_v0 = vmul.f32 %v5315_v60, %v642_v63 }
  0xab   : > { %v762_v1 = vadd.f32 %v5322_v61, %v726_v0  ;;  %681 = vmatmul.bf16.gmra.mxu0 %v4921_v62 }
  0xad   : > { %v794_v2 = vmax.f32 %v762_v1, 0.0 }
  0xaf   : > { %881 = vst [vmem:[#allocation2 + $0x19] sm:$0xff] %v794_v2  ;;  %v1011_v7 = vpack.c.bf16 %v794_v2, %v794_v2 }
  0xb0   : > { %v644_v3 = vpop.f32.mrf.mxu0 }
  0xb1   : > { %v727_v4 = vmul.f32 %v5315_v60, %v644_v3  ;;  %v1620_v15 = vunpack.c.l.b16 %v1011_v7  ;;  %v4974_v7 = vld [vmem:[%s6446_s4 + $0x128] sm:$0xff] }
  0xb2   : > { %3288 = vmatpush.bf16.msrb.mxu1 %v4974_v7 }
  0xb3   : > { %v763_v5 = vadd.f32 %v5322_v61, %v727_v4  ;;  %v4924_v4 = vld [vmem:[%s5179_s14 + $0x58] sm:$0xff] }
  0xb5   : > { %v795_v6 = vmax.f32 %v763_v5, 0.0 }
  0xb6   : > { %v915_v14 = vld [vmem:[#allocation2 + $0x18] sm:$0xff] }
  0xb7   : > { %882 = vst [vmem:[#allocation2 + $0x21] sm:$0xff] %v795_v6  ;;  %v1012_v9 = vpack.c.bf16 %v795_v6, %v795_v6  ;;  %v947_v19 = vpack.c.bf16 %v915_v14, %v915_v14  ;;  %v4966_v6 = vld [vmem:[%s6446_s4 + $0xe8] sm:$0xff] }
  0xb8   : > { %v647_v12 = vpop.f32.mrf.mxu0  ;;  %3199 = vmatpush.bf16.msrb.mxu0 %v4966_v6 }
  0xb9   : > { %v728_v13 = vmul.f32 %v5315_v60, %v647_v12  ;;  %v1621_v16 = vunpack.c.l.b16 %v1012_v9  ;;  %v1524_v28 = vunpack.c.l.b16 %v947_v19 }
  0xbb   : > { %v764_v17 = vadd.f32 %v5322_v61, %v728_v13  ;;  %686 = vmatmul.bf16.gmra.mxu0 %v4922_v8  ;;  %v1651_v18 = vpack.c.b16 %v1621_v16, %v1620_v15 }
  0xbd   : > { %v796_v20 = vmax.f32 %v764_v17, 0.0  ;;  %3032 = vmatmul.bf16.gmra.mxu2 %v1651_v18 }
  0xbe   : > { %v916_v21 = vld [vmem:[#allocation2 + $0x20] sm:$0xff] }
  0xbf   : > { %v1043_v22 = vld [vmem:[#allocation2 + $0x1a] sm:$0xff]  ;;  %v1044_v23 = vld [vmem:[#allocation2 + $0x22] sm:$0xff]  ;;  %883 = vst [vmem:[#allocation2 + $0x31] sm:$0xff] %v796_v20  ;;  %v948_v24 = vpack.c.bf16 %v916_v21, %v916_v21  ;;  %v1013_v37 = vpack.c.bf16 %v796_v20, %v796_v20 }
  0xc0   : > { %v1075_v25 = vpack.c.bf16 %v1043_v22, %v1043_v22  ;;  %v1076_v26 = vpack.c.bf16 %v1044_v23, %v1044_v23  ;;  %v649_v27 = vpop.f32.mrf.mxu0 }
  0xc1   : > { %v729_v29 = vmul.f32 %v5315_v60, %v649_v27  ;;  %v1525_v30 = vunpack.c.l.b16 %v948_v24  ;;  %v1622_v43 = vunpack.c.l.b16 %v1013_v37 }
  0xc2   : > { %v1716_v31 = vunpack.c.l.b16 %v1075_v25  ;;  %v1717_v32 = vunpack.c.l.b16 %v1076_v26 }
  0xc3   : > { %v765_v33 = vadd.f32 %v5322_v61, %v729_v29  ;;  %v5347_v34 = vpack.c.b16 %v1525_v30, %v1524_v28 }
  0xc4   : > { %v1747_v35 = vpack.c.b16 %v1717_v32, %v1716_v31 }
  0xc5   : > { %v797_v36 = vmax.f32 %v765_v33, 0.0  ;;  %2943 = vmatmul.bf16.gmra.mxu1 %v5347_v34 }
  0xc6   : > { %3121 = vmatmul.bf16.gmra.mxu3 %v1747_v35  ;;  %v917_v42 = vld [vmem:[#allocation2 + $0x30] sm:$0xff]  ;;  %v4925_v35 = vld [vmem:[%s5179_s14 + $0x60] sm:$0xff] }
  0xc7   : > { %884 = vst [vmem:[#allocation2 + $0x39] sm:$0xff] %v797_v36  ;;  %v1014_v39 = vpack.c.bf16 %v797_v36, %v797_v36  ;;  %v949_v47 = vpack.c.bf16 %v917_v42, %v917_v42 }
  0xc8   : > { %v652_v40 = vpop.f32.mrf.mxu0 }
  0xc9   : > { %v730_v41 = vmul.f32 %v5315_v60, %v652_v40  ;;  %v1623_v44 = vunpack.c.l.b16 %v1014_v39  ;;  %v1526_v56 = vunpack.c.l.b16 %v949_v47 }
  0xcb   : > { %v766_v45 = vadd.f32 %v5322_v61, %v730_v41  ;;  %691 = vmatmul.bf16.gmra.mxu0 %v4923_v38  ;;  %v1652_v46 = vpack.c.b16 %v1623_v44, %v1622_v43 }
  0xcd   : > { %v798_v48 = vmax.f32 %v766_v45, 0.0  ;;  %3037 = vmatmul.bf16.gmra.mxu2 %v1652_v46 }
  0xce   : > { %v918_v49 = vld [vmem:[#allocation2 + $0x38] sm:$0xff] }
  0xcf   : > { %v1045_v50 = vld [vmem:[#allocation2 + $0x32] sm:$0xff]  ;;  %v1046_v51 = vld [vmem:[#allocation2 + $0x3a] sm:$0xff]  ;;  %885 = vst [vmem:[#allocation2 + $0x49] sm:$0xff] %v798_v48  ;;  %v950_v52 = vpack.c.bf16 %v918_v49, %v918_v49  ;;  %v1015_v3 = vpack.c.bf16 %v798_v48, %v798_v48 }
  0xd0   : > { %v1077_v53 = vpack.c.bf16 %v1045_v50, %v1045_v50  ;;  %v1078_v54 = vpack.c.bf16 %v1046_v51, %v1046_v51  ;;  %v654_v55 = vpop.f32.mrf.mxu0 }
  0xd1   : > { %v731_v57 = vmul.f32 %v5315_v60, %v654_v55  ;;  %v1527_v58 = vunpack.c.l.b16 %v950_v52  ;;  %v1624_v11 = vunpack.c.l.b16 %v1015_v3 }
  0xd2   : > { %v1718_v59 = vunpack.c.l.b16 %v1077_v53  ;;  %v1719_v62 = vunpack.c.l.b16 %v1078_v54 }
  0xd3   : > { %v767_v63 = vadd.f32 %v5322_v61, %v731_v57  ;;  %v5355_v0 = vpack.c.b16 %v1527_v58, %v1526_v56 }
  0xd4   : > { %v1748_v1 = vpack.c.b16 %v1719_v62, %v1718_v59 }
  0xd5   : > { %v799_v2 = vmax.f32 %v767_v63, 0.0  ;;  %2948 = vmatmul.bf16.gmra.mxu1 %v5355_v0 }
  0xd6   : > { %3126 = vmatmul.bf16.gmra.mxu3 %v1748_v1  ;;  %v919_v10 = vld [vmem:[#allocation2 + $0x48] sm:$0xff] }
  0xd7   : > { %886 = vst [vmem:[#allocation2 + $0x51] sm:$0xff] %v799_v2  ;;  %v1016_v5 = vpack.c.bf16 %v799_v2, %v799_v2  ;;  %v951_v15 = vpack.c.bf16 %v919_v10, %v919_v10  ;;  %v4926_v2 = vld [vmem:[%s5179_s14 + $0x68] sm:$0xff] }
  0xd8   : > { %v657_v8 = vpop.f32.mrf.mxu0 }
  0xd9   : > { %v732_v9 = vmul.f32 %v5315_v60, %v657_v8  ;;  %v1625_v12 = vunpack.c.l.b16 %v1016_v5  ;;  %v1528_v24 = vunpack.c.l.b16 %v951_v15  ;;  %v4973_v5 = vld [vmem:[%s6446_s4 + $0x120] sm:$0xff] }
  0xda   : > { %3289 = vmatpush.bf16.msrb.mxu1 %v4973_v5 }
  0xdb   : > { %v768_v13 = vadd.f32 %v5322_v61, %v732_v9  ;;  %696 = vmatmul.bf16.gmra.mxu0 %v4924_v4  ;;  %v1653_v14 = vpack.c.b16 %v1625_v12, %v1624_v11  ;;  %v4965_v4 = vld [vmem:[%s6446_s4 + $0xe0] sm:$0xff] }
  0xdc   : > { %3200 = vmatpush.bf16.msrb.mxu0 %v4965_v4  ;;  %v3117_v4 = vpop.f32.mrf.mxu3 }
  0xdd   : > { %v800_v16 = vmax.f32 %v768_v13, 0.0  ;;  %3042 = vmatmul.bf16.gmra.mxu2 %v1653_v14  ;;  %v4964_v13 = vld [vmem:[%s6446_s4 + $0xd8] sm:$0xff] }
  0xde   : > { %v920_v17 = vld [vmem:[#allocation2 + $0x50] sm:$0xff] }
  0xdf   : > { %v1047_v18 = vld [vmem:[#allocation2 + $0x4a] sm:$0xff]  ;;  %v1048_v19 = vld [vmem:[#allocation2 + $0x52] sm:$0xff]  ;;  %887 = vst [vmem:[#allocation2 + $0x61] sm:$0xff] %v800_v16  ;;  %v952_v20 = vpack.c.bf16 %v920_v17, %v920_v17  ;;  %v1017_v33 = vpack.c.bf16 %v800_v16, %v800_v16 }
  0xe0   : > { %v1079_v21 = vpack.c.bf16 %v1047_v18, %v1047_v18  ;;  %v1080_v22 = vpack.c.bf16 %v1048_v19, %v1048_v19  ;;  %v659_v23 = vpop.f32.mrf.mxu0  ;;  %3201 = vmatpush.bf16.msrb.mxu0 %v4964_v13  ;;  %v4972_v13 = vld [vmem:[%s6446_s4 + $0x118] sm:$0xff] }
  0xe1   : > { %v733_v25 = vmul.f32 %v5315_v60, %v659_v23  ;;  %v1529_v26 = vunpack.c.l.b16 %v952_v20  ;;  %v1626_v40 = vunpack.c.l.b16 %v1017_v33  ;;  %v4962_v33 = vld [vmem:[%s6446_s4 + $0xc8] sm:$0xff]  ;;  %3290 = vmatpush.bf16.msrb.mxu1 %v4972_v13 }
  0xe2   : > { %v1720_v27 = vunpack.c.l.b16 %v1079_v21  ;;  %v1721_v28 = vunpack.c.l.b16 %v1080_v22  ;;  %v4963_v22 = vld [vmem:[%s6446_s4 + $0xd0] sm:$0xff] }
  0xe3   : > { %v769_v29 = vadd.f32 %v5322_v61, %v733_v25  ;;  %v5369_v30 = vpack.c.b16 %v1529_v26, %v1528_v24 }
  0xe4   : > { %v1749_v31 = vpack.c.b16 %v1721_v28, %v1720_v27  ;;  %3202 = vmatpush.bf16.msrb.mxu0 %v4963_v22 }
  0xe5   : > { %v801_v32 = vmax.f32 %v769_v29, 0.0  ;;  %2953 = vmatmul.bf16.gmra.mxu1 %v5369_v30 }
  0xe6   : > { %3131 = vmatmul.bf16.gmra.mxu3 %v1749_v31  ;;  %v921_v39 = vld [vmem:[#allocation2 + $0x60] sm:$0xff] }
  0xe7   : > { %888 = vst [vmem:[#allocation2 + $0x69] sm:$0xff] %v801_v32  ;;  %v1018_v36 = vpack.c.bf16 %v801_v32, %v801_v32  ;;  %v953_v44 = vpack.c.bf16 %v921_v39, %v921_v39  ;;  %v4961_v39 = vld [vmem:[%s6446_s4 + $0xc0] sm:$0xff] }
  0xe8   : > { %v662_v37 = vpop.f32.mrf.mxu0  ;;  %3203 = vmatpush.bf16.msrb.mxu0 %v4962_v33 }
  0xe9   : > { %v734_v38 = vmul.f32 %v5315_v60, %v662_v37  ;;  %v1627_v41 = vunpack.c.l.b16 %v1018_v36  ;;  %v1530_v53 = vunpack.c.l.b16 %v953_v44  ;;  %v4927_v37 = vld [vmem:[%s5179_s14 + $0x70] sm:$0xff] }
  0xeb   : > { %v770_v42 = vadd.f32 %v5322_v61, %v734_v38  ;;  %701 = vmatmul.bf16.gmra.mxu0 %v4925_v35  ;;  %v1654_v43 = vpack.c.b16 %v1627_v41, %v1626_v40 }
  0xec   : > { %3204 = vmatpush.bf16.msrb.mxu0 %v4961_v39 }
  0xed   : > { %v802_v45 = vmax.f32 %v770_v42, 0.0  ;;  %3047 = vmatmul.bf16.gmra.mxu2 %v1654_v43 }
  0xee   : > { %v922_v46 = vld [vmem:[#allocation2 + $0x68] sm:$0xff] }
  0xef   : > { %v1049_v47 = vld [vmem:[#allocation2 + $0x62] sm:$0xff]  ;;  %v1050_v48 = vld [vmem:[#allocation2 + $0x6a] sm:$0xff]  ;;  %889 = vst [vmem:[#allocation2 + $0x79] sm:$0xff] %v802_v45  ;;  %v954_v49 = vpack.c.bf16 %v922_v46, %v922_v46  ;;  %v1019_v1 = vpack.c.bf16 %v802_v45, %v802_v45 }
  0xf0   : > { %v1081_v50 = vpack.c.bf16 %v1049_v47, %v1049_v47  ;;  %v1082_v51 = vpack.c.bf16 %v1050_v48, %v1050_v48  ;;  %v664_v52 = vpop.f32.mrf.mxu0 }
  0xf1   : > { %v735_v54 = vmul.f32 %v5315_v60, %v664_v52  ;;  %v1531_v55 = vunpack.c.l.b16 %v954_v49  ;;  %v1628_v9 = vunpack.c.l.b16 %v1019_v1 }
  0xf2   : > { %v1722_v56 = vunpack.c.l.b16 %v1081_v50  ;;  %v1723_v57 = vunpack.c.l.b16 %v1082_v51 }
  0xf3   : > { %v771_v58 = vadd.f32 %v5322_v61, %v735_v54  ;;  %v5377_v59 = vpack.c.b16 %v1531_v55, %v1530_v53  ;;  %v2939_v55 = vpop.f32.mrf.mxu1 }
  0xf4   : > { %v1750_v62 = vpack.c.b16 %v1723_v57, %v1722_v56  ;;  %v3028_v56 = vpop.f32.mrf.mxu2 }
  0xf5   : > { %v803_v63 = vmax.f32 %v771_v58, 0.0  ;;  %2958 = vmatmul.bf16.gmra.mxu1 %v5377_v59 }
  0xf6   : > { %3136 = vmatmul.bf16.gmra.mxu3 %v1750_v62  ;;  %v923_v8 = vld [vmem:[#allocation2 + $0x78] sm:$0xff]  ;;  %v3029_v62 = vadd.f32 %v3028_v56, %v2939_v55 }
  0xf7   : > { %890 = vst [vmem:[#allocation2 + $0x81] sm:$0xff] %v803_v63  ;;  %v1020_v3 = vpack.c.bf16 %v803_v63, %v803_v63  ;;  %v955_v14 = vpack.c.bf16 %v923_v8, %v923_v8 }
  0xf8   : > { %v667_v6 = vpop.f32.mrf.mxu0  ;;  %v5410_v5 = vadd.f32 %v3117_v4, %v3029_v62 }
  0xf9   : > { %v736_v7 = vmul.f32 %v5315_v60, %v667_v6  ;;  %v1629_v10 = vunpack.c.l.b16 %v1020_v3  ;;  %v1532_v24 = vunpack.c.l.b16 %v955_v14 }
  0xfb   : > { %v772_v11 = vadd.f32 %v5322_v61, %v736_v7  ;;  %706 = vmatmul.bf16.gmra.mxu0 %v4926_v2  ;;  %v1655_v12 = vpack.c.b16 %v1629_v10, %v1628_v9 }
  0xfd   : > { %v804_v15 = vmax.f32 %v772_v11, 0.0  ;;  %3052 = vmatmul.bf16.gmra.mxu2 %v1655_v12  ;;  %v4928_v11 = vld [vmem:[%s5179_s14 + $0x78] sm:$0xff] }
  0xfe   : > { %v924_v16 = vld [vmem:[#allocation2 + $0x80] sm:$0xff] }
  0xff   : > { %v1051_v17 = vld [vmem:[#allocation2 + $0x7a] sm:$0xff]  ;;  %v1052_v18 = vld [vmem:[#allocation2 + $0x82] sm:$0xff]  ;;  %891 = vst [vmem:[#allocation2 + $0x91] sm:$0xff] %v804_v15  ;;  %v956_v19 = vpack.c.bf16 %v924_v16, %v924_v16  ;;  %v1021_v36 = vpack.c.bf16 %v804_v15, %v804_v15 }
 0x100   : > { %v1083_v20 = vpack.c.bf16 %v1051_v17, %v1051_v17  ;;  %v1084_v21 = vpack.c.bf16 %v1052_v18, %v1052_v18  ;;  %v669_v23 = vpop.f32.mrf.mxu0 }
 0x101   : > { %v737_v25 = vmul.f32 %v5315_v60, %v669_v23  ;;  %v1533_v26 = vunpack.c.l.b16 %v956_v19  ;;  %v1630_v43 = vunpack.c.l.b16 %v1021_v36 }
 0x102   : > { %v1724_v27 = vunpack.c.l.b16 %v1083_v20  ;;  %v1725_v28 = vunpack.c.l.b16 %v1084_v21 }
 0x103   : > { %v773_v29 = vadd.f32 %v5322_v61, %v737_v25  ;;  %v5397_v31 = vpack.c.b16 %v1533_v26, %v1532_v24 }
 0x104   : > { %v1751_v32 = vpack.c.b16 %v1725_v28, %v1724_v27 }
 0x105   : > { %v805_v35 = vmax.f32 %v773_v29, 0.0  ;;  %2963 = vmatmul.bf16.gmra.mxu1 %v5397_v31 }
 0x106   : > { %3141 = vmatmul.bf16.gmra.mxu3 %v1751_v32  ;;  %v925_v42 = vld [vmem:[#allocation2 + $0x90] sm:$0xff] }
 0x107   : > { %892 = vst [vmem:[#allocation2 + $0x99] sm:$0xff] %v805_v35  ;;  %v1022_v38 = vpack.c.bf16 %v805_v35, %v805_v35  ;;  %v957_v47 = vpack.c.bf16 %v925_v42, %v925_v42 }
 0x108   : > { %v672_v40 = vpop.f32.mrf.mxu0 }
 0x109   : > { %v738_v41 = vmul.f32 %v5315_v60, %v672_v40  ;;  %v1631_v44 = vunpack.c.l.b16 %v1022_v38  ;;  %v1534_v58 = vunpack.c.l.b16 %v957_v47 }
 0x10b   : > { %v774_v45 = vadd.f32 %v5322_v61, %v738_v41  ;;  %711 = vmatmul.bf16.gmra.mxu0 %v4927_v37  ;;  %v1656_v46 = vpack.c.b16 %v1631_v44, %v1630_v43  ;;  %v4984_v44 = vld [vmem:[%s6446_s4 + $0x178] sm:$0xff] }
 0x10c   : > { %3375 = vmatpush.bf16.msrb.mxu2 %v4984_v44 }
 0x10d   : > { %v806_v48 = vmax.f32 %v774_v45, 0.0  ;;  %3057 = vmatmul.bf16.gmra.mxu2 %v1656_v46  ;;  %v4992_v45 = vld [vmem:[%s6446_s4 + $0x1b8] sm:$0xff] }
 0x10e   : > { %v926_v49 = vld [vmem:[#allocation2 + $0x98] sm:$0xff]  ;;  %3464 = vmatpush.bf16.msrb.mxu3 %v4992_v45 }
 0x10f   : > { %v1053_v50 = vld [vmem:[#allocation2 + $0x92] sm:$0xff]  ;;  %v1054_v51 = vld [vmem:[#allocation2 + $0x9a] sm:$0xff]  ;;  %893 = vst [vmem:[#allocation2 + $0xa9] sm:$0xff] %v806_v48  ;;  %v958_v52 = vpack.c.bf16 %v926_v49, %v926_v49  ;;  %v1023_v10 = vpack.c.bf16 %v806_v48, %v806_v48 }
 0x110   : > { %v1085_v53 = vpack.c.bf16 %v1053_v50, %v1053_v50  ;;  %v1086_v54 = vpack.c.bf16 %v1054_v51, %v1054_v51  ;;  %v674_v57 = vpop.f32.mrf.mxu0 }
 0x111   : > { %v739_v63 = vmul.f32 %v5315_v60, %v674_v57  ;;  %v1535_v1 = vunpack.c.l.b16 %v958_v52  ;;  %v1632_v17 = vunpack.c.l.b16 %v1023_v10 }
 0x112   : > { %v1726_v2 = vunpack.c.l.b16 %v1085_v53  ;;  %v1727_v3 = vunpack.c.l.b16 %v1086_v54 }
 0x113   : > { %v775_v6 = vadd.f32 %v5322_v61, %v739_v63  ;;  %v5413_v7 = vpack.c.b16 %v1535_v1, %v1534_v58 }
 0x114   : > { %v1752_v8 = vpack.c.b16 %v1727_v3, %v1726_v2 }
 0x115   : > { %v807_v9 = vmax.f32 %v775_v6, 0.0  ;;  %2968 = vmatmul.bf16.gmra.mxu1 %v5413_v7 }
 0x116   : > { %3146 = vmatmul.bf16.gmra.mxu3 %v1752_v8  ;;  %v927_v16 = vld [vmem:[#allocation2 + $0xa8] sm:$0xff] }
 0x117   : > { %894 = vst [vmem:[#allocation2 + $0xb1] sm:$0xff] %v807_v9  ;;  %v1024_v12 = vpack.c.bf16 %v807_v9, %v807_v9  ;;  %v959_v21 = vpack.c.bf16 %v927_v16, %v927_v16 }
 0x118   : > { %v677_v14 = vpop.f32.mrf.mxu0 }
 0x119   : > { %v740_v15 = vmul.f32 %v5315_v60, %v677_v14  ;;  %v1633_v18 = vunpack.c.l.b16 %v1024_v12  ;;  %v1536_v32 = vunpack.c.l.b16 %v959_v21  ;;  %v4971_v14 = vld [vmem:[%s6446_s4 + $0x110] sm:$0xff]  ;;  %v5447_v21 = vpop.f32.mrf.mxu1 }
 0x11a   : > { %3291 = vmatpush.bf16.msrb.mxu1 %v4971_v14 }
 0x11b   : > { %v776_v19 = vadd.f32 %v5322_v61, %v740_v15  ;;  %716 = vmatmul.bf16.gmra.mxu0 %v4928_v11  ;;  %v1657_v20 = vpack.c.b16 %v1633_v18, %v1632_v17  ;;  %v5444_v15 = vpop.f32.mrf.mxu2 }
 0x11d   : > { %v808_v22 = vmax.f32 %v776_v19, 0.0  ;;  %3062 = vmatmul.bf16.gmra.mxu2 %v1657_v20 }
 0x11e   : > { %v928_v23 = vld [vmem:[#allocation2 + $0xb0] sm:$0xff] }
 0x11f   : > { %v1055_v24 = vld [vmem:[#allocation2 + $0xaa] sm:$0xff]  ;;  %v1056_v25 = vld [vmem:[#allocation2 + $0xb2] sm:$0xff]  ;;  %895 = vst [vmem:[#allocation2 + $0xc1] sm:$0xff] %v808_v22  ;;  %v960_v26 = vpack.c.bf16 %v928_v23, %v928_v23  ;;  %v1025_v42 = vpack.c.bf16 %v808_v22, %v808_v22 }
 0x120   : > { %v1087_v27 = vpack.c.bf16 %v1055_v24, %v1055_v24  ;;  %v1088_v28 = vpack.c.bf16 %v1056_v25, %v1056_v25  ;;  %v679_v29 = vpop.f32.mrf.mxu0 }
 0x121   : > { %v741_v33 = vmul.f32 %v5315_v60, %v679_v29  ;;  %v1537_v35 = vunpack.c.l.b16 %v960_v26  ;;  %v1634_v49 = vunpack.c.l.b16 %v1025_v42  ;;  %v5451_v29 = vpop.f32.mrf.mxu3 }
 0x122   : > { %v1728_v36 = vunpack.c.l.b16 %v1087_v27  ;;  %v1729_v37 = vunpack.c.l.b16 %v1088_v28 }
 0x123   : > { %v777_v38 = vadd.f32 %v5322_v61, %v741_v33  ;;  %v5424_v39 = vpack.c.b16 %v1537_v35, %v1536_v32 }
 0x124   : > { %v1753_v40 = vpack.c.b16 %v1729_v37, %v1728_v36 }
 0x125   : > { %v809_v41 = vmax.f32 %v777_v38, 0.0  ;;  %2973 = vmatmul.bf16.gmra.mxu1 %v5424_v39 }
 0x126   : > { %3151 = vmatmul.bf16.gmra.mxu3 %v1753_v40  ;;  %v929_v48 = vld [vmem:[#allocation2 + $0xc0] sm:$0xff] }
 0x127   : > { %896 = vst [vmem:[#allocation2 + $0xc9] sm:$0xff] %v809_v41  ;;  %v1026_v43 = vpack.c.bf16 %v809_v41, %v809_v41  ;;  %v961_v53 = vpack.c.bf16 %v929_v48, %v929_v48 }
 0x128   : > { %v682_v46 = vpop.f32.mrf.mxu0 }
 0x129   : > { %v742_v47 = vmul.f32 %v5315_v60, %v682_v46  ;;  %v1635_v50 = vunpack.c.l.b16 %v1026_v43  ;;  %v1538_v2 = vunpack.c.l.b16 %v961_v53 }
 0x12b   : > { %v778_v51 = vadd.f32 %v5322_v61, %v742_v47  ;;  %3205 = vmatmul.bf16.vlgmr.msrb.gmra.mxu0 %v5347_v34  ;;  %v1658_v52 = vpack.c.b16 %v1635_v50, %v1634_v49 }
 0x12d   : > { %v810_v54 = vmax.f32 %v778_v51, 0.0  ;;  %3067 = vmatmul.bf16.gmra.mxu2 %v1658_v52  ;;  %v4983_v51 = vld [vmem:[%s6446_s4 + $0x170] sm:$0xff] }
 0x12e   : > { %v930_v55 = vld [vmem:[#allocation2 + $0xc8] sm:$0xff]  ;;  %v4991_v52 = vld [vmem:[%s6446_s4 + $0x1b0] sm:$0xff]  ;;  %3376 = vmatpush.bf16.msrb.mxu2 %v4983_v51 }
 0x12f   : > { %v1057_v56 = vld [vmem:[#allocation2 + $0xc2] sm:$0xff]  ;;  %v1058_v57 = vld [vmem:[#allocation2 + $0xca] sm:$0xff]  ;;  %897 = vst [vmem:[#allocation2 + $0xd9] sm:$0xff] %v810_v54  ;;  %v962_v58 = vpack.c.bf16 %v930_v55, %v930_v55  ;;  %v1027_v12 = vpack.c.bf16 %v810_v54, %v810_v54  ;;  %3465 = vmatpush.bf16.msrb.mxu3 %v4991_v52 }
 0x130   : > { %v1089_v62 = vpack.c.bf16 %v1057_v56, %v1057_v56  ;;  %v1090_v63 = vpack.c.bf16 %v1058_v57, %v1058_v57  ;;  %v684_v1 = vpop.f32.mrf.mxu0 }
 0x131   : > { %v743_v3 = vmul.f32 %v5315_v60, %v684_v1  ;;  %v1539_v4 = vunpack.c.l.b16 %v962_v58  ;;  %v1636_v19 = vunpack.c.l.b16 %v1027_v12 }
 0x132   : > { %v1730_v6 = vunpack.c.l.b16 %v1089_v62  ;;  %v1731_v8 = vunpack.c.l.b16 %v1090_v63 }
 0x133   : > { %v779_v34 = vadd.f32 %v5322_v61, %v743_v3  ;;  %v5438_v9 = vpack.c.b16 %v1539_v4, %v1538_v2 }
 0x134   : > { %v1754_v10 = vpack.c.b16 %v1731_v8, %v1730_v6 }
 0x135   : > { %v811_v11 = vmax.f32 %v779_v34, 0.0  ;;  %2978 = vmatmul.bf16.gmra.mxu1 %v5438_v9 }
 0x136   : > { %3156 = vmatmul.bf16.gmra.mxu3 %v1754_v10  ;;  %v931_v18 = vld [vmem:[#allocation2 + $0xd8] sm:$0xff] }
 0x137   : > { %898 = vst [vmem:[#allocation2 + $0xe1] sm:$0xff] %v811_v11  ;;  %v1028_v13 = vpack.c.bf16 %v811_v11, %v811_v11  ;;  %v963_v24 = vpack.c.bf16 %v931_v18, %v931_v18 }
 0x138   : > { %v687_v16 = vpop.f32.mrf.mxu0 }
 0x139   : > { %v744_v17 = vmul.f32 %v5315_v60, %v687_v16  ;;  %v1637_v20 = vunpack.c.l.b16 %v1028_v13  ;;  %v1540_v37 = vunpack.c.l.b16 %v963_v24 }
 0x13b   : > { %v780_v22 = vadd.f32 %v5322_v61, %v744_v17  ;;  %3210 = vmatmul.bf16.gmra.mxu0 %v5355_v0  ;;  %v1659_v23 = vpack.c.b16 %v1637_v20, %v1636_v19 }
 0x13d   : > { %v812_v25 = vmax.f32 %v780_v22, 0.0  ;;  %3072 = vmatmul.bf16.gmra.mxu2 %v1659_v23 }
 0x13e   : > { %v932_v26 = vld [vmem:[#allocation2 + $0xe0] sm:$0xff] }
 0x13f   : > { %v1059_v27 = vld [vmem:[#allocation2 + $0xda] sm:$0xff]  ;;  %v1060_v28 = vld [vmem:[#allocation2 + $0xe2] sm:$0xff]  ;;  %899 = vst [vmem:[#allocation2 + $0xf1] sm:$0xff] %v812_v25  ;;  %v964_v32 = vpack.c.bf16 %v932_v26, %v932_v26  ;;  %v1029_v49 = vpack.c.bf16 %v812_v25, %v812_v25 }
 0x140   : > { %v1091_v33 = vpack.c.bf16 %v1059_v27, %v1059_v27  ;;  %v1092_v35 = vpack.c.bf16 %v1060_v28, %v1060_v28  ;;  %v689_v36 = vpop.f32.mrf.mxu0  ;;  %v3033_v38 = vpop.f32.mrf.mxu2 }
 0x141   : > { %v745_v40 = vmul.f32 %v5315_v60, %v689_v36  ;;  %v1541_v41 = vunpack.c.l.b16 %v964_v32  ;;  %v1638_v62 = vunpack.c.l.b16 %v1029_v49 }
 0x142   : > { %v1732_v0 = vunpack.c.l.b16 %v1091_v33  ;;  %v1733_v42 = vunpack.c.l.b16 %v1092_v35  ;;  %v2944_v43 = vpop.f32.mrf.mxu1 }
 0x143   : > { %v781_v44 = vadd.f32 %v5322_v61, %v745_v40  ;;  %v5455_v45 = vpack.c.b16 %v1541_v41, %v1540_v37  ;;  %v3034_v47 = vadd.f32 %v3033_v38, %v2944_v43  ;;  %v4970_v37 = vld [vmem:[%s6446_s4 + $0x108] sm:$0xff] }
 0x144   : > { %v1755_v46 = vpack.c.b16 %v1733_v42, %v1732_v0  ;;  %3292 = vmatpush.bf16.msrb.mxu1 %v4970_v37 }
 0x145   : > { %v813_v48 = vmax.f32 %v781_v44, 0.0  ;;  %2983 = vmatmul.bf16.gmra.mxu1 %v5455_v45 }
 0x146   : > { %3161 = vmatmul.bf16.gmra.mxu3 %v1755_v46  ;;  %v933_v58 = vld [vmem:[#allocation2 + $0xf0] sm:$0xff] }
 0x147   : > { %900 = vst [vmem:[#allocation2 + $0xf9] sm:$0xff] %v813_v48  ;;  %v1030_v50 = vpack.c.bf16 %v813_v48, %v813_v48  ;;  %v965_v6 = vpack.c.bf16 %v933_v58, %v933_v58 }
 0x148   : > { %v692_v53 = vpop.f32.mrf.mxu0  ;;  %v3035_v57 = vpop.f32.mrf.mxu2 }
 0x149   : > { %v3122_v54 = vpop.f32.mrf.mxu3  ;;  %v746_v55 = vmul.f32 %v5315_v60, %v692_v53  ;;  %v1639_v63 = vunpack.c.l.b16 %v1030_v50  ;;  %v1542_v18 = vunpack.c.l.b16 %v965_v6 }
 0x14a   : > { %v5465_v56 = vadd.f32 %v3122_v54, %v3034_v47  ;;  %v2946_v1 = vpop.f32.mrf.mxu1 }
 0x14b   : > { %v782_v2 = vadd.f32 %v5322_v61, %v746_v55  ;;  %3215 = vmatmul.bf16.gmra.mxu0 %v5369_v30  ;;  %v3036_v3 = vadd.f32 %v3035_v57, %v2946_v1  ;;  %v1660_v4 = vpack.c.b16 %v1639_v63, %v1638_v62 }
 0x14d   : > { %v814_v8 = vmax.f32 %v782_v2, 0.0  ;;  %3077 = vmatmul.bf16.gmra.mxu2 %v1660_v4 }
 0x14e   : > { %v934_v34 = vld [vmem:[#allocation2 + $0xf8] sm:$0xff] }
 0x14f   : > { %v1061_v10 = vld [vmem:[#allocation2 + $0xf2] sm:$0xff]  ;;  %v1062_v11 = vld [vmem:[#allocation2 + $0xfa] sm:$0xff]  ;;  %901 = vst [vmem:[#allocation2 + $0x109] sm:$0xff] %v814_v8  ;;  %v966_v12 = vpack.c.bf16 %v934_v34, %v934_v34  ;;  %v1031_v35 = vpack.c.bf16 %v814_v8, %v814_v8 }
 0x150   : > { %v1093_v13 = vpack.c.bf16 %v1061_v10, %v1061_v10  ;;  %v1094_v14 = vpack.c.bf16 %v1062_v11, %v1062_v11  ;;  %v694_v16 = vpop.f32.mrf.mxu0  ;;  %v3038_v23 = vpop.f32.mrf.mxu2 }
 0x151   : > { %v3124_v17 = vpop.f32.mrf.mxu3  ;;  %v747_v19 = vmul.f32 %v5315_v60, %v694_v16  ;;  %v1543_v30 = vunpack.c.l.b16 %v966_v12  ;;  %v1640_v44 = vunpack.c.l.b16 %v1031_v35 }
 0x152   : > { %v5470_v20 = vadd.f32 %v3124_v17, %v3036_v3  ;;  %v1734_v22 = vunpack.c.l.b16 %v1093_v13  ;;  %v2949_v24 = vpop.f32.mrf.mxu1  ;;  %v1735_v25 = vunpack.c.l.b16 %v1094_v14 }
 0x153   : > { %v783_v26 = vadd.f32 %v5322_v61, %v747_v19  ;;  %v5473_v27 = vpack.c.b16 %v1543_v30, %v1542_v18  ;;  %v3039_v28 = vadd.f32 %v3038_v23, %v2949_v24  ;;  %v4982_v19 = vld [vmem:[%s6446_s4 + $0x168] sm:$0xff] }
 0x154   : > { %v1756_v32 = vpack.c.b16 %v1735_v25, %v1734_v22  ;;  %v4990_v30 = vld [vmem:[%s6446_s4 + $0x1a8] sm:$0xff]  ;;  %3377 = vmatpush.bf16.msrb.mxu2 %v4982_v19 }
 0x155   : > { %v815_v33 = vmax.f32 %v783_v26, 0.0  ;;  %2988 = vmatmul.bf16.gmra.mxu1 %v5473_v27  ;;  %3466 = vmatpush.bf16.msrb.mxu3 %v4990_v30  ;;  %v5521_v30 = vld [vmem:[%s6445_s3] ss:$0 sm:$0xff] }
 0x156   : > { %3166 = vmatmul.bf16.gmra.mxu3 %v1756_v32  ;;  %v935_v43 = vld [vmem:[#allocation2 + $0x108] sm:$0xff] }
 0x157   : > { %902 = vst [vmem:[#allocation2 + $0x111] sm:$0xff] %v815_v33  ;;  %v1032_v36 = vpack.c.bf16 %v815_v33, %v815_v33  ;;  %v967_v51 = vpack.c.bf16 %v935_v43, %v935_v43 }
 0x158   : > { %v697_v38 = vpop.f32.mrf.mxu0  ;;  %v3040_v42 = vpop.f32.mrf.mxu2 }
 0x159   : > { %v3127_v40 = vpop.f32.mrf.mxu3  ;;  %v748_v41 = vmul.f32 %v5315_v60, %v697_v38  ;;  %v1641_v46 = vunpack.c.l.b16 %v1032_v36  ;;  %v1544_v2 = vunpack.c.l.b16 %v967_v51 }
 0x15a   : > { %v5480_v0 = vadd.f32 %v3127_v40, %v3039_v28  ;;  %v2951_v47 = vpop.f32.mrf.mxu1 }
 0x15b   : > { %v784_v48 = vadd.f32 %v5322_v61, %v748_v41  ;;  %3220 = vmatmul.bf16.gmra.mxu0 %v5377_v59  ;;  %v3041_v49 = vadd.f32 %v3040_v42, %v2951_v47  ;;  %v1661_v50 = vpack.c.b16 %v1641_v46, %v1640_v44 }
 0x15d   : > { %v816_v52 = vmax.f32 %v784_v48, 0.0  ;;  %3082 = vmatmul.bf16.gmra.mxu2 %v1661_v50 }
 0x15e   : > { %v936_v53 = vld [vmem:[#allocation2 + $0x110] sm:$0xff] }
 0x15f   : > { %v1063_v54 = vld [vmem:[#allocation2 + $0x10a] sm:$0xff]  ;;  %v1064_v55 = vld [vmem:[#allocation2 + $0x112] sm:$0xff]  ;;  %903 = vst [vmem:[#allocation2 + $0x121] sm:$0xff] %v816_v52  ;;  %v968_v57 = vpack.c.bf16 %v936_v53, %v936_v53  ;;  %v1033_v17 = vpack.c.bf16 %v816_v52, %v816_v52 }
 0x160   : > { %v1095_v58 = vpack.c.bf16 %v1063_v54, %v1063_v54  ;;  %v1096_v62 = vpack.c.bf16 %v1064_v55, %v1064_v55  ;;  %v699_v63 = vpop.f32.mrf.mxu0  ;;  %v3043_v8 = vpop.f32.mrf.mxu2 }
 0x161   : > { %v3129_v1 = vpop.f32.mrf.mxu3  ;;  %v749_v3 = vmul.f32 %v5315_v60, %v699_v63  ;;  %v1545_v59 = vunpack.c.l.b16 %v968_v57  ;;  %v1642_v32 = vunpack.c.l.b16 %v1033_v17 }
 0x162   : > { %v5485_v4 = vadd.f32 %v3129_v1, %v3041_v49  ;;  %v1736_v6 = vunpack.c.l.b16 %v1095_v58  ;;  %v2954_v34 = vpop.f32.mrf.mxu1  ;;  %v1737_v10 = vunpack.c.l.b16 %v1096_v62 }
 0x163   : > { %v785_v11 = vadd.f32 %v5322_v61, %v749_v3  ;;  %v5488_v12 = vpack.c.b16 %v1545_v59, %v1544_v2  ;;  %v3044_v13 = vadd.f32 %v3043_v8, %v2954_v34  ;;  %v4969_v8 = vld [vmem:[%s6446_s4 + $0x100] sm:$0xff] }
 0x164   : > { %v1757_v14 = vpack.c.b16 %v1737_v10, %v1736_v6  ;;  %3293 = vmatpush.bf16.msrb.mxu1 %v4969_v8 }
 0x165   : > { %v817_v16 = vmax.f32 %v785_v11, 0.0  ;;  %2993 = vmatmul.bf16.gmra.mxu1 %v5488_v12 }
 0x166   : > { %3171 = vmatmul.bf16.gmra.mxu3 %v1757_v14  ;;  %v937_v28 = vld [vmem:[#allocation2 + $0x120] sm:$0xff] }
 0x167   : > { %904 = vst [vmem:[#allocation2 + $0x129] sm:$0xff] %v817_v16  ;;  %v1034_v18 = vpack.c.bf16 %v817_v16, %v817_v16  ;;  %v969_v40 = vpack.c.bf16 %v937_v28, %v937_v28  ;;  %v4980_v28 = vld [vmem:[%s6446_s4 + $0x158] sm:$0xff] }
 0x168   : > { %v702_v22 = vpop.f32.mrf.mxu0  ;;  %v3045_v26 = vpop.f32.mrf.mxu2 }
 0x169   : > { %v3132_v23 = vpop.f32.mrf.mxu3  ;;  %v750_v24 = vmul.f32 %v5315_v60, %v702_v22  ;;  %v1643_v33 = vunpack.c.l.b16 %v1034_v18  ;;  %v1546_v51 = vunpack.c.l.b16 %v969_v40  ;;  %v4981_v18 = vld [vmem:[%s6446_s4 + $0x160] sm:$0xff] }
 0x16a   : > { %v5498_v25 = vadd.f32 %v3132_v23, %v3044_v13  ;;  %v2956_v35 = vpop.f32.mrf.mxu1  ;;  %3378 = vmatpush.bf16.msrb.mxu2 %v4981_v18 }
 0x16b   : > { %v786_v36 = vadd.f32 %v5322_v61, %v750_v24  ;;  %3225 = vmatmul.bf16.gmra.mxu0 %v5397_v31  ;;  %v3046_v37 = vadd.f32 %v3045_v26, %v2956_v35  ;;  %v1662_v38 = vpack.c.b16 %v1643_v33, %v1642_v32 }
 0x16d   : > { %v818_v41 = vmax.f32 %v786_v36, 0.0  ;;  %3087 = vmatmul.bf16.gmra.mxu2 %v1662_v38 }
 0x16e   : > { %v938_v42 = vld [vmem:[#allocation2 + $0x128] sm:$0xff]  ;;  %3379 = vmatpush.bf16.msrb.mxu2 %v4980_v28 }
 0x16f   : > { %v1065_v43 = vld [vmem:[#allocation2 + $0x122] sm:$0xff]  ;;  %v1066_v44 = vld [vmem:[#allocation2 + $0x12a] sm:$0xff]  ;;  %905 = vst [vmem:[#allocation2 + $0x139] sm:$0xff] %v818_v41  ;;  %v970_v46 = vpack.c.bf16 %v938_v42, %v938_v42  ;;  %v1035_v59 = vpack.c.bf16 %v818_v41, %v818_v41  ;;  %v5531_v42 = vld [vmem:[%s6444_s2] ss:$0 sm:$0xff] }
 0x170   : > { %v1097_v47 = vpack.c.bf16 %v1065_v43, %v1065_v43  ;;  %v1098_v48 = vpack.c.bf16 %v1066_v44, %v1066_v44  ;;  %v704_v49 = vpop.f32.mrf.mxu0  ;;  %v3048_v55 = vpop.f32.mrf.mxu2 }
 0x171   : > { %v3134_v50 = vpop.f32.mrf.mxu3  ;;  %v751_v52 = vmul.f32 %v5315_v60, %v704_v49  ;;  %v1547_v31 = vunpack.c.l.b16 %v970_v46  ;;  %v1644_v16 = vunpack.c.l.b16 %v1035_v59  ;;  %v4989_v49 = vld [vmem:[%s6446_s4 + $0x1a0] sm:$0xff] }
 0x172   : > { %v5503_v53 = vadd.f32 %v3134_v50, %v3046_v37  ;;  %v1738_v54 = vunpack.c.l.b16 %v1097_v47  ;;  %v2959_v57 = vpop.f32.mrf.mxu1  ;;  %v1739_v58 = vunpack.c.l.b16 %v1098_v48  ;;  %v4979_v50 = vld [vmem:[%s6446_s4 + $0x150] sm:$0xff]  ;;  %3467 = vmatpush.bf16.msrb.mxu3 %v4989_v49 }
 0x173   : > { %v787_v62 = vadd.f32 %v5322_v61, %v751_v52  ;;  %v5506_v63 = vpack.c.b16 %v1547_v31, %v1546_v51  ;;  %v3049_v1 = vadd.f32 %v3048_v55, %v2959_v57  ;;  %3380 = vmatpush.bf16.msrb.mxu2 %v4979_v50 }
 0x174   : > { %v1758_v2 = vpack.c.b16 %v1739_v58, %v1738_v54 }
 0x175   : > { %v819_v3 = vmax.f32 %v787_v62, 0.0  ;;  %2998 = vmatmul.bf16.gmra.mxu1 %v5506_v63 }
 0x176   : > { %3176 = vmatmul.bf16.gmra.mxu3 %v1758_v2  ;;  %v939_v14 = vld [vmem:[#allocation2 + $0x138] sm:$0xff]  ;;  %v4978_v2 = vld [vmem:[%s6446_s4 + $0x148] sm:$0xff] }
 0x177   : > { %906 = vst [vmem:[#allocation2 + $0x141] sm:$0xff] %v819_v3  ;;  %v1036_v6 = vpack.c.bf16 %v819_v3, %v819_v3  ;;  %v971_v24 = vpack.c.bf16 %v939_v14, %v939_v14  ;;  %3381 = vmatpush.bf16.msrb.mxu2 %v4978_v2 }
 0x178   : > { %v707_v34 = vpop.f32.mrf.mxu0  ;;  %v3050_v13 = vpop.f32.mrf.mxu2 }
 0x179   : > { %v3137_v10 = vpop.f32.mrf.mxu3  ;;  %v752_v11 = vmul.f32 %v5315_v60, %v707_v34  ;;  %v1645_v17 = vunpack.c.l.b16 %v1036_v6 }
 0x17a   : > { %v5513_v61 = vadd.f32 %v3137_v10, %v3049_v1  ;;  %v2961_v19 = vpop.f32.mrf.mxu1  ;;  %v4988_v1 = vld [vmem:[%s6446_s4 + $0x198] sm:$0xff] }
 0x17b   : > { %v788_v22 = vadd.f32 %v5521_v30, %v752_v11  ;;  %3230 = vmatmul.bf16.gmra.mxu0 %v5413_v7  ;;  %v3051_v60 = vadd.f32 %v3050_v13, %v2961_v19  ;;  %v1663_v23 = vpack.c.b16 %v1645_v17, %v1644_v16  ;;  %v1548_v7 = vunpack.c.l.b16 %v971_v24  ;;  %3468 = vmatpush.bf16.msrb.mxu3 %v4988_v1  ;;  %v4987_v16 = vld [vmem:[%s6446_s4 + $0x190] sm:$0xff]  ;;  %v4977_v17 = vld [vmem:[%s6446_s4 + $0x140] sm:$0xff]  ;;  %v4986_v24 = vld [vmem:[%s6446_s4 + $0x188] sm:$0xff] }
 0x17c   : > { %3382 = vmatpush.bf16.msrb.mxu2 %v4977_v17  ;;  %v5008_v1 = vld [vmem:[%s6446_s4 + $0x238] sm:$0xff] }
 0x17d   : > { %v820_v26 = vmax.f32 %v788_v22, 0.0  ;;  %3092 = vmatmul.bf16.gmra.mxu2 %v1663_v23  ;;  %3642 = vmatpush.bf16.msra.mxu1 %v5008_v1 }
 0x17e   : > { %v940_v32 = vld [vmem:[#allocation2 + $0x140] sm:$0xff] }
 0x17f   : > { %v1067_v33 = vld [vmem:[#allocation2 + $0x13a] sm:$0xff]  ;;  %v1068_v35 = vld [vmem:[#allocation2 + $0x142] sm:$0xff]  ;;  %907 = vst [vmem:[#allocation2 + $0x151] sm:$0xff] %v820_v26  ;;  %v972_v36 = vpack.c.bf16 %v940_v32, %v940_v32  ;;  %v1037_v62 = vpack.c.bf16 %v820_v26, %v820_v26  ;;  %3469 = vmatpush.bf16.msrb.mxu3 %v4987_v16 }
 0x180   : > { %v1099_v37 = vpack.c.bf16 %v1067_v33, %v1067_v33  ;;  %v1100_v38 = vpack.c.bf16 %v1068_v35, %v1068_v35  ;;  %v709_v40 = vpop.f32.mrf.mxu0  ;;  %v3053_v48 = vpop.f32.mrf.mxu2 }
 0x181   : > { %v3139_v41 = vpop.f32.mrf.mxu3  ;;  %v753_v43 = vmul.f32 %v5531_v42, %v709_v40  ;;  %v1549_v46 = vunpack.c.l.b16 %v972_v36  ;;  %v1646_v13 = vunpack.c.l.b16 %v1037_v62 }
 0x182   : > { %v5534_v44 = vadd.f32 %v3139_v41, %v3051_v60  ;;  %v1740_v47 = vunpack.c.l.b16 %v1099_v37  ;;  %v2964_v51 = vpop.f32.mrf.mxu1  ;;  %v1741_v52 = vunpack.c.l.b16 %v1100_v38 }
 0x183   : > { %v789_v31 = vadd.f32 %v5521_v30, %v753_v43  ;;  %v5543_v54 = vpack.c.b16 %v1549_v46, %v1548_v7  ;;  %v3054_v55 = vadd.f32 %v3053_v48, %v2964_v51  ;;  %3470 = vmatpush.bf16.msrb.mxu3 %v4986_v24  ;;  %v4985_v48 = vld [vmem:[%s6446_s4 + $0x180] sm:$0xff]  ;;  %v5000_v51 = vld [vmem:[%s6446_s4 + $0x1f8] sm:$0xff] }
 0x184   : > { %v1759_v57 = vpack.c.b16 %v1741_v52, %v1740_v47  ;;  %3553 = vmatpush.bf16.msra.mxu0 %v5000_v51 }
 0x185   : > { %v821_v58 = vmax.f32 %v789_v31, 0.0  ;;  %3003 = vmatmul.bf16.gmra.mxu1 %v5543_v54 }
 0x186   : > { %3181 = vmatmul.bf16.gmra.mxu3 %v1759_v57  ;;  %v941_v11 = vld [vmem:[#allocation2 + $0x150] sm:$0xff] }
 0x187   : > { %908 = vst [vmem:[#allocation2 + $0x159] sm:$0xff] %v821_v58  ;;  %v1038_v3 = vpack.c.bf16 %v821_v58, %v821_v58  ;;  %v973_v23 = vpack.c.bf16 %v941_v11, %v941_v11  ;;  %3471 = vmatpush.bf16.msrb.mxu3 %v4985_v48 }
 0x188   : > { %v712_v59 = vpop.f32.mrf.mxu0  ;;  %v3055_v10 = vpop.f32.mrf.mxu2 }
 0x189   : > { %v3142_v6 = vpop.f32.mrf.mxu3  ;;  %v754_v8 = vmul.f32 %v5531_v42, %v712_v59  ;;  %v1647_v14 = vunpack.c.l.b16 %v1038_v3  ;;  %v1550_v40 = vunpack.c.l.b16 %v973_v23 }
 0x18a   : > { %v5553_v34 = vadd.f32 %v3142_v6, %v3054_v55  ;;  %v2966_v18 = vpop.f32.mrf.mxu1 }
 0x18b   : > { %v790_v19 = vadd.f32 %v5521_v30, %v754_v8  ;;  %3235 = vmatmul.bf16.gmra.mxu0 %v5424_v39  ;;  %v3056_v22 = vadd.f32 %v3055_v10, %v2966_v18  ;;  %v1664_v60 = vpack.c.b16 %v1647_v14, %v1646_v13 }
 0x18d   : > { %v822_v26 = vmax.f32 %v790_v19, 0.0  ;;  %3097 = vmatmul.bf16.gmra.mxu2 %v1664_v60 }
 0x18e   : > { %v942_v28 = vld [vmem:[#allocation2 + $0x158] sm:$0xff] }
 0x18f   : > { %v1069_v32 = vld [vmem:[#allocation2 + $0x152] sm:$0xff]  ;;  %v1070_v33 = vld [vmem:[#allocation2 + $0x15a] sm:$0xff]  ;;  %909 = vst [vmem:[#allocation2 + $0x169] sm:$0xff] %v822_v26  ;;  %v974_v35 = vpack.c.bf16 %v942_v28, %v942_v28  ;;  %v1039_v62 = vpack.c.bf16 %v822_v26, %v822_v26 }
 0x190   : > { %v1101_v36 = vpack.c.bf16 %v1069_v32, %v1069_v32  ;;  %v1102_v37 = vpack.c.bf16 %v1070_v33, %v1070_v33  ;;  %v714_v38 = vpop.f32.mrf.mxu0  ;;  %v3058_v47 = vpop.f32.mrf.mxu2 }
 0x191   : > { %v3144_v39 = vpop.f32.mrf.mxu3  ;;  %v755_v41 = vmul.f32 %v5531_v42, %v714_v38  ;;  %v1551_v43 = vunpack.c.l.b16 %v974_v35  ;;  %v1648_v13 = vunpack.c.l.b16 %v1039_v62  ;;  %v1233_v35 = vld [vmem:[#allocation2 + $0x1a] sm:$0xff] }
 0x192   : > { %v5567_v7 = vadd.f32 %v3144_v39, %v3056_v22  ;;  %v1742_v46 = vunpack.c.l.b16 %v1101_v36  ;;  %v2969_v49 = vpop.f32.mrf.mxu1  ;;  %v1743_v50 = vunpack.c.l.b16 %v1102_v37  ;;  %v1234_v39 = vld [vmem:[#allocation2 + $0x22] sm:$0xff] }
 0x193   : > { %v791_v52 = vadd.f32 %v5521_v30, %v755_v41  ;;  %v5576_v31 = vpack.c.b16 %v1551_v43, %v1550_v40  ;;  %v3059_v55 = vadd.f32 %v3058_v47, %v2969_v49  ;;  %v1265_v49 = vpack.c.bf16 %v1233_v35, %v1233_v35 }
 0x194   : > { %v1760_v57 = vpack.c.b16 %v1743_v50, %v1742_v46 }
 0x195   : > { %v823_v58 = vmax.f32 %v791_v52, 0.0  ;;  %3008 = vmatmul.bf16.gmra.mxu1 %v5576_v31 }
 0x196   : > { %3186 = vmatmul.bf16.gmra.mxu3 %v1760_v57  ;;  %v943_v11 = vld [vmem:[#allocation2 + $0x168] sm:$0xff] }
 0x197   : > { %910 = vst [vmem:[#allocation2 + $0x171] sm:$0xff] %v823_v58  ;;  %v1040_v2 = vpack.c.bf16 %v823_v58, %v823_v58  ;;  %v975_v22 = vpack.c.bf16 %v943_v11, %v943_v11 }
 0x198   : > { %v717_v3 = vpop.f32.mrf.mxu0  ;;  %v3060_v10 = vpop.f32.mrf.mxu2 }
 0x199   : > { %v3147_v59 = vpop.f32.mrf.mxu3  ;;  %v756_v6 = vmul.f32 %v5531_v42, %v717_v3  ;;  %v1649_v14 = vunpack.c.l.b16 %v1040_v2  ;;  %v1552_v38 = vunpack.c.l.b16 %v975_v22  ;;  %v1170_v3 = vld [vmem:[#allocation2 + $0x21] sm:$0xff] }
 0x19a   : > { %v5583_v8 = vadd.f32 %v3147_v59, %v3059_v55  ;;  %v2971_v16 = vpop.f32.mrf.mxu1  ;;  %v1266_v55 = vpack.c.bf16 %v1234_v39, %v1234_v39 }
 0x19b   : > { %v792_v17 = vadd.f32 %v5521_v30, %v756_v6  ;;  %3240 = vmatmul.bf16.gmra.mxu0 %v5438_v9  ;;  %v3061_v18 = vadd.f32 %v3060_v10, %v2971_v16  ;;  %v1665_v19 = vpack.c.b16 %v1649_v14, %v1648_v13  ;;  %v1299_v10 = vld [vmem:[#allocation2 + $0x38] sm:$0xff]  ;;  %v1202_v16 = vpack.c.bf16 %v1170_v3, %v1170_v3 }
 0x19c   : > { %v2003_v62 = vunpack.c.l.b16 %v1266_v55  ;;  %v1169_v13 = vld [vmem:[#allocation2 + $0x19] sm:$0xff] }
 0x19d   : > { %v824_v60 = vmax.f32 %v792_v17, 0.0  ;;  %3102 = vmatmul.bf16.gmra.mxu2 %v1665_v19  ;;  %v1331_v19 = vpack.c.bf16 %v1299_v10, %v1299_v10  ;;  %v1201_v22 = vpack.c.bf16 %v1169_v13, %v1169_v13  ;;  %v1172_v55 = vld [vmem:[#allocation2 + $0x39] sm:$0xff] }
 0x19e   : > { %v944_v23 = vld [vmem:[#allocation2 + $0x170] sm:$0xff] }
 0x19f   : > { %v1071_v24 = vld [vmem:[#allocation2 + $0x16a] sm:$0xff]  ;;  %v1072_v26 = vld [vmem:[#allocation2 + $0x172] sm:$0xff]  ;;  %911 = vst [vmem:[#allocation2 + $0x181] sm:$0xff] %v824_v60  ;;  %v976_v28 = vpack.c.bf16 %v944_v23, %v944_v23  ;;  %v1907_v23 = vunpack.c.l.b16 %v1202_v16  ;;  %v1906_v35 = vunpack.c.l.b16 %v1201_v22 }
 0x1a0   : > { %v1103_v32 = vpack.c.bf16 %v1071_v24, %v1071_v24  ;;  %v1104_v33 = vpack.c.bf16 %v1072_v26, %v1072_v26  ;;  %v719_v36 = vpop.f32.mrf.mxu0  ;;  %v3063_v46 = vpop.f32.mrf.mxu2 }
 0x1a1   : > { %v3149_v37 = vpop.f32.mrf.mxu3  ;;  %v757_v40 = vmul.f32 %v5531_v42, %v719_v36  ;;  %v1553_v41 = vunpack.c.l.b16 %v976_v28  ;;  %v2002_v42 = vunpack.c.l.b16 %v1265_v49  ;;  %v1235_v28 = vld [vmem:[#allocation2 + $0x32] sm:$0xff]  ;;  %v1938_v39 = vpack.c.b16 %v1907_v23, %v1906_v35 }
 0x1a2   : > { %v5588_v9 = vadd.f32 %v3149_v37, %v3061_v18  ;;  %v1744_v43 = vunpack.c.l.b16 %v1103_v32  ;;  %v2974_v47 = vpop.f32.mrf.mxu1  ;;  %v1745_v48 = vunpack.c.l.b16 %v1104_v33  ;;  %v1298_v18 = vld [vmem:[#allocation2 + $0x30] sm:$0xff]  ;;  %v1236_v32 = vld [vmem:[#allocation2 + $0x3a] sm:$0xff] }
 0x1a3   : > { %v793_v50 = vadd.f32 %v5521_v30, %v757_v40  ;;  %v5591_v51 = vpack.c.b16 %v1553_v41, %v1552_v38  ;;  %v3064_v52 = vadd.f32 %v3063_v46, %v2974_v47  ;;  %v2034_v17 = vpack.c.b16 %v2003_v62, %v2002_v42  ;;  %v4999_v38 = vld [vmem:[%s6446_s4 + $0x1f0] sm:$0xff] }
 0x1a4   : > { %v1761_v57 = vpack.c.b16 %v1745_v48, %v1744_v43  ;;  %v1330_v60 = vpack.c.bf16 %v1298_v18, %v1298_v18  ;;  %v1267_v41 = vpack.c.bf16 %v1235_v28, %v1235_v28  ;;  %v1268_v43 = vpack.c.bf16 %v1236_v32, %v1236_v32  ;;  %3554 = vmatpush.bf16.msra.mxu0 %v4999_v38  ;;  %v5007_v47 = vld [vmem:[%s6446_s4 + $0x230] sm:$0xff] }
 0x1a5   : > { %v825_v58 = vmax.f32 %v793_v50, 0.0  ;;  %3013 = vmatmul.bf16.gmra.mxu1 %v5591_v51  ;;  %v1301_v62 = vld [vmem:[#allocation2 + $0x50] sm:$0xff] }
 0x1a6   : > { %3191 = vmatmul.bf16.gmra.mxu3 %v1761_v57  ;;  %v2098_v37 = vunpack.c.l.b16 %v1330_v60  ;;  %v2004_v48 = vunpack.c.l.b16 %v1267_v41  ;;  %v2005_v49 = vunpack.c.l.b16 %v1268_v43  ;;  %3643 = vmatpush.bf16.msra.mxu1 %v5007_v47  ;;  %v1333_v13 = vpack.c.bf16 %v1301_v62, %v1301_v62  ;;  %v1238_v60 = vld [vmem:[#allocation2 + $0x52] sm:$0xff] }
 0x1a7   : > { %912 = vst [vmem:[#allocation2 + $0x189] sm:$0xff] %v825_v58 }
 0x1a8   : > { %v3206_v2 = vpop.f32.mrf.mxu0  ;;  %v3065_v30 = vpop.f32.mrf.mxu2  ;;  %v2035_v10 = vpack.c.b16 %v2005_v49, %v2004_v48  ;;  %v2101_v22 = vunpack.c.l.b16 %v1333_v13  ;;  %v1303_v49 = vld [vmem:[#allocation2 + $0x68] sm:$0xff] }
 0x1a9   : > { %v3152_v1 = vpop.f32.mrf.mxu3  ;;  %v5597_v6 = vadd.f32 %v3206_v2, %v5410_v5  ;;  %v2099_v5 = vunpack.c.l.b16 %v1331_v19  ;;  %v1171_v2 = vld [vmem:[#allocation2 + $0x31] sm:$0xff] }
 0x1aa   : > { %v5594_v59 = vadd.f32 %v3152_v1, %v3064_v52  ;;  %v2976_v11 = vpop.f32.mrf.mxu1 }
 0x1ab   : > { %3245 = vmatmul.bf16.gmra.mxu0 %v5455_v45  ;;  %v3066_v14 = vadd.f32 %v3065_v30, %v2976_v11  ;;  %v2130_v46 = vpack.c.b16 %v2099_v5, %v2098_v37  ;;  %v1204_v30 = vpack.c.bf16 %v1172_v55, %v1172_v55  ;;  %v1300_v11 = vld [vmem:[#allocation2 + $0x48] sm:$0xff]  ;;  %v1270_v37 = vpack.c.bf16 %v1238_v60, %v1238_v60 }
 0x1ac   : > { %v1332_v16 = vpack.c.bf16 %v1300_v11, %v1300_v11  ;;  %v4998_v60 = vld [vmem:[%s6446_s4 + $0x1e8] sm:$0xff] }
 0x1ad   : > { %3383 = vmatmul.bf16.vlgmr.msrb.gmra.mxu2 %v2034_v17  ;;  %v1909_v17 = vunpack.c.l.b16 %v1204_v30  ;;  %3555 = vmatpush.bf16.msra.mxu0 %v4998_v60 }
 0x1ae   : > { %v2100_v32 = vunpack.c.l.b16 %v1332_v16  ;;  %v1240_v16 = vld [vmem:[#allocation2 + $0x6a] sm:$0xff] }
 0x1b0   : > { %v5600_v26 = vpop.f32.mrf.mxu0  ;;  %v3068_v36 = vpop.f32.mrf.mxu2  ;;  %v2131_v38 = vpack.c.b16 %v2101_v22, %v2100_v32  ;;  %v1272_v32 = vpack.c.bf16 %v1240_v16, %v1240_v16 }
 0x1b1   : > { %v3154_v24 = vpop.f32.mrf.mxu3 }
 0x1b2   : > { %v5602_v33 = vadd.f32 %v3154_v24, %v3066_v14  ;;  %v2979_v45 = vpop.f32.mrf.mxu1  ;;  %v1203_v14 = vpack.c.bf16 %v1171_v2, %v1171_v2  ;;  %v1335_v2 = vpack.c.bf16 %v1303_v49, %v1303_v49 }
 0x1b3   : > { %v3069_v40 = vadd.f32 %v3068_v36, %v2979_v45 }
 0x1b5   : > { %3294 = vmatmul.bf16.vlgmr.msrb.gmra.mxu1 %v1938_v39 }
 0x1b6   : > { %3472 = vmatmul.bf16.vlgmr.msrb.gmra.mxu3 %v2130_v46  ;;  %v1174_v46 = vld [vmem:[#allocation2 + $0x51] sm:$0xff] }
 0x1b8   : > { %v3211_v52 = vpop.f32.mrf.mxu0  ;;  %v3070_v42 = vpop.f32.mrf.mxu2 }
 0x1b9   : > { %v3157_v50 = vpop.f32.mrf.mxu3  ;;  %v5613_v58 = vadd.f32 %v3211_v52, %v5465_v56  ;;  %v1237_v56 = vld [vmem:[#allocation2 + $0x4a] sm:$0xff] }
 0x1ba   : > { %v5610_v57 = vadd.f32 %v3157_v50, %v3069_v40  ;;  %v2981_v1 = vpop.f32.mrf.mxu1  ;;  %v1269_v45 = vpack.c.bf16 %v1237_v56, %v1237_v56  ;;  %v2007_v40 = vunpack.c.l.b16 %v1270_v37  ;;  %v1173_v52 = vld [vmem:[#allocation2 + $0x49] sm:$0xff]  ;;  %v2009_v37 = vunpack.c.l.b16 %v1272_v32 }
 0x1bb   : > { %3250 = vmatmul.bf16.gmra.mxu0 %v5473_v27  ;;  %v3071_v3 = vadd.f32 %v3070_v42, %v2981_v1  ;;  %v1908_v27 = vunpack.c.l.b16 %v1203_v14  ;;  %v1206_v42 = vpack.c.bf16 %v1174_v46, %v1174_v46  ;;  %v1302_v1 = vld [vmem:[#allocation2 + $0x60] sm:$0xff]  ;;  %v2103_v14 = vunpack.c.l.b16 %v1335_v2 }
 0x1bc   : > { %v2006_v39 = vunpack.c.l.b16 %v1269_v45  ;;  %v1334_v30 = vpack.c.bf16 %v1302_v1, %v1302_v1  ;;  %v1305_v46 = vld [vmem:[#allocation2 + $0x80] sm:$0xff] }
 0x1bd   : > { %3388 = vmatmul.bf16.gmra.mxu2 %v2035_v10  ;;  %v5621_v35 = vpack.c.b16 %v1909_v17, %v1908_v27  ;;  %v1911_v10 = vunpack.c.l.b16 %v1206_v42  ;;  %v1337_v1 = vpack.c.bf16 %v1305_v46, %v1305_v46 }
 0x1be   : > { %v2036_v62 = vpack.c.b16 %v2007_v40, %v2006_v39  ;;  %v2102_v56 = vunpack.c.l.b16 %v1334_v30  ;;  %v1176_v39 = vld [vmem:[#allocation2 + $0x69] sm:$0xff] }
 0x1c0   : > { %v3213_v19 = vpop.f32.mrf.mxu0  ;;  %v3073_v5 = vpop.f32.mrf.mxu2 }
 0x1c1   : > { %v3159_v18 = vpop.f32.mrf.mxu3  ;;  %v5619_v24 = vadd.f32 %v3213_v19, %v5470_v20 }
 0x1c2   : > { %v5616_v23 = vadd.f32 %v3159_v18, %v3071_v3  ;;  %v2984_v28 = vpop.f32.mrf.mxu1  ;;  %v1205_v3 = vpack.c.bf16 %v1173_v52, %v1173_v52 }
 0x1c3   : > { %v3074_v36 = vadd.f32 %v3073_v5, %v2984_v28 }
 0x1c5   : > { %3299 = vmatmul.bf16.gmra.mxu1 %v5621_v35 }
 0x1c6   : > { %3477 = vmatmul.bf16.gmra.mxu3 %v2131_v38 }
 0x1c8   : > { %v3216_v43 = vpop.f32.mrf.mxu0  ;;  %v3075_v48 = vpop.f32.mrf.mxu2 }
 0x1c9   : > { %v3162_v41 = vpop.f32.mrf.mxu3  ;;  %v5627_v47 = vadd.f32 %v3216_v43, %v5480_v0  ;;  %v1239_v0 = vld [vmem:[#allocation2 + $0x62] sm:$0xff] }
 0x1ca   : > { %v5624_v20 = vadd.f32 %v3162_v41, %v3074_v36  ;;  %v2986_v50 = vpop.f32.mrf.mxu1  ;;  %v1271_v28 = vpack.c.bf16 %v1239_v0, %v1239_v0  ;;  %v2132_v36 = vpack.c.b16 %v2103_v14, %v2102_v56 }
 0x1cb   : > { %3255 = vmatmul.bf16.gmra.mxu0 %v5488_v12  ;;  %v3076_v55 = vadd.f32 %v3075_v48, %v2986_v50  ;;  %v1910_v12 = vunpack.c.l.b16 %v1205_v3  ;;  %v1175_v50 = vld [vmem:[#allocation2 + $0x61] sm:$0xff] }
 0x1cc   : > { %v2008_v45 = vunpack.c.l.b16 %v1271_v28  ;;  %v1207_v2 = vpack.c.bf16 %v1175_v50, %v1175_v50 }
 0x1cd   : > { %3393 = vmatmul.bf16.gmra.mxu2 %v2036_v62  ;;  %v5638_v27 = vpack.c.b16 %v1911_v10, %v1910_v12  ;;  %v1304_v62 = vld [vmem:[#allocation2 + $0x78] sm:$0xff] }
 0x1ce   : > { %v2037_v42 = vpack.c.b16 %v2009_v37, %v2008_v45  ;;  %v1336_v3 = vpack.c.bf16 %v1304_v62, %v1304_v62  ;;  %v1912_v16 = vunpack.c.l.b16 %v1207_v2 }
 0x1d0   : > { %v3218_v13 = vpop.f32.mrf.mxu0  ;;  %v3078_v19 = vpop.f32.mrf.mxu2 }
 0x1d1   : > { %v3164_v11 = vpop.f32.mrf.mxu3  ;;  %v5633_v18 = vadd.f32 %v3218_v13, %v5485_v4  ;;  %v5006_v4 = vld [vmem:[%s6446_s4 + $0x228] sm:$0xff] }
 0x1d2   : > { %v5630_v17 = vadd.f32 %v3164_v11, %v3076_v55  ;;  %v2989_v22 = vpop.f32.mrf.mxu1  ;;  %3644 = vmatpush.bf16.msra.mxu1 %v5006_v4  ;;  %v1208_v55 = vpack.c.bf16 %v1176_v39, %v1176_v39  ;;  %v1241_v11 = vld [vmem:[#allocation2 + $0x7a] sm:$0xff]  ;;  %v1242_v13 = vld [vmem:[#allocation2 + $0x82] sm:$0xff] }
 0x1d3   : > { %v3079_v5 = vadd.f32 %v3078_v19, %v2989_v22  ;;  %v2104_v22 = vunpack.c.l.b16 %v1336_v3  ;;  %v1274_v28 = vpack.c.bf16 %v1242_v13, %v1242_v13 }
 0x1d4   : > { %v1913_v30 = vunpack.c.l.b16 %v1208_v55 }
 0x1d5   : > { %3304 = vmatmul.bf16.gmra.mxu1 %v5638_v27  ;;  %v2011_v4 = vunpack.c.l.b16 %v1274_v28 }
 0x1d6   : > { %3482 = vmatmul.bf16.gmra.mxu3 %v2132_v36  ;;  %v5655_v56 = vpack.c.b16 %v1913_v30, %v1912_v16 }
 0x1d8   : > { %v3221_v38 = vpop.f32.mrf.mxu0  ;;  %v3080_v43 = vpop.f32.mrf.mxu2 }
 0x1d9   : > { %v3167_v40 = vpop.f32.mrf.mxu3  ;;  %v5645_v41 = vadd.f32 %v3221_v38, %v5498_v25  ;;  %v2105_v25 = vunpack.c.l.b16 %v1337_v1 }
 0x1da   : > { %v5647_v48 = vadd.f32 %v3167_v40, %v3079_v5  ;;  %v2991_v49 = vpop.f32.mrf.mxu1  ;;  %v1273_v5 = vpack.c.bf16 %v1241_v11, %v1241_v11  ;;  %v1307_v40 = vld [vmem:[#allocation2 + $0x98] sm:$0xff] }
 0x1db   : > { %3260 = vmatmul.bf16.gmra.mxu0 %v5506_v63  ;;  %v3081_v52 = vadd.f32 %v3080_v43, %v2991_v49  ;;  %v2133_v32 = vpack.c.b16 %v2105_v25, %v2104_v22  ;;  %v1177_v49 = vld [vmem:[#allocation2 + $0x79] sm:$0xff]  ;;  %v1339_v62 = vpack.c.bf16 %v1307_v40, %v1307_v40 }
 0x1dc   : > { %v2010_v36 = vunpack.c.l.b16 %v1273_v5  ;;  %v1209_v1 = vpack.c.bf16 %v1177_v49, %v1177_v49  ;;  %v1244_v25 = vld [vmem:[#allocation2 + $0x9a] sm:$0xff]  ;;  %v1309_v49 = vld [vmem:[#allocation2 + $0xb0] sm:$0xff] }
 0x1dd   : > { %3398 = vmatmul.bf16.gmra.mxu2 %v2037_v42  ;;  %v1306_v42 = vld [vmem:[#allocation2 + $0x90] sm:$0xff]  ;;  %v4997_v22 = vld [vmem:[%s6446_s4 + $0x1e0] sm:$0xff] }
 0x1de   : > { %v2038_v55 = vpack.c.b16 %v2011_v4, %v2010_v36  ;;  %v1338_v2 = vpack.c.bf16 %v1306_v42, %v1306_v42  ;;  %3556 = vmatpush.bf16.msra.mxu0 %v4997_v22 }
 0x1e0   : > { %v3223_v10 = vpop.f32.mrf.mxu0  ;;  %v3083_v12 = vpop.f32.mrf.mxu2 }
 0x1e1   : > { %v3169_v14 = vpop.f32.mrf.mxu3  ;;  %v5651_v0 = vadd.f32 %v3223_v10, %v5503_v53  ;;  %v1178_v53 = vld [vmem:[#allocation2 + $0x81] sm:$0xff]  ;;  %v1243_v10 = vld [vmem:[#allocation2 + $0x92] sm:$0xff] }
 0x1e2   : > { %v5653_v63 = vadd.f32 %v3169_v14, %v3081_v52  ;;  %v2994_v19 = vpop.f32.mrf.mxu1  ;;  %v1210_v52 = vpack.c.bf16 %v1178_v53, %v1178_v53  ;;  %v1914_v14 = vunpack.c.l.b16 %v1209_v1  ;;  %v1275_v28 = vpack.c.bf16 %v1243_v10, %v1243_v10 }
 0x1e3   : > { %v3084_v60 = vadd.f32 %v3083_v12, %v2994_v19  ;;  %v2106_v19 = vunpack.c.l.b16 %v1338_v2  ;;  %v1308_v2 = vld [vmem:[#allocation2 + $0xa8] sm:$0xff] }
 0x1e4   : > { %v1915_v3 = vunpack.c.l.b16 %v1210_v52  ;;  %v2012_v4 = vunpack.c.l.b16 %v1275_v28 }
 0x1e5   : > { %3309 = vmatmul.bf16.gmra.mxu1 %v5655_v56 }
 0x1e6   : > { %3487 = vmatmul.bf16.gmra.mxu3 %v2133_v32  ;;  %v1276_v32 = vpack.c.bf16 %v1244_v25, %v1244_v25 }
 0x1e8   : > { %v3226_v45 = vpop.f32.mrf.mxu0  ;;  %v3085_v39 = vpop.f32.mrf.mxu2 }
 0x1e9   : > { %v3172_v37 = vpop.f32.mrf.mxu3  ;;  %v5659_v38 = vadd.f32 %v3226_v45, %v5513_v61  ;;  %v2107_v61 = vunpack.c.l.b16 %v1339_v62  ;;  %v2013_v45 = vunpack.c.l.b16 %v1276_v32 }
 0x1ea   : > { %v5661_v43 = vadd.f32 %v3172_v37, %v3084_v60  ;;  %v2996_v46 = vpop.f32.mrf.mxu1  ;;  %v5672_v60 = vpack.c.b16 %v1915_v3, %v1914_v14  ;;  %v1180_v37 = vld [vmem:[#allocation2 + $0x99] sm:$0xff]  ;;  %v1245_v14 = vld [vmem:[#allocation2 + $0xaa] sm:$0xff] }
 0x1eb   : > { %3265 = vmatmul.bf16.gmra.mxu0 %v5543_v54  ;;  %v3086_v50 = vadd.f32 %v3085_v39, %v2996_v46  ;;  %v2134_v36 = vpack.c.b16 %v2107_v61, %v2106_v19  ;;  %v1212_v62 = vpack.c.bf16 %v1180_v37, %v1180_v37  ;;  %v2039_v1 = vpack.c.b16 %v2013_v45, %v2012_v4  ;;  %v4996_v3 = vld [vmem:[%s6446_s4 + $0x1d8] sm:$0xff] }
 0x1ec   : > { %3557 = vmatpush.bf16.msra.mxu0 %v4996_v3  ;;  %v1277_v45 = vpack.c.bf16 %v1245_v14, %v1245_v14 }
 0x1ed   : > { %3403 = vmatmul.bf16.gmra.mxu2 %v2038_v55  ;;  %v1179_v55 = vld [vmem:[#allocation2 + $0x91] sm:$0xff]  ;;  %v1917_v10 = vunpack.c.l.b16 %v1212_v62 }
 0x1ee   : > { %v1211_v61 = vpack.c.bf16 %v1179_v55, %v1179_v55 }
 0x1f0   : > { %v3228_v30 = vpop.f32.mrf.mxu0  ;;  %v3088_v16 = vpop.f32.mrf.mxu2  ;;  %v1916_v19 = vunpack.c.l.b16 %v1211_v61 }
 0x1f1   : > { %v3174_v11 = vpop.f32.mrf.mxu3  ;;  %v5665_v13 = vadd.f32 %v3228_v30, %v5534_v44  ;;  %v5005_v44 = vld [vmem:[%s6446_s4 + $0x220] sm:$0xff]  ;;  %v1341_v30 = vpack.c.bf16 %v1309_v49, %v1309_v49 }
 0x1f2   : > { %v5667_v54 = vadd.f32 %v3174_v11, %v3086_v50  ;;  %v2999_v12 = vpop.f32.mrf.mxu1  ;;  %3645 = vmatpush.bf16.msra.mxu1 %v5005_v44  ;;  %v5695_v44 = vpack.c.b16 %v1917_v10, %v1916_v19 }
 0x1f3   : > { %v3089_v5 = vadd.f32 %v3088_v16, %v2999_v12  ;;  %v2109_v11 = vunpack.c.l.b16 %v1341_v30  ;;  %v1246_v16 = vld [vmem:[#allocation2 + $0xb2] sm:$0xff] }
 0x1f5   : > { %3314 = vmatmul.bf16.gmra.mxu1 %v5672_v60 }
 0x1f6   : > { %3492 = vmatmul.bf16.gmra.mxu3 %v2134_v36  ;;  %v4995_v36 = vld [vmem:[%s6446_s4 + $0x1d0] sm:$0xff] }
 0x1f7   : > { %3558 = vmatpush.bf16.msra.mxu0 %v4995_v36  ;;  %v1247_v36 = vld [vmem:[#allocation2 + $0xc2] sm:$0xff] }
 0x1f8   : > { %v3231_v53 = vpop.f32.mrf.mxu0  ;;  %v3090_v46 = vpop.f32.mrf.mxu2 }
 0x1f9   : > { %v3177_v39 = vpop.f32.mrf.mxu3  ;;  %v5679_v40 = vadd.f32 %v3231_v53, %v5553_v34  ;;  %v1340_v34 = vpack.c.bf16 %v1308_v2, %v1308_v2  ;;  %v1278_v53 = vpack.c.bf16 %v1246_v16, %v1246_v16  ;;  %v1311_v2 = vld [vmem:[#allocation2 + $0xc8] sm:$0xff] }
 0x1fa   : > { %v5681_v50 = vadd.f32 %v3177_v39, %v3089_v5  ;;  %v3001_v52 = vpop.f32.mrf.mxu1  ;;  %v1182_v39 = vld [vmem:[#allocation2 + $0xb1] sm:$0xff]  ;;  %v1343_v16 = vpack.c.bf16 %v1311_v2, %v1311_v2 }
 0x1fb   : > { %3270 = vmatmul.bf16.gmra.mxu0 %v5576_v31  ;;  %v3091_v42 = vadd.f32 %v3090_v46, %v3001_v52  ;;  %v2108_v32 = vunpack.c.l.b16 %v1340_v34  ;;  %v2014_v46 = vunpack.c.l.b16 %v1277_v45  ;;  %v2015_v49 = vunpack.c.l.b16 %v1278_v53  ;;  %v4993_v34 = vld [vmem:[%s6446_s4 + $0x1c0] sm:$0xff] }
 0x1fc   : > { %v1214_v61 = vpack.c.bf16 %v1182_v39, %v1182_v39  ;;  %v2111_v53 = vunpack.c.l.b16 %v1343_v16  ;;  %v1184_v16 = vld [vmem:[#allocation2 + $0xc9] sm:$0xff] }
 0x1fd   : > { %3408 = vmatmul.bf16.gmra.mxu2 %v2039_v1  ;;  %v2135_v37 = vpack.c.b16 %v2109_v11, %v2108_v32  ;;  %v1181_v1 = vld [vmem:[#allocation2 + $0xa9] sm:$0xff]  ;;  %v1310_v11 = vld [vmem:[#allocation2 + $0xc0] sm:$0xff] }
 0x1fe   : > { %v1213_v14 = vpack.c.bf16 %v1181_v1, %v1181_v1  ;;  %v1919_v19 = vunpack.c.l.b16 %v1214_v61 }
 0x200   : > { %v3233_v25 = vpop.f32.mrf.mxu0  ;;  %v3093_v22 = vpop.f32.mrf.mxu2  ;;  %v1918_v45 = vunpack.c.l.b16 %v1213_v14 }
 0x201   : > { %v3179_v12 = vpop.f32.mrf.mxu3  ;;  %v5688_v31 = vadd.f32 %v3233_v25, %v5567_v7  ;;  %v4994_v7 = vld [vmem:[%s6446_s4 + $0x1c8] sm:$0xff]  ;;  %v2040_v25 = vpack.c.b16 %v2015_v49, %v2014_v46 }
 0x202   : > { %v5690_v5 = vadd.f32 %v3179_v12, %v3091_v42  ;;  %v3004_v28 = vpop.f32.mrf.mxu1  ;;  %3559 = vmatpush.bf16.msra.mxu0 %v4994_v7  ;;  %v1136_v12 = vld [vmem:[#allocation2 + $0x188] sm:$0xff] }
 0x203   : > { %v3094_v4 = vadd.f32 %v3093_v22, %v3004_v28  ;;  %v1342_v22 = vpack.c.bf16 %v1310_v11, %v1310_v11  ;;  %v1168_v32 = vpack.c.bf16 %v1136_v12, %v1136_v12 }
 0x205   : > { %3319 = vmatmul.bf16.gmra.mxu1 %v5695_v44 }
 0x206   : > { %3497 = vmatmul.bf16.gmra.mxu3 %v2135_v37  ;;  %3560 = vmatpush.bf16.msra.mxu0 %v4993_v34  ;;  %v1248_v37 = vld [vmem:[#allocation2 + $0xca] sm:$0xff] }
 0x207   : > { %v1280_v61 = vpack.c.bf16 %v1248_v37, %v1248_v37  ;;  %v1312_v37 = vld [vmem:[#allocation2 + $0xd8] sm:$0xff] }
 0x208   : > { %v3236_v52 = vpop.f32.mrf.mxu0  ;;  %v3095_v62 = vpop.f32.mrf.mxu2 }
 0x209   : > { %v3182_v55 = vpop.f32.mrf.mxu3  ;;  %v5702_v42 = vadd.f32 %v3236_v52, %v5583_v8  ;;  %v1135_v8 = vld [vmem:[#allocation2 + $0x180] sm:$0xff]  ;;  %v5715_v52 = vpack.c.b16 %v1919_v19, %v1918_v45  ;;  %v2017_v11 = vunpack.c.l.b16 %v1280_v61  ;;  %v1216_v45 = vpack.c.bf16 %v1184_v16, %v1184_v16 }
 0x20a   : > { %v5704_v3 = vadd.f32 %v3182_v55, %v3094_v4  ;;  %v3006_v30 = vpop.f32.mrf.mxu1  ;;  %v1167_v28 = vpack.c.bf16 %v1135_v8, %v1135_v8  ;;  %v2110_v55 = vunpack.c.l.b16 %v1342_v22  ;;  %v1313_v22 = vld [vmem:[#allocation2 + $0xe0] sm:$0xff] }
 0x20b   : > { %3275 = vmatmul.bf16.gmra.mxu0 %v5591_v51  ;;  %v3096_v10 = vadd.f32 %v3095_v62, %v3006_v30  ;;  %v1279_v62 = vpack.c.bf16 %v1247_v36, %v1247_v36  ;;  %v1841_v30 = vunpack.c.l.b16 %v1168_v32  ;;  %v1183_v36 = vld [vmem:[#allocation2 + $0xc1] sm:$0xff] }
 0x20c   : > { %v1840_v2 = vunpack.c.l.b16 %v1167_v28  ;;  %v2136_v34 = vpack.c.b16 %v2111_v53, %v2110_v55  ;;  %v1921_v55 = vunpack.c.l.b16 %v1216_v45 }
 0x20d   : > { %3413 = vmatmul.bf16.gmra.mxu2 %v2040_v25 }
 0x20e   : > { %v5721_v25 = vpack.c.b16 %v1841_v30, %v1840_v2  ;;  %v1249_v2 = vld [vmem:[#allocation2 + $0xda] sm:$0xff]  ;;  %v1250_v30 = vld [vmem:[#allocation2 + $0xe2] sm:$0xff] }
 0x210   : > { %v3238_v4 = vpop.f32.mrf.mxu0  ;;  %v3098_v39 = vpop.f32.mrf.mxu2 }
 0x211   : > { %v3184_v7 = vpop.f32.mrf.mxu3  ;;  %v5711_v51 = vadd.f32 %v3238_v4, %v5588_v9  ;;  %v5004_v9 = vld [vmem:[%s6446_s4 + $0x218] sm:$0xff] }
 0x212   : > { %v5713_v46 = vadd.f32 %v3184_v7, %v3096_v10  ;;  %v3009_v49 = vpop.f32.mrf.mxu1  ;;  %v2016_v10 = vunpack.c.l.b16 %v1279_v62  ;;  %3646 = vmatpush.bf16.msra.mxu1 %v5004_v9  ;;  %v1345_v7 = vpack.c.bf16 %v1313_v22, %v1313_v22  ;;  %v1282_v22 = vpack.c.bf16 %v1250_v30, %v1250_v30 }
 0x213   : > { %v3099_v1 = vadd.f32 %v3098_v39, %v3009_v49  ;;  %v1215_v39 = vpack.c.bf16 %v1183_v36, %v1183_v36  ;;  %v1344_v49 = vpack.c.bf16 %v1312_v37, %v1312_v37  ;;  %v5024_v36 = vld [vmem:[%s6452_s10 + $0x38] sm:$0xff]  ;;  %v1186_v37 = vld [vmem:[#allocation2 + $0xe1] sm:$0xff] }
 0x214   : > { %v2041_v53 = vpack.c.b16 %v2017_v11, %v2016_v10  ;;  %v2019_v45 = vunpack.c.l.b16 %v1282_v22  ;;  %4140 = vmatpush.bf16.msra.mxu3 %v5024_v36  ;;  %v1252_v36 = vld [vmem:[#allocation2 + $0xfa] sm:$0xff] }
 0x215   : > { %3324 = vmatmul.bf16.gmra.mxu1 %v5715_v52  ;;  %v2112_v10 = vunpack.c.l.b16 %v1344_v49 }
 0x216   : > { %3502 = vmatmul.bf16.gmra.mxu3 %v2136_v34  ;;  %v1920_v34 = vunpack.c.l.b16 %v1215_v39 }
 0x218   : > { %v3241_v14 = vpop.f32.mrf.mxu0  ;;  %v3100_v19 = vpop.f32.mrf.mxu2  ;;  %v5734_v11 = vpack.c.b16 %v1921_v55, %v1920_v34  ;;  %v1315_v55 = vld [vmem:[#allocation2 + $0xf8] sm:$0xff] }
 0x219   : > { %v3187_v8 = vpop.f32.mrf.mxu3  ;;  %v5724_v12 = vadd.f32 %v3241_v14, %v5594_v59  ;;  %v2113_v59 = vunpack.c.l.b16 %v1345_v7 }
 0x21a   : > { %v5726_v28 = vadd.f32 %v3187_v8, %v3099_v1  ;;  %v3011_v32 = vpop.f32.mrf.mxu1 }
 0x21b   : > { %3280 = vmatmul.bf16.gmra.mxu0 %v5721_v25  ;;  %v3101_v4 = vadd.f32 %v3100_v19, %v3011_v32  ;;  %v1281_v19 = vpack.c.bf16 %v1249_v2, %v1249_v2  ;;  %v2137_v32 = vpack.c.b16 %v2113_v59, %v2112_v10  ;;  %v1185_v2 = vld [vmem:[#allocation2 + $0xd9] sm:$0xff] }
 0x21c   : > { %v1217_v10 = vpack.c.bf16 %v1185_v2, %v1185_v2  ;;  %v1284_v2 = vpack.c.bf16 %v1252_v36, %v1252_v36 }
 0x21d   : > { %3418 = vmatmul.bf16.gmra.mxu2 %v2041_v53 }
 0x220   : > { %v3243_v62 = vpop.f32.mrf.mxu0  ;;  %v3103_v9 = vpop.f32.mrf.mxu2 }
 0x221   : > { %v3189_v61 = vpop.f32.mrf.mxu3  ;;  %v5730_v1 = vadd.f32 %v3243_v62, %v5602_v33  ;;  %v5016_v33 = vld [vmem:[%s6449_s7 + $0x38] sm:$0xff] }
 0x222   : > { %v5732_v14 = vadd.f32 %v3189_v61, %v3101_v4  ;;  %v3014_v16 = vpop.f32.mrf.mxu1  ;;  %v2018_v4 = vunpack.c.l.b16 %v1281_v19  ;;  %3915 = vmatpush.bf16.msra.mxu2 %v5016_v33  ;;  %v1218_v61 = vpack.c.bf16 %v1186_v37, %v1186_v37  ;;  %v1251_v33 = vld [vmem:[#allocation2 + $0xf2] sm:$0xff] }
 0x223   : > { %v3104_v8 = vadd.f32 %v3103_v9, %v3014_v16  ;;  %v1314_v9 = vld [vmem:[#allocation2 + $0xf0] sm:$0xff]  ;;  %v1347_v16 = vpack.c.bf16 %v1315_v55, %v1315_v55 }
 0x224   : > { %v2042_v34 = vpack.c.b16 %v2019_v45, %v2018_v4  ;;  %v1346_v19 = vpack.c.bf16 %v1314_v9, %v1314_v9  ;;  %v1923_v22 = vunpack.c.l.b16 %v1218_v61 }
 0x225   : > { %3329 = vmatmul.bf16.gmra.mxu1 %v5734_v11 }
 0x226   : > { %3507 = vmatmul.bf16.gmra.mxu3 %v2137_v32  ;;  %v2114_v37 = vunpack.c.l.b16 %v1346_v19 }
 0x228   : > { %v3246_v53 = vpop.f32.mrf.mxu0  ;;  %v3105_v49 = vpop.f32.mrf.mxu2 }
 0x229   : > { %v3192_v7 = vpop.f32.mrf.mxu3  ;;  %v5744_v39 = vadd.f32 %v3246_v53, %v5610_v57  ;;  %v2115_v57 = vunpack.c.l.b16 %v1347_v16  ;;  %v1188_v16 = vld [vmem:[#allocation2 + $0xf9] sm:$0xff] }
 0x22a   : > { %v5746_v62 = vadd.f32 %v3192_v7, %v3104_v8  ;;  %v3016_v59 = vpop.f32.mrf.mxu1  ;;  %v1922_v7 = vunpack.c.l.b16 %v1217_v10 }
 0x22b   : > { %6456 = vst [vmem:[#allocation3_spill] sm:$0xff] %v5744_v39  ;;  %3561 = vmatmul.bf16.vlgmr.msra.gmra.mxu0 %v5621_v35  ;;  %v3106_v30 = vadd.f32 %v3105_v49, %v3016_v59  ;;  %v3031_v35 = vadd.f32 %v5444_v15, %v5447_v21  ;;  %v1283_v59 = vpack.c.bf16 %v1251_v33, %v1251_v33  ;;  %v1187_v33 = vld [vmem:[#allocation2 + $0xf1] sm:$0xff] }
 0x22c   : > { %v5757_v55 = vpack.c.b16 %v1923_v22, %v1922_v7  ;;  %v2138_v61 = vpack.c.b16 %v2115_v57, %v2114_v37  ;;  %v1316_v7 = vld [vmem:[#allocation2 + $0x108] sm:$0xff]  ;;  %v1219_v37 = vpack.c.bf16 %v1187_v33, %v1187_v33  ;;  %v5023_v33 = vld [vmem:[%s6452_s10 + $0x30] sm:$0xff] }
 0x22d   : > { %3423 = vmatmul.bf16.gmra.mxu2 %v2042_v34  ;;  %v5003_v34 = vld [vmem:[%s6446_s4 + $0x210] sm:$0xff]  ;;  %v3120_v15 = vadd.f32 %v5451_v29, %v3031_v35  ;;  %v2020_v21 = vunpack.c.l.b16 %v1283_v59  ;;  %v1220_v29 = vpack.c.bf16 %v1188_v16, %v1188_v16  ;;  %4141 = vmatpush.bf16.msra.mxu3 %v5023_v33 }
 0x22e   : > { %3647 = vmatpush.bf16.msra.mxu1 %v5003_v34 }
 0x230   : > { %v3248_v32 = vpop.f32.mrf.mxu0  ;;  %v3384_v39 = vpop.f32.mrf.mxu2 }
 0x231   : > { %v3194_v53 = vpop.f32.mrf.mxu3  ;;  %v5750_v8 = vadd.f32 %v3248_v32, %v5616_v23 }
 0x232   : > { %v5754_v4 = vadd.f32 %v3194_v53, %v3106_v30  ;;  %v3295_v45 = vpop.f32.mrf.mxu1  ;;  %v2021_v30 = vunpack.c.l.b16 %v1284_v2  ;;  %v1253_v2 = vld [vmem:[#allocation2 + $0x10a] sm:$0xff] }
 0x233   : > { %v3296_v49 = vadd.f32 %v3295_v45, %v5597_v6  ;;  %v3209_v6 = vadd.f32 %v5600_v26, %v3120_v15  ;;  %v1348_v26 = vpack.c.bf16 %v1316_v7, %v1316_v7  ;;  %v1924_v15 = vunpack.c.l.b16 %v1219_v37  ;;  %v1319_v37 = vld [vmem:[#allocation2 + $0x128] sm:$0xff] }
 0x234   : > { %v2043_v53 = vpack.c.b16 %v2021_v30, %v2020_v21 }
 0x235   : > { %3334 = vmatmul.bf16.gmra.mxu1 %v5757_v55  ;;  %v3385_v23 = vadd.f32 %v3384_v39, %v3296_v49  ;;  %v1317_v39 = vld [vmem:[#allocation2 + $0x110] sm:$0xff]  ;;  %v2116_v30 = vunpack.c.l.b16 %v1348_v26 }
 0x236   : > { %3512 = vmatmul.bf16.gmra.mxu3 %v2138_v61  ;;  %v1349_v35 = vpack.c.bf16 %v1317_v39, %v1317_v39  ;;  %v1254_v61 = vld [vmem:[#allocation2 + $0x112] sm:$0xff] }
 0x238   : > { %v3251_v9 = vpop.f32.mrf.mxu0  ;;  %v3386_v22 = vpop.f32.mrf.mxu2  ;;  %v2117_v59 = vunpack.c.l.b16 %v1349_v35 }
 0x239   : > { %v5766_v10 = vadd.f32 %v3251_v9, %v5624_v20  ;;  %v3473_v19 = vpop.f32.mrf.mxu3  ;;  %v1925_v20 = vunpack.c.l.b16 %v1220_v29 }
 0x23a   : > { %v5768_v32 = vadd.f32 %v3473_v19, %v3385_v23  ;;  %v3297_v57 = vpop.f32.mrf.mxu1  ;;  %v1285_v19 = vpack.c.bf16 %v1253_v2, %v1253_v2  ;;  %v2139_v39 = vpack.c.b16 %v2117_v59, %v2116_v30 }
 0x23b   : > { %v3298_v36 = vadd.f32 %v3297_v57, %v3209_v6  ;;  %3566 = vmatmul.bf16.gmra.mxu0 %v5638_v27  ;;  %v5777_v6 = vpack.c.b16 %v1925_v20, %v1924_v15  ;;  %v1351_v15 = vpack.c.bf16 %v1319_v37, %v1319_v37 }
 0x23d   : > { %v3387_v45 = vadd.f32 %v3386_v22, %v3298_v36  ;;  %3428 = vmatmul.bf16.gmra.mxu2 %v2043_v53  ;;  %v1286_v22 = vpack.c.bf16 %v1254_v61, %v1254_v61  ;;  %v2022_v36 = vunpack.c.l.b16 %v1285_v19  ;;  %v1190_v53 = vld [vmem:[#allocation2 + $0x111] sm:$0xff]  ;;  %v2119_v19 = vunpack.c.l.b16 %v1351_v15 }
 0x23e   : > { %v1222_v2 = vpack.c.bf16 %v1190_v53, %v1190_v53 }
 0x23f   : > { %v2023_v29 = vunpack.c.l.b16 %v1286_v22  ;;  %v1255_v22 = vld [vmem:[#allocation2 + $0x122] sm:$0xff] }
 0x240   : > { %v3253_v49 = vpop.f32.mrf.mxu0  ;;  %v3389_v9 = vpop.f32.mrf.mxu2  ;;  %v1927_v30 = vunpack.c.l.b16 %v1222_v2 }
 0x241   : > { %v5772_v23 = vadd.f32 %v3253_v49, %v5630_v17  ;;  %v3475_v34 = vpop.f32.mrf.mxu3  ;;  %v5015_v17 = vld [vmem:[%s6449_s7 + $0x30] sm:$0xff]  ;;  %v2044_v61 = vpack.c.b16 %v2023_v29, %v2022_v36 }
 0x242   : > { %v5774_v27 = vadd.f32 %v3475_v34, %v3387_v45  ;;  %v3300_v21 = vpop.f32.mrf.mxu1  ;;  %3916 = vmatpush.bf16.msra.mxu2 %v5015_v17  ;;  %v1189_v49 = vld [vmem:[#allocation2 + $0x109] sm:$0xff]  ;;  %v1318_v34 = vld [vmem:[#allocation2 + $0x120] sm:$0xff] }
 0x243   : > { %v3301_v16 = vadd.f32 %v3300_v21, %v5613_v58  ;;  %v1221_v21 = vpack.c.bf16 %v1189_v49, %v1189_v49 }
 0x245   : > { %3339 = vmatmul.bf16.gmra.mxu1 %v5777_v6  ;;  %v3390_v57 = vadd.f32 %v3389_v9, %v3301_v16 }
 0x246   : > { %3517 = vmatmul.bf16.gmra.mxu3 %v2139_v39  ;;  %v1256_v39 = vld [vmem:[#allocation2 + $0x12a] sm:$0xff] }
 0x248   : > { %v3256_v58 = vpop.f32.mrf.mxu0  ;;  %v3391_v45 = vpop.f32.mrf.mxu2 }
 0x249   : > { %v5787_v7 = vadd.f32 %v3256_v58, %v5647_v48  ;;  %v3478_v35 = vpop.f32.mrf.mxu3  ;;  %v1350_v48 = vpack.c.bf16 %v1318_v34, %v1318_v34 }
 0x24a   : > { %v5789_v26 = vadd.f32 %v3478_v35, %v3390_v57  ;;  %v3302_v20 = vpop.f32.mrf.mxu1  ;;  %v1287_v35 = vpack.c.bf16 %v1255_v22, %v1255_v22 }
 0x24b   : > { %v3303_v59 = vadd.f32 %v3302_v20, %v5619_v24  ;;  %3571 = vmatmul.bf16.gmra.mxu0 %v5655_v56  ;;  %v1926_v24 = vunpack.c.l.b16 %v1221_v21  ;;  %v2118_v29 = vunpack.c.l.b16 %v1350_v48 }
 0x24c   : > { %v2024_v49 = vunpack.c.l.b16 %v1287_v35  ;;  %v1257_v35 = vld [vmem:[#allocation2 + $0x13a] sm:$0xff] }
 0x24d   : > { %v3392_v9 = vadd.f32 %v3391_v45, %v3303_v59  ;;  %3433 = vmatmul.bf16.gmra.mxu2 %v2044_v61  ;;  %v5799_v53 = vpack.c.b16 %v1927_v30, %v1926_v24  ;;  %v1288_v45 = vpack.c.bf16 %v1256_v39, %v1256_v39  ;;  %v2140_v37 = vpack.c.b16 %v2119_v19, %v2118_v29  ;;  %v1192_v61 = vld [vmem:[#allocation2 + $0x129] sm:$0xff]  ;;  %v1191_v30 = vld [vmem:[#allocation2 + $0x121] sm:$0xff]  ;;  %v1320_v39 = vld [vmem:[#allocation2 + $0x138] sm:$0xff] }
 0x24e   : > { %v1224_v19 = vpack.c.bf16 %v1192_v61, %v1192_v61 }
 0x24f   : > { %v2025_v59 = vunpack.c.l.b16 %v1288_v45  ;;  %v1258_v45 = vld [vmem:[#allocation2 + $0x142] sm:$0xff] }
 0x250   : > { %v3258_v16 = vpop.f32.mrf.mxu0  ;;  %v3394_v33 = vpop.f32.mrf.mxu2 }
 0x251   : > { %v5794_v57 = vadd.f32 %v3258_v16, %v5653_v63  ;;  %v3480_v17 = vpop.f32.mrf.mxu3  ;;  %v5002_v63 = vld [vmem:[%s6446_s4 + $0x208] sm:$0xff]  ;;  %v2045_v22 = vpack.c.b16 %v2025_v59, %v2024_v49 }
 0x252   : > { %v5796_v56 = vadd.f32 %v3480_v17, %v3392_v9  ;;  %v3305_v36 = vpop.f32.mrf.mxu1  ;;  %3648 = vmatpush.bf16.msra.mxu1 %v5002_v63  ;;  %v1321_v9 = vld [vmem:[#allocation2 + $0x140] sm:$0xff] }
 0x253   : > { %v3306_v58 = vadd.f32 %v3305_v36, %v5627_v47  ;;  %v1353_v17 = vpack.c.bf16 %v1321_v9, %v1321_v9  ;;  %v1929_v36 = vunpack.c.l.b16 %v1224_v19 }
 0x255   : > { %3344 = vmatmul.bf16.gmra.mxu1 %v5799_v53  ;;  %v3395_v20 = vadd.f32 %v3394_v33, %v3306_v58  ;;  %v1223_v33 = vpack.c.bf16 %v1191_v30, %v1191_v30  ;;  %v2121_v58 = vunpack.c.l.b16 %v1353_v17  ;;  %v5022_v30 = vld [vmem:[%s6452_s10 + $0x28] sm:$0xff] }
 0x256   : > { %3522 = vmatmul.bf16.gmra.mxu3 %v2140_v37 }
 0x257   : > { %4142 = vmatpush.bf16.msra.mxu3 %v5022_v30 }
 0x258   : > { %v3261_v2 = vpop.f32.mrf.mxu0  ;;  %v3396_v15 = vpop.f32.mrf.mxu2 }
 0x259   : > { %v5806_v47 = vadd.f32 %v3261_v2, %v5661_v43  ;;  %v3483_v34 = vpop.f32.mrf.mxu3  ;;  %v1352_v43 = vpack.c.bf16 %v1320_v39, %v1320_v39 }
 0x25a   : > { %v5808_v21 = vadd.f32 %v3483_v34, %v3395_v20  ;;  %v3307_v48 = vpop.f32.mrf.mxu1  ;;  %v1289_v34 = vpack.c.bf16 %v1257_v35, %v1257_v35 }
 0x25b   : > { %v3308_v16 = vadd.f32 %v3307_v48, %v5633_v18  ;;  %3576 = vmatmul.bf16.gmra.mxu0 %v5672_v60  ;;  %v1928_v18 = vunpack.c.l.b16 %v1223_v33  ;;  %v2120_v59 = vunpack.c.l.b16 %v1352_v43  ;;  %v1323_v33 = vld [vmem:[#allocation2 + $0x158] sm:$0xff] }
 0x25d   : > { %v3397_v24 = vadd.f32 %v3396_v15, %v3308_v16  ;;  %3438 = vmatmul.bf16.gmra.mxu2 %v2045_v22  ;;  %v5818_v61 = vpack.c.b16 %v1929_v36, %v1928_v18  ;;  %v1290_v15 = vpack.c.bf16 %v1258_v45, %v1258_v45  ;;  %v2141_v9 = vpack.c.b16 %v2121_v58, %v2120_v59  ;;  %v1194_v22 = vld [vmem:[#allocation2 + $0x141] sm:$0xff] }
 0x25e   : > { %v2026_v16 = vunpack.c.l.b16 %v1289_v34  ;;  %v1226_v35 = vpack.c.bf16 %v1194_v22, %v1194_v22  ;;  %v1355_v18 = vpack.c.bf16 %v1323_v33, %v1323_v33 }
 0x25f   : > { %v2027_v19 = vunpack.c.l.b16 %v1290_v15  ;;  %v1259_v15 = vld [vmem:[#allocation2 + $0x152] sm:$0xff] }
 0x260   : > { %v3263_v29 = vpop.f32.mrf.mxu0  ;;  %v3399_v63 = vpop.f32.mrf.mxu2  ;;  %v1931_v59 = vunpack.c.l.b16 %v1226_v35  ;;  %v2123_v34 = vunpack.c.l.b16 %v1355_v18 }
 0x261   : > { %v5813_v37 = vadd.f32 %v3263_v29, %v5667_v54  ;;  %v3485_v20 = vpop.f32.mrf.mxu3  ;;  %v5014_v54 = vld [vmem:[%s6449_s7 + $0x28] sm:$0xff]  ;;  %v1193_v29 = vld [vmem:[#allocation2 + $0x139] sm:$0xff]  ;;  %v2046_v45 = vpack.c.b16 %v2027_v19, %v2026_v16 }
 0x262   : > { %v5815_v60 = vadd.f32 %v3485_v20, %v3397_v24  ;;  %v3310_v49 = vpop.f32.mrf.mxu1  ;;  %3917 = vmatpush.bf16.msra.mxu2 %v5014_v54  ;;  %v1322_v20 = vld [vmem:[#allocation2 + $0x150] sm:$0xff] }
 0x263   : > { %v3311_v2 = vadd.f32 %v3310_v49, %v5645_v41  ;;  %v1225_v49 = vpack.c.bf16 %v1193_v29, %v1193_v29 }
 0x265   : > { %3349 = vmatmul.bf16.gmra.mxu1 %v5818_v61  ;;  %v3400_v48 = vadd.f32 %v3399_v63, %v3311_v2 }
 0x266   : > { %3527 = vmatmul.bf16.gmra.mxu3 %v2141_v9  ;;  %v1260_v9 = vld [vmem:[#allocation2 + $0x15a] sm:$0xff] }
 0x268   : > { %v3266_v41 = vpop.f32.mrf.mxu0  ;;  %v3401_v24 = vpop.f32.mrf.mxu2 }
 0x269   : > { %v5828_v39 = vadd.f32 %v3266_v41, %v5681_v50  ;;  %v3488_v17 = vpop.f32.mrf.mxu3  ;;  %v1354_v50 = vpack.c.bf16 %v1322_v20, %v1322_v20 }
 0x26a   : > { %v5830_v43 = vadd.f32 %v3488_v17, %v3400_v48  ;;  %v3312_v36 = vpop.f32.mrf.mxu1  ;;  %v1291_v17 = vpack.c.bf16 %v1259_v15, %v1259_v15 }
 0x26b   : > { %v3313_v58 = vadd.f32 %v3312_v36, %v5651_v0  ;;  %3581 = vmatmul.bf16.gmra.mxu0 %v5695_v44  ;;  %v1930_v0 = vunpack.c.l.b16 %v1225_v49  ;;  %v2122_v19 = vunpack.c.l.b16 %v1354_v50 }
 0x26c   : > { %v2028_v29 = vunpack.c.l.b16 %v1291_v17  ;;  %v1262_v17 = vld [vmem:[#allocation2 + $0x172] sm:$0xff] }
 0x26d   : > { %v3402_v63 = vadd.f32 %v3401_v24, %v3313_v58  ;;  %3443 = vmatmul.bf16.gmra.mxu2 %v2046_v45  ;;  %v5840_v22 = vpack.c.b16 %v1931_v59, %v1930_v0  ;;  %v1292_v24 = vpack.c.bf16 %v1260_v9, %v1260_v9  ;;  %v2142_v33 = vpack.c.b16 %v2123_v34, %v2122_v19  ;;  %v1196_v45 = vld [vmem:[#allocation2 + $0x159] sm:$0xff]  ;;  %v1195_v59 = vld [vmem:[#allocation2 + $0x151] sm:$0xff]  ;;  %v1324_v9 = vld [vmem:[#allocation2 + $0x168] sm:$0xff] }
 0x26e   : > { %v1228_v34 = vpack.c.bf16 %v1196_v45, %v1196_v45  ;;  %v1227_v0 = vpack.c.bf16 %v1195_v59, %v1195_v59  ;;  %v1294_v45 = vpack.c.bf16 %v1262_v17, %v1262_v17 }
 0x26f   : > { %v2029_v58 = vunpack.c.l.b16 %v1292_v24 }
 0x270   : > { %v3268_v2 = vpop.f32.mrf.mxu0  ;;  %v3404_v30 = vpop.f32.mrf.mxu2 }
 0x271   : > { %v5835_v48 = vadd.f32 %v3268_v2, %v5690_v5  ;;  %v3490_v54 = vpop.f32.mrf.mxu3  ;;  %v5001_v5 = vld [vmem:[%s6446_s4 + $0x200] sm:$0xff]  ;;  %v2047_v15 = vpack.c.b16 %v2029_v58, %v2028_v29 }
 0x272   : > { %v5837_v44 = vadd.f32 %v3490_v54, %v3402_v63  ;;  %v3315_v16 = vpop.f32.mrf.mxu1  ;;  %3649 = vmatpush.bf16.msra.mxu1 %v5001_v5  ;;  %v1325_v63 = vld [vmem:[#allocation2 + $0x170] sm:$0xff] }
 0x273   : > { %v3316_v41 = vadd.f32 %v3315_v16, %v5659_v38  ;;  %v1357_v54 = vpack.c.bf16 %v1325_v63, %v1325_v63 }
 0x275   : > { %3354 = vmatmul.bf16.gmra.mxu1 %v5840_v22  ;;  %v3405_v36 = vadd.f32 %v3404_v30, %v3316_v41  ;;  %v1933_v30 = vunpack.c.l.b16 %v1228_v34  ;;  %v2125_v19 = vunpack.c.l.b16 %v1357_v54  ;;  %v1261_v41 = vld [vmem:[#allocation2 + $0x16a] sm:$0xff]  ;;  %v2031_v34 = vunpack.c.l.b16 %v1294_v45 }
 0x276   : > { %3532 = vmatmul.bf16.gmra.mxu3 %v2142_v33 }
 0x278   : > { %v3271_v35 = vpop.f32.mrf.mxu0  ;;  %v5849_v18 = vpop.f32.mrf.mxu2 }
 0x279   : > { %v5847_v38 = vadd.f32 %v3271_v35, %v5704_v3  ;;  %v3493_v20 = vpop.f32.mrf.mxu3  ;;  %v1356_v3 = vpack.c.bf16 %v1324_v9, %v1324_v9  ;;  %v1293_v35 = vpack.c.bf16 %v1261_v41, %v1261_v41 }
 0x27a   : > { %v5851_v49 = vadd.f32 %v3493_v20, %v3405_v36  ;;  %v3317_v50 = vpop.f32.mrf.mxu1 }
 0x27b   : > { %v5854_v2 = vadd.f32 %v3317_v50, %v5665_v13  ;;  %3586 = vmatmul.bf16.gmra.mxu0 %v5715_v52  ;;  %v1932_v13 = vunpack.c.l.b16 %v1227_v0  ;;  %v2124_v5 = vunpack.c.l.b16 %v1356_v3  ;;  %v5021_v50 = vld [vmem:[%s6452_s10 + $0x20] sm:$0xff]  ;;  %v2030_v59 = vunpack.c.l.b16 %v1293_v35 }
 0x27c   : > { %4143 = vmatpush.bf16.msra.mxu3 %v5021_v50 }
 0x27d   : > { %3448 = vmatmul.bf16.gmra.mxu2 %v2047_v15  ;;  %v5863_v58 = vpack.c.b16 %v1933_v30, %v1932_v13  ;;  %v2143_v20 = vpack.c.b16 %v2125_v19, %v2124_v5  ;;  %v1198_v15 = vld [vmem:[#allocation2 + $0x171] sm:$0xff]  ;;  %v5883_v17 = vpack.c.b16 %v2031_v34, %v2030_v59 }
 0x27e   : > { %v1230_v41 = vpack.c.bf16 %v1198_v15, %v1198_v15  ;;  %v1264_v5 = vld [vmem:[#allocation2 + $0x18a] sm:$0xff]  ;;  %v1199_v15 = vld [vmem:[#allocation2 + $0x181] sm:$0xff] }
 0x27f   : > { %v1296_v50 = vpack.c.bf16 %v1264_v5, %v1264_v5 }
 0x280   : > { %v3273_v16 = vpop.f32.mrf.mxu0  ;;  %v3409_v36 = vpop.f32.mrf.mxu2 }
 0x281   : > { %v5858_v24 = vadd.f32 %v3273_v16, %v5713_v46  ;;  %v5860_v33 = vpop.f32.mrf.mxu3  ;;  %v5013_v46 = vld [vmem:[%s6449_s7 + $0x20] sm:$0xff]  ;;  %v1197_v16 = vld [vmem:[#allocation2 + $0x169] sm:$0xff] }
 0x282   : > { %v3320_v52 = vpop.f32.mrf.mxu1  ;;  %3918 = vmatpush.bf16.msra.mxu2 %v5013_v46  ;;  %v1229_v13 = vpack.c.bf16 %v1197_v16, %v1197_v16 }
 0x283   : > { %v3321_v29 = vadd.f32 %v3320_v52, %v5679_v40  ;;  %v1263_v52 = vld [vmem:[#allocation2 + $0x182] sm:$0xff] }
 0x284   : > { %v1934_v45 = vunpack.c.l.b16 %v1229_v13  ;;  %v1295_v46 = vpack.c.bf16 %v1263_v52, %v1263_v52 }
 0x285   : > { %3359 = vmatmul.bf16.gmra.mxu1 %v5863_v58  ;;  %v3410_v63 = vadd.f32 %v3409_v36, %v3321_v29 }
 0x286   : > { %3537 = vmatmul.bf16.gmra.mxu3 %v2143_v20  ;;  %v2032_v34 = vunpack.c.l.b16 %v1295_v46 }
 0x288   : > { %v3276_v40 = vpop.f32.mrf.mxu0  ;;  %v5875_v0 = vpop.f32.mrf.mxu2 }
 0x289   : > { %v5873_v9 = vadd.f32 %v3276_v40, %v5726_v28  ;;  %v3498_v54 = vpop.f32.mrf.mxu3  ;;  %v1935_v28 = vunpack.c.l.b16 %v1230_v41  ;;  %v2033_v40 = vunpack.c.l.b16 %v1296_v50 }
 0x28a   : > { %v5877_v3 = vadd.f32 %v3498_v54, %v3410_v63  ;;  %v3322_v30 = vpop.f32.mrf.mxu1  ;;  %v1200_v54 = vld [vmem:[#allocation2 + $0x189] sm:$0xff] }
 0x28b   : > { %v5880_v19 = vadd.f32 %v3322_v30, %v5688_v31  ;;  %3591 = vmatmul.bf16.gmra.mxu0 %v5734_v11  ;;  %v5892_v63 = vpack.c.b16 %v1935_v28, %v1934_v45  ;;  %v5044_v28 = vld [vmem:[#allocation2] sm:$0xff]  ;;  %v1232_v5 = vpack.c.bf16 %v1200_v54, %v1200_v54  ;;  %v5907_v45 = vpack.c.b16 %v2033_v40, %v2032_v34  ;;  %v5012_v40 = vld [vmem:[%s6449_s7 + $0x18] sm:$0xff] }
 0x28c   : > { %3919 = vmatpush.bf16.msra.mxu2 %v5012_v40 }
 0x28d   : > { %3453 = vmatmul.bf16.gmra.mxu2 %v5883_v17 }
 0x290   : > { %v3278_v36 = vpop.f32.mrf.mxu0  ;;  %v3414_v31 = vpop.f32.mrf.mxu2 }
 0x291   : > { %v5887_v29 = vadd.f32 %v3278_v36, %v5732_v14  ;;  %v5889_v35 = vpop.f32.mrf.mxu3  ;;  %v1360_v36 = vpack.c.bf16 %v5044_v28, %v5044_v28 }
 0x292   : > { %v3325_v20 = vpop.f32.mrf.mxu1 }
 0x293   : > { %v3326_v11 = vadd.f32 %v3325_v20, %v5702_v42  ;;  %v1937_v20 = vunpack.c.l.b16 %v1232_v5 }
 0x295   : > { %3364 = vmatmul.bf16.gmra.mxu1 %v5892_v63  ;;  %v3415_v59 = vadd.f32 %v3414_v31, %v3326_v11 }
 0x296   : > { %3542 = vmatmul.bf16.gmra.mxu3 %v5721_v25  ;;  %v1231_v25 = vpack.c.bf16 %v1199_v15, %v1199_v15 }
 0x298   : > { %v3281_v14 = vpop.f32.mrf.mxu0  ;;  %v5899_v41 = vpop.f32.mrf.mxu2  ;;  %v1936_v31 = vunpack.c.l.b16 %v1231_v25 }
 0x299   : > { %v5897_v30 = vadd.f32 %v3281_v14, %v5746_v62  ;;  %v3503_v16 = vpop.f32.mrf.mxu3  ;;  %v2128_v62 = vunpack.c.l.b16 %v1360_v36 }
 0x29a   : > { %v5901_v42 = vadd.f32 %v3503_v16, %v3415_v59  ;;  %v3327_v13 = vpop.f32.mrf.mxu1  ;;  %v5916_v15 = vpack.c.b16 %v1937_v20, %v1936_v31  ;;  %v1426_v16 = vld [vmem:[#allocation2 + $0x32] sm:$0xff] }
 0x29b   : > { %v5904_v52 = vadd.f32 %v3327_v13, %v5711_v51  ;;  %3596 = vmatmul.bf16.gmra.mxu0 %v5757_v55  ;;  %v2145_v14 = vpack.c.b16 %v2128_v62, %v2128_v62  ;;  %v1427_v13 = vld [vmem:[#allocation2 + $0x3a] sm:$0xff]  ;;  %v1458_v31 = vpack.c.bf16 %v1426_v16, %v1426_v16 }
 0x29c   : > { %v1459_v20 = vpack.c.bf16 %v1427_v13, %v1427_v13 }
 0x29d   : > { %3458 = vmatmul.bf16.gmra.mxu2 %v5907_v45 }
 0x2a0   : > { %v3283_v11 = vpop.f32.mrf.mxu0  ;;  %v3419_v59 = vpop.f32.mrf.mxu2 }
 0x2a1   : > { %v5911_v46 = vadd.f32 %v3283_v11, %v5754_v4  ;;  %v5913_v50 = vpop.f32.mrf.mxu3  ;;  %v5020_v4 = vld [vmem:[%s6452_s10 + $0x18] sm:$0xff]  ;;  %v2290_v11 = vunpack.c.l.b16 %v1458_v31 }
 0x2a2   : > { %v3330_v51 = vpop.f32.mrf.mxu1  ;;  %4144 = vmatpush.bf16.msra.mxu3 %v5020_v4 }
 0x2a3   : > { %v3331_v55 = vadd.f32 %v3330_v51, %v5724_v12 }
 0x2a5   : > { %3369 = vmatmul.bf16.gmra.mxu1 %v5916_v15  ;;  %v3420_v34 = vadd.f32 %v3419_v59, %v3331_v55  ;;  %v2291_v59 = vunpack.c.l.b16 %v1459_v20 }
 0x2a6   : > { %3547 = vmatmul.bf16.gmra.mxu3 %v2145_v14 }
 0x2a8   : > { %v3562_v54 = vpop.f32.mrf.mxu0  ;;  %v5928_v36 = vpop.f32.mrf.mxu2 }
 0x2a9   : > { %v3508_v12 = vpop.f32.mrf.mxu3  ;;  %v5926_v28 = vadd.f32 %v3562_v54, %v5768_v32  ;;  %v2322_v54 = vpack.c.b16 %v2291_v59, %v2290_v11 }
 0x2aa   : > { %v5930_v25 = vadd.f32 %v3508_v12, %v3420_v34  ;;  %v3332_v5 = vpop.f32.mrf.mxu1  ;;  %v6457_v34 = vld [vmem:[#allocation3_spill] sm:$0xff] }
 0x2ab   : > { %v5933_v62 = vadd.f32 %v3332_v5, %v5730_v1  ;;  %3601 = vmatmul.bf16.gmra.mxu0 %v5777_v6  ;;  %v1428_v5 = vld [vmem:[#allocation2 + $0x4a] sm:$0xff]  ;;  %v1429_v6 = vld [vmem:[#allocation2 + $0x52] sm:$0xff] }
 0x2ac   : > { %v1460_v11 = vpack.c.bf16 %v1428_v5, %v1428_v5  ;;  %v1461_v59 = vpack.c.bf16 %v1429_v6, %v1429_v6  ;;  %v5019_v5 = vld [vmem:[%s6452_s10 + $0x10] sm:$0xff] }
 0x2ad   : > { %4145 = vmatpush.bf16.msra.mxu3 %v5019_v5 }
 0x2b0   : > { %v3564_v51 = vpop.f32.mrf.mxu0  ;;  %v3424_v55 = vpop.f32.mrf.mxu2 }
 0x2b1   : > { %v5936_v14 = vpop.f32.mrf.mxu3  ;;  %v5939_v32 = vadd.f32 %v3564_v51, %v5774_v27 }
 0x2b2   : > { %v3335_v40 = vpop.f32.mrf.mxu1 }
 0x2b3   : > { %v3336_v4 = vadd.f32 %v3335_v40, %v6457_v34  ;;  %v2293_v40 = vunpack.c.l.b16 %v1461_v59 }
 0x2b5   : > { %3650 = vmatmul.bf16.vlgmr.msra.gmra.mxu1 %v2322_v54  ;;  %v3425_v1 = vadd.f32 %v3424_v55, %v3336_v4  ;;  %v2292_v55 = vunpack.c.l.b16 %v1460_v11 }
 0x2b8   : > { %v3567_v12 = vpop.f32.mrf.mxu0  ;;  %v5945_v31 = vpop.f32.mrf.mxu2 }
 0x2b9   : > { %v3513_v16 = vpop.f32.mrf.mxu3  ;;  %v5943_v13 = vadd.f32 %v3567_v12, %v5789_v26 }
 0x2ba   : > { %v5947_v20 = vadd.f32 %v3513_v16, %v3425_v1  ;;  %v3337_v27 = vpop.f32.mrf.mxu1  ;;  %v2323_v16 = vpack.c.b16 %v2293_v40, %v2292_v55 }
 0x2bb   : > { %v5950_v51 = vadd.f32 %v3337_v27, %v5750_v8  ;;  %3606 = vmatmul.bf16.gmra.mxu0 %v5799_v53  ;;  %v5011_v53 = vld [vmem:[%s6449_s7 + $0x10] sm:$0xff] }
 0x2bc   : > { %3920 = vmatpush.bf16.msra.mxu2 %v5011_v53  ;;  %v1431_v27 = vld [vmem:[#allocation2 + $0x6a] sm:$0xff] }
 0x2c0   : > { %v3569_v34 = vpop.f32.mrf.mxu0  ;;  %v3429_v54 = vpop.f32.mrf.mxu2 }
 0x2c1   : > { %v5953_v4 = vpop.f32.mrf.mxu3  ;;  %v5956_v26 = vadd.f32 %v3569_v34, %v5796_v56  ;;  %v1430_v56 = vld [vmem:[#allocation2 + $0x62] sm:$0xff] }
 0x2c2   : > { %v3340_v12 = vpop.f32.mrf.mxu1 }
 0x2c3   : > { %v3341_v1 = vadd.f32 %v3340_v12, %v5766_v10  ;;  %v1463_v12 = vpack.c.bf16 %v1431_v27, %v1431_v27 }
 0x2c5   : > { %3655 = vmatmul.bf16.gmra.mxu1 %v2323_v16  ;;  %v3430_v8 = vadd.f32 %v3429_v54, %v3341_v1  ;;  %v1462_v54 = vpack.c.bf16 %v1430_v56, %v1430_v56  ;;  %v2295_v16 = vunpack.c.l.b16 %v1463_v12 }
 0x2c7   : > { %v2294_v1 = vunpack.c.l.b16 %v1462_v54 }
 0x2c8   : > { %v3572_v6 = vpop.f32.mrf.mxu0  ;;  %v5968_v10 = vpop.f32.mrf.mxu2 }
 0x2c9   : > { %v3518_v11 = vpop.f32.mrf.mxu3  ;;  %v5966_v59 = vadd.f32 %v3572_v6, %v5808_v21  ;;  %6458 = vst [vmem:[#allocation3_spill] sm:$0xff] %v5968_v10 }
 0x2ca   : > { %v5970_v55 = vadd.f32 %v3518_v11, %v3430_v8  ;;  %v3342_v40 = vpop.f32.mrf.mxu1  ;;  %v2324_v11 = vpack.c.b16 %v2295_v16, %v2294_v1 }
 0x2cb   : > { %v5973_v34 = vadd.f32 %v3342_v40, %v5772_v23  ;;  %3611 = vmatmul.bf16.gmra.mxu0 %v5818_v61  ;;  %v1433_v61 = vld [vmem:[#allocation2 + $0x82] sm:$0xff] }
 0x2cd   : > { %6459 = vst [vmem:[#allocation4_spill] sm:$0xff] %v5973_v34  ;;  %v1432_v34 = vld [vmem:[#allocation2 + $0x7a] sm:$0xff] }
 0x2d0   : > { %v3574_v53 = vpop.f32.mrf.mxu0  ;;  %v3434_v6 = vpop.f32.mrf.mxu2 }
 0x2d1   : > { %v5976_v5 = vpop.f32.mrf.mxu3  ;;  %v5979_v21 = vadd.f32 %v3574_v53, %v5815_v60 }
 0x2d2   : > { %v3345_v10 = vpop.f32.mrf.mxu1 }
 0x2d3   : > { %v3346_v8 = vadd.f32 %v3345_v10, %v5787_v7  ;;  %v1464_v7 = vpack.c.bf16 %v1432_v34, %v1432_v34  ;;  %v1465_v10 = vpack.c.bf16 %v1433_v61, %v1433_v61  ;;  %v5018_v34 = vld [vmem:[%s6452_s10 + $0x8] sm:$0xff]  ;;  %v1434_v61 = vld [vmem:[#allocation2 + $0x92] sm:$0xff] }
 0x2d4   : > { %4146 = vmatpush.bf16.msra.mxu3 %v5018_v34 }
 0x2d5   : > { %3660 = vmatmul.bf16.gmra.mxu1 %v2324_v11  ;;  %v3435_v23 = vadd.f32 %v3434_v6, %v3346_v8  ;;  %v2296_v1 = vunpack.c.l.b16 %v1464_v7  ;;  %v2297_v16 = vunpack.c.l.b16 %v1465_v10 }
 0x2d8   : > { %v3577_v40 = vpop.f32.mrf.mxu0  ;;  %v5985_v54 = vpop.f32.mrf.mxu2 }
 0x2d9   : > { %v3523_v56 = vpop.f32.mrf.mxu3  ;;  %v5983_v27 = vadd.f32 %v3577_v40, %v5830_v43 }
 0x2da   : > { %v5987_v12 = vadd.f32 %v3523_v56, %v3435_v23  ;;  %v3347_v60 = vpop.f32.mrf.mxu1  ;;  %v2325_v56 = vpack.c.b16 %v2297_v16, %v2296_v1  ;;  %v1466_v16 = vpack.c.bf16 %v1434_v61, %v1434_v61 }
 0x2db   : > { %v5990_v53 = vadd.f32 %v3347_v60, %v5794_v57  ;;  %3616 = vmatmul.bf16.gmra.mxu0 %v5840_v22  ;;  %v5010_v22 = vld [vmem:[%s6449_s7 + $0x8] sm:$0xff] }
 0x2dc   : > { %3921 = vmatpush.bf16.msra.mxu2 %v5010_v22 }
 0x2e0   : > { %v3579_v6 = vpop.f32.mrf.mxu0  ;;  %v3439_v11 = vpop.f32.mrf.mxu2 }
 0x2e1   : > { %v5993_v8 = vpop.f32.mrf.mxu3  ;;  %v5996_v43 = vadd.f32 %v3579_v6, %v5837_v44  ;;  %v1435_v44 = vld [vmem:[#allocation2 + $0x9a] sm:$0xff] }
 0x2e2   : > { %6460 = vst [vmem:[#allocation5_spill] sm:$0xff] %v5993_v8  ;;  %v3350_v40 = vpop.f32.mrf.mxu1  ;;  %v1467_v6 = vpack.c.bf16 %v1435_v44, %v1435_v44 }
 0x2e3   : > { %v3351_v23 = vadd.f32 %v3350_v40, %v5806_v47 }
 0x2e4   : > { %v2299_v40 = vunpack.c.l.b16 %v1467_v6 }
 0x2e5   : > { %3665 = vmatmul.bf16.gmra.mxu1 %v2325_v56  ;;  %v3440_v57 = vadd.f32 %v3439_v11, %v3351_v23  ;;  %v2298_v11 = vunpack.c.l.b16 %v1466_v16 }
 0x2e7   : > { %v2326_v8 = vpack.c.b16 %v2299_v40, %v2298_v11 }
 0x2e8   : > { %v6005_v7 = vpop.f32.mrf.mxu2 }
 0x2e9   : > { %v3528_v60 = vpop.f32.mrf.mxu3  ;;  %6461 = vst [vmem:[#allocation6_spill] sm:$0xff] %v6005_v7  ;;  %v1437_v7 = vld [vmem:[#allocation2 + $0xb2] sm:$0xff] }
 0x2ea   : > { %v6007_v10 = vadd.f32 %v3528_v60, %v3440_v57  ;;  %v3352_v47 = vpop.f32.mrf.mxu1  ;;  %v1436_v60 = vld [vmem:[#allocation2 + $0xaa] sm:$0xff]  ;;  %v1469_v16 = vpack.c.bf16 %v1437_v7, %v1437_v7  ;;  %v1438_v7 = vld [vmem:[#allocation2 + $0xc2] sm:$0xff] }
 0x2eb   : > { %v6010_v1 = vadd.f32 %v3352_v47, %v5813_v37  ;;  %3621 = vmatmul.bf16.gmra.mxu0 %v5863_v58  ;;  %v1468_v44 = vpack.c.bf16 %v1436_v60, %v1436_v60 }
 0x2ec   : > { %6462 = vst [vmem:[#allocation7_spill] sm:$0xff] %v6007_v10 }
 0x2ed   : > { %v2300_v6 = vunpack.c.l.b16 %v1468_v44  ;;  %v5045_v44 = vld [vmem:[%s5179_s14] sm:$0xff] }
 0x2f0   : > { %v3444_v56 = vpop.f32.mrf.mxu2 }
 0x2f1   : > { %v6013_v23 = vpop.f32.mrf.mxu3 }
 0x2f2   : > { %v3355_v22 = vpop.f32.mrf.mxu1 }
 0x2f3   : > { %v3356_v34 = vadd.f32 %v3355_v22, %v5828_v39  ;;  %v2301_v39 = vunpack.c.l.b16 %v1469_v16 }
 0x2f5   : > { %3670 = vmatmul.bf16.gmra.mxu1 %v2326_v8  ;;  %v3445_v57 = vadd.f32 %v3444_v56, %v3356_v34  ;;  %v2327_v22 = vpack.c.b16 %v2301_v39, %v2300_v6  ;;  %v1439_v34 = vld [vmem:[#allocation2 + $0xca] sm:$0xff]  ;;  %v1470_v6 = vpack.c.bf16 %v1438_v7, %v1438_v7 }
 0x2f6   : > { %v1471_v39 = vpack.c.bf16 %v1439_v34, %v1439_v34  ;;  %v1440_v34 = vld [vmem:[#allocation2 + $0xda] sm:$0xff] }
 0x2f8   : > { %v6016_v37 = vpop.f32.mrf.mxu2 }
 0x2f9   : > { %v3533_v10 = vpop.f32.mrf.mxu3 }
 0x2fa   : > { %v6018_v47 = vadd.f32 %v3533_v10, %v3445_v57  ;;  %v3357_v58 = vpop.f32.mrf.mxu1 }
 0x2fb   : > { %v6021_v61 = vadd.f32 %v3357_v58, %v5835_v48  ;;  %3626 = vmatmul.bf16.gmra.mxu0 %v5892_v63  ;;  %v5009_v48 = vld [vmem:[%s6449_s7] sm:$0xff] }
 0x2fc   : > { %v5017_v63 = vld [vmem:[%s6452_s10] sm:$0xff]  ;;  %3922 = vmatpush.bf16.msra.mxu2 %v5009_v48 }
 0x2fd   : > { %4147 = vmatpush.bf16.msra.mxu3 %v5017_v63 }
 0x300   : > { %v3449_v8 = vpop.f32.mrf.mxu2  ;;  %4148 = vmatmul.bf16.vlgmr.msra.gmra.mxu3 %v5045_v44 }
 0x301   : > { %v6024_v11 = vpop.f32.mrf.mxu3 }
 0x302   : > { %6463 = vst [vmem:[#allocation8_spill] sm:$0xff] %v6024_v11  ;;  %v3360_v40 = vpop.f32.mrf.mxu1 }
 0x303   : > { %v3361_v56 = vadd.f32 %v3360_v40, %v5847_v38  ;;  %v1393_v40 = vld [vmem:[#allocation2 + $0x1a1] sm:$0xff] }
 0x304   : > { %v1425_v63 = vpack.c.bf16 %v1393_v40, %v1393_v40  ;;  %v5046_v40 = vld [vmem:[%s5179_s14 + $0x8] sm:$0xff] }
 0x305   : > { %3675 = vmatmul.bf16.gmra.mxu1 %v2327_v22  ;;  %v3450_v10 = vadd.f32 %v3449_v8, %v3361_v56  ;;  %v1392_v8 = vld [vmem:[#allocation2 + $0x199] sm:$0xff]  ;;  %v2302_v56 = vunpack.c.l.b16 %v1470_v6  ;;  %v2303_v22 = vunpack.c.l.b16 %v1471_v39 }
 0x306   : > { %v1424_v48 = vpack.c.bf16 %v1392_v8, %v1392_v8 }
 0x308   : > { %v6033_v60 = vpop.f32.mrf.mxu2 }
 0x309   : > { %v3538_v57 = vpop.f32.mrf.mxu3  ;;  %6464 = vst [vmem:[#allocation9_spill] sm:$0xff] %v6033_v60  ;;  %v2328_v60 = vpack.c.b16 %v2303_v22, %v2302_v56 }
 0x30a   : > { %v6035_v58 = vadd.f32 %v3538_v57, %v3450_v10  ;;  %v3362_v38 = vpop.f32.mrf.mxu1 }
 0x30b   : > { %v6039_v16 = vadd.f32 %v3362_v38, %v5858_v24  ;;  %3631 = vmatmul.bf16.gmra.mxu0 %v5916_v15  ;;  %v2224_v24 = vunpack.c.l.b16 %v1424_v48  ;;  %v2225_v38 = vunpack.c.l.b16 %v1425_v63 }
 0x30c   : > { %6465 = vst [vmem:[#allocation10_spill] sm:$0xff] %v6035_v58 }
 0x30d   : > { %6466 = vst [vmem:[#allocation11_spill] sm:$0xff] %v6039_v16  ;;  %v2241_v7 = vpack.c.b16 %v2225_v38, %v2224_v24  ;;  %v1441_v16 = vld [vmem:[#allocation2 + $0xe2] sm:$0xff]  ;;  %v1442_v24 = vld [vmem:[#allocation2 + $0xf2] sm:$0xff]  ;;  %v1443_v38 = vld [vmem:[#allocation2 + $0xfa] sm:$0xff] }
 0x30e   : > { %v1473_v56 = vpack.c.bf16 %v1441_v16, %v1441_v16 }
 0x310   : > { %v3454_v10 = vpop.f32.mrf.mxu2  ;;  %4153 = vmatmul.bf16.gmra.mxu3 %v5046_v40  ;;  %v2305_v22 = vunpack.c.l.b16 %v1473_v56  ;;  %v1475_v40 = vpack.c.bf16 %v1443_v38, %v1443_v38 }
 0x311   : > { %v6042_v11 = vpop.f32.mrf.mxu3 }
 0x312   : > { %6467 = vst [vmem:[#allocation12_spill] sm:$0xff] %v6042_v11  ;;  %v3365_v57 = vpop.f32.mrf.mxu1 }
 0x313   : > { %v3366_v44 = vadd.f32 %v3365_v57, %v5873_v9  ;;  %v1472_v9 = vpack.c.bf16 %v1440_v34, %v1440_v34  ;;  %v1474_v34 = vpack.c.bf16 %v1442_v24, %v1442_v24  ;;  %v5048_v24 = vld [vmem:[%s5179_s14 + $0x18] sm:$0xff] }
 0x315   : > { %3680 = vmatmul.bf16.gmra.mxu1 %v2328_v60  ;;  %v3455_v15 = vadd.f32 %v3454_v10, %v3366_v44  ;;  %v2304_v60 = vunpack.c.l.b16 %v1472_v9  ;;  %v2306_v9 = vunpack.c.l.b16 %v1474_v34 }
 0x317   : > { %v2329_v10 = vpack.c.b16 %v2305_v22, %v2304_v60 }
 0x318   : > { %v6047_v8 = vpop.f32.mrf.mxu2 }
 0x319   : > { %v3543_v58 = vpop.f32.mrf.mxu3 }
 0x31a   : > { %v6045_v6 = vadd.f32 %v3543_v58, %v3455_v15  ;;  %v3367_v39 = vpop.f32.mrf.mxu1 }
 0x31b   : > { %v6051_v11 = vadd.f32 %v3367_v39, %v5887_v29  ;;  %3636 = vmatmul.bf16.gmra.mxu0 %v2241_v7  ;;  %v5047_v7 = vld [vmem:[%s5179_s14 + $0x10] sm:$0xff] }
 0x320   : > { %v3459_v57 = vpop.f32.mrf.mxu2  ;;  %4158 = vmatmul.bf16.gmra.mxu3 %v5047_v7 }
 0x321   : > { %v6053_v48 = vpop.f32.mrf.mxu3 }
 0x322   : > { %v3370_v63 = vpop.f32.mrf.mxu1 }
 0x323   : > { %v3371_v58 = vadd.f32 %v3370_v63, %v5897_v30  ;;  %v2307_v30 = vunpack.c.l.b16 %v1475_v40  ;;  %v6066_v63 = vld [vmem:[%s6447_s5] ss:$0 sm:$0xff] }
 0x325   : > { %3685 = vmatmul.bf16.gmra.mxu1 %v2329_v10  ;;  %v3460_v44 = vadd.f32 %v3459_v57, %v3371_v58  ;;  %v2330_v60 = vpack.c.b16 %v2307_v30, %v2306_v9  ;;  %v1444_v58 = vld [vmem:[#allocation2 + $0x10a] sm:$0xff]  ;;  %v1445_v10 = vld [vmem:[#allocation2 + $0x112] sm:$0xff]  ;;  %v6079_v30 = vpop.f32.mrf.mxu0 }
 0x326   : > { %v1476_v38 = vpack.c.bf16 %v1444_v58, %v1444_v58  ;;  %v1446_v58 = vld [vmem:[#allocation2 + $0x122] sm:$0xff] }
 0x328   : > { %v2308_v40 = vunpack.c.l.b16 %v1476_v38  ;;  %v5049_v38 = vld [vmem:[%s5179_s14 + $0x20] sm:$0xff] }
 0x329   : > { %v3548_v15 = vpop.f32.mrf.mxu3 }
 0x32a   : > { %v3372_v29 = vpop.f32.mrf.mxu1  ;;  %v6056_v39 = vadd.f32 %v3548_v15, %v3460_v44  ;;  %v1477_v15 = vpack.c.bf16 %v1445_v10, %v1445_v10  ;;  %v1447_v10 = vld [vmem:[#allocation2 + $0x12a] sm:$0xff] }
 0x32b   : > { %v6060_v16 = vadd.f32 %v3372_v29, %v5911_v46  ;;  %v6072_v46 = vld [vmem:[%s6448_s6] ss:$0 sm:$0xff] }
 0x32c   : > { %6468 = vst [vmem:[#allocation13_spill] sm:$0xff] %v6056_v39  ;;  %v2309_v9 = vunpack.c.l.b16 %v1477_v15 }
 0x32d   : > { %6469 = vst [vmem:[#allocation14_spill] sm:$0xff] %v6060_v16 }
 0x330   : > { %4163 = vmatmul.bf16.gmra.mxu3 %v5048_v24  ;;  %v2331_v24 = vpack.c.b16 %v2309_v9, %v2308_v40 }
 0x332   : > { %v3651_v56 = vpop.f32.mrf.mxu1 }
 0x333   : > { %v3652_v22 = vadd.f32 %v3651_v56, %v5926_v28 }
 0x335   : > { %3690 = vmatmul.bf16.gmra.mxu1 %v2330_v60  ;;  %v3735_v57 = vmul.f32 %v6066_v63, %v3652_v22 }
 0x337   : > { %v3771_v29 = vadd.f32 %v6072_v46, %v3735_v57 }
 0x339   : > { %v3803_v56 = vmax.f32 %v3771_v29, 0.0  ;;  %v1478_v29 = vpack.c.bf16 %v1446_v58, %v1446_v58  ;;  %v1448_v58 = vld [vmem:[#allocation2 + $0x13a] sm:$0xff] }
 0x33a   : > { %v3653_v44 = vpop.f32.mrf.mxu1 }
 0x33b   : > { %v3654_v28 = vadd.f32 %v3653_v44, %v5939_v32  ;;  %v6083_v44 = vpop.f32.mrf.mxu0 }
 0x33d   : > { %v3736_v7 = vmul.f32 %v6066_v63, %v3654_v28 }
 0x33f   : > { %v3772_v34 = vadd.f32 %v6072_v46, %v3736_v7  ;;  %v1479_v7 = vpack.c.bf16 %v1447_v10, %v1447_v10  ;;  %v1449_v10 = vld [vmem:[#allocation2 + $0x142] sm:$0xff] }
 0x340   : > { %4168 = vmatmul.bf16.gmra.mxu3 %v5049_v38  ;;  %v5050_v38 = vld [vmem:[%s5179_s14 + $0x28] sm:$0xff] }
 0x341   : > { %v3804_v60 = vmax.f32 %v3772_v34, 0.0  ;;  %v2311_v9 = vunpack.c.l.b16 %v1479_v7  ;;  %v1481_v7 = vpack.c.bf16 %v1449_v10, %v1449_v10  ;;  %v1451_v10 = vld [vmem:[#allocation2 + $0x15a] sm:$0xff] }
 0x342   : > { %v3656_v22 = vpop.f32.mrf.mxu1 }
 0x343   : > { %v3835_v16 = vpack.c.bf16 %v3804_v60, %v3803_v56  ;;  %v3657_v32 = vadd.f32 %v3656_v22, %v5943_v13  ;;  %v6090_v39 = vpop.f32.mrf.mxu0 }
 0x345   : > { %3695 = vmatmul.bf16.gmra.mxu1 %v2331_v24  ;;  %3923 = vmatmul.bf16.vlgmr.msra.gmra.mxu2 %v3835_v16  ;;  %v3737_v57 = vmul.f32 %v6066_v63, %v3657_v32  ;;  %v2310_v16 = vunpack.c.l.b16 %v1478_v29  ;;  %v1480_v29 = vpack.c.bf16 %v1448_v58, %v1448_v58  ;;  %v1450_v58 = vld [vmem:[#allocation2 + $0x152] sm:$0xff] }
 0x347   : > { %v3773_v34 = vadd.f32 %v6072_v46, %v3737_v57  ;;  %v2332_v24 = vpack.c.b16 %v2311_v9, %v2310_v16  ;;  %v2312_v16 = vunpack.c.l.b16 %v1480_v29  ;;  %v2313_v9 = vunpack.c.l.b16 %v1481_v7 }
 0x348   : > { %v1482_v29 = vpack.c.bf16 %v1450_v58, %v1450_v58  ;;  %v1483_v7 = vpack.c.bf16 %v1451_v10, %v1451_v10 }
 0x349   : > { %v3805_v56 = vmax.f32 %v3773_v34, 0.0 }
 0x34a   : > { %v3658_v28 = vpop.f32.mrf.mxu1 }
 0x34b   : > { %v3659_v15 = vadd.f32 %v3658_v28, %v5956_v26 }
 0x34d   : > { %v3738_v40 = vmul.f32 %v6066_v63, %v3659_v15 }
 0x34f   : > { %v3774_v13 = vadd.f32 %v6072_v46, %v3738_v40 }
 0x350   : > { %4173 = vmatmul.bf16.gmra.mxu3 %v5050_v38  ;;  %v5051_v38 = vld [vmem:[%s5179_s14 + $0x30] sm:$0xff] }
 0x351   : > { %v3806_v60 = vmax.f32 %v3774_v13, 0.0  ;;  %v3589_v13 = vpop.f32.mrf.mxu0 }
 0x352   : > { %v3661_v22 = vpop.f32.mrf.mxu1 }
 0x353   : > { %v3836_v32 = vpack.c.bf16 %v3806_v60, %v3805_v56  ;;  %v3662_v26 = vadd.f32 %v3661_v22, %v5966_v59 }
 0x355   : > { %3700 = vmatmul.bf16.gmra.mxu1 %v2332_v24  ;;  %3928 = vmatmul.bf16.gmra.mxu2 %v3836_v32  ;;  %v3739_v57 = vmul.f32 %v6066_v63, %v3662_v26  ;;  %v2333_v24 = vpack.c.b16 %v2313_v9, %v2312_v16  ;;  %v2315_v16 = vunpack.c.l.b16 %v1483_v7 }
 0x357   : > { %v3775_v34 = vadd.f32 %v6072_v46, %v3739_v57 }
 0x359   : > { %v3807_v56 = vmax.f32 %v3775_v34, 0.0 }
 0x35a   : > { %v3663_v28 = vpop.f32.mrf.mxu1 }
 0x35b   : > { %v3664_v15 = vadd.f32 %v3663_v28, %v5979_v21  ;;  %v3592_v21 = vpop.f32.mrf.mxu0 }
 0x35d   : > { %v3740_v40 = vmul.f32 %v6066_v63, %v3664_v15 }
 0x35f   : > { %v3776_v59 = vadd.f32 %v6072_v46, %v3740_v40 }
 0x360   : > { %4178 = vmatmul.bf16.gmra.mxu3 %v5051_v38 }
 0x361   : > { %v3808_v60 = vmax.f32 %v3776_v59, 0.0  ;;  %v2314_v59 = vunpack.c.l.b16 %v1482_v29 }
 0x362   : > { %v3666_v22 = vpop.f32.mrf.mxu1 }
 0x363   : > { %v3837_v32 = vpack.c.bf16 %v3808_v60, %v3807_v56  ;;  %v3667_v26 = vadd.f32 %v3666_v22, %v5983_v27  ;;  %v3594_v60 = vpop.f32.mrf.mxu0 }
 0x365   : > { %3705 = vmatmul.bf16.gmra.mxu1 %v2333_v24  ;;  %3933 = vmatmul.bf16.gmra.mxu2 %v3837_v32  ;;  %v3741_v57 = vmul.f32 %v6066_v63, %v3667_v26  ;;  %v3583_v24 = vadd.f32 %v6079_v30, %v5851_v49  ;;  %v2334_v32 = vpack.c.b16 %v2315_v16, %v2314_v59 }
 0x366   : > { %v3407_v26 = vadd.f32 %v5849_v18, %v5854_v2 }
 0x367   : > { %v3777_v34 = vadd.f32 %v6072_v46, %v3741_v57 }
 0x368   : > { %v3496_v10 = vadd.f32 %v5860_v33, %v3407_v26  ;;  %v3588_v33 = vadd.f32 %v6090_v39, %v5877_v3 }
 0x369   : > { %v3809_v9 = vmax.f32 %v3777_v34, 0.0 }
 0x36a   : > { %v3668_v28 = vpop.f32.mrf.mxu1  ;;  %v3585_v57 = vadd.f32 %v6083_v44, %v3496_v10  ;;  %v3417_v10 = vadd.f32 %v5899_v41, %v5904_v52 }
 0x36b   : > { %v3669_v15 = vadd.f32 %v3668_v28, %v5996_v43  ;;  %v3597_v7 = vpop.f32.mrf.mxu0 }
 0x36d   : > { %v3742_v40 = vmul.f32 %v6066_v63, %v3669_v15  ;;  %v5052_v15 = vld [vmem:[%s5179_s14 + $0x38] sm:$0xff] }
 0x36f   : > { %v3778_v27 = vadd.f32 %v6072_v46, %v3742_v40 }
 0x370   : > { %4183 = vmatmul.bf16.gmra.mxu3 %v5052_v15  ;;  %v3506_v15 = vadd.f32 %v5913_v50, %v3417_v10 }
 0x371   : > { %v3810_v56 = vmax.f32 %v3778_v27, 0.0  ;;  %v3412_v27 = vadd.f32 %v5875_v0, %v5880_v19 }
 0x372   : > { %v3671_v22 = vpop.f32.mrf.mxu1 }
 0x373   : > { %v3838_v43 = vpack.c.bf16 %v3810_v56, %v3809_v9  ;;  %v3672_v58 = vadd.f32 %v3671_v22, %v3583_v24  ;;  %v3599_v16 = vpop.f32.mrf.mxu0  ;;  %v3501_v9 = vadd.f32 %v5889_v35, %v3412_v27  ;;  %v3593_v35 = vadd.f32 %v3592_v21, %v5901_v42  ;;  %v5054_v42 = vld [vmem:[%s5179_s14 + $0x48] sm:$0xff] }
 0x375   : > { %3710 = vmatmul.bf16.gmra.mxu1 %v2334_v32  ;;  %3938 = vmatmul.bf16.gmra.mxu2 %v3838_v43  ;;  %v3743_v28 = vmul.f32 %v6066_v63, %v3672_v58  ;;  %v3590_v56 = vadd.f32 %v3589_v13, %v3501_v9  ;;  %v5053_v32 = vld [vmem:[%s5179_s14 + $0x40] sm:$0xff]  ;;  %v3598_v9 = vadd.f32 %v3597_v7, %v5930_v25 }
 0x377   : > { %v3779_v49 = vadd.f32 %v6072_v46, %v3743_v28  ;;  %v1456_v28 = vld [vmem:[#allocation2 + $0x19a] sm:$0xff] }
 0x379   : > { %v3811_v2 = vmax.f32 %v3779_v49, 0.0 }
 0x37a   : > { %v3673_v38 = vpop.f32.mrf.mxu1 }
 0x37b   : > { %v3674_v29 = vadd.f32 %v3673_v38, %v3585_v57  ;;  %v3602_v19 = vpop.f32.mrf.mxu0  ;;  %v1457_v38 = vld [vmem:[#allocation2 + $0x1a2] sm:$0xff] }
 0x37d   : > { %v3744_v30 = vmul.f32 %v6066_v63, %v3674_v29  ;;  %v3595_v29 = vadd.f32 %v3594_v60, %v3506_v15 }
 0x37f   : > { %v3780_v18 = vadd.f32 %v6072_v46, %v3744_v30  ;;  %v1488_v30 = vpack.c.bf16 %v1456_v28, %v1456_v28  ;;  %v3427_v28 = vadd.f32 %v5945_v31, %v5950_v51  ;;  %v6160_v51 = vpop.f32.mrf.mxu2 }
 0x380   : > { %4188 = vmatmul.bf16.gmra.mxu3 %v5053_v32 }
 0x381   : > { %v3812_v34 = vmax.f32 %v3780_v18, 0.0  ;;  %v1489_v18 = vpack.c.bf16 %v1457_v38, %v1457_v38  ;;  %v3516_v15 = vadd.f32 %v5953_v4, %v3427_v28 }
 0x382   : > { %v3676_v40 = vpop.f32.mrf.mxu1 }
 0x383   : > { %v3839_v44 = vpack.c.bf16 %v3812_v34, %v3811_v2  ;;  %v3677_v59 = vadd.f32 %v3676_v40, %v3588_v33  ;;  %v3604_v2 = vpop.f32.mrf.mxu0  ;;  %v6135_v40 = vpop.f32.mrf.mxu3  ;;  %v2321_v33 = vunpack.c.l.b16 %v1489_v18 }
 0x385   : > { %3715 = vmatmul.bf16.gmra.mxu1 %v5883_v17  ;;  %3943 = vmatmul.bf16.gmra.mxu2 %v3839_v44  ;;  %v3745_v22 = vmul.f32 %v6066_v63, %v3677_v59 }
 0x387   : > { %v3781_v3 = vadd.f32 %v6072_v46, %v3745_v22 }
 0x389   : > { %v3813_v26 = vmax.f32 %v3781_v3, 0.0 }
 0x38a   : > { %v3678_v24 = vpop.f32.mrf.mxu1 }
 0x38b   : > { %v3679_v43 = vadd.f32 %v3678_v24, %v3590_v56  ;;  %v3607_v22 = vpop.f32.mrf.mxu0  ;;  %v3422_v24 = vadd.f32 %v5928_v36, %v5933_v62 }
 0x38d   : > { %v3746_v39 = vmul.f32 %v6066_v63, %v3679_v43  ;;  %v4149_v43 = vpop.f32.mrf.mxu3  ;;  %v3511_v3 = vadd.f32 %v5936_v14, %v3422_v24  ;;  %v3603_v14 = vadd.f32 %v3602_v19, %v5947_v20 }
 0x38f   : > { %v3782_v0 = vadd.f32 %v6072_v46, %v3746_v39  ;;  %v3600_v39 = vadd.f32 %v3599_v16, %v3511_v3 }
 0x390   : > { %4193 = vmatmul.bf16.gmra.mxu3 %v5054_v42  ;;  %v5056_v42 = vld [vmem:[%s5179_s14 + $0x58] sm:$0xff] }
 0x391   : > { %v3814_v17 = vmax.f32 %v3782_v0, 0.0 }
 0x392   : > { %v3681_v58 = vpop.f32.mrf.mxu1 }
 0x393   : > { %v3840_v13 = vpack.c.bf16 %v3814_v17, %v3813_v26  ;;  %v3682_v57 = vadd.f32 %v3681_v58, %v3593_v35  ;;  %v5055_v17 = vld [vmem:[%s5179_s14 + $0x50] sm:$0xff]  ;;  %v3609_v35 = vpop.f32.mrf.mxu0 }
 0x395   : > { %3720 = vmatmul.bf16.gmra.mxu1 %v5907_v45  ;;  %3948 = vmatmul.bf16.gmra.mxu2 %v3840_v13  ;;  %v3747_v49 = vmul.f32 %v6066_v63, %v3682_v57  ;;  %v2320_v45 = vunpack.c.l.b16 %v1488_v30  ;;  %v4151_v62 = vpop.f32.mrf.mxu3  ;;  %v3605_v30 = vadd.f32 %v3604_v2, %v3516_v15  ;;  %v6165_v2 = vld [vmem:[%s6453_s11] ss:$0 sm:$0xff] }
 0x397   : > { %v3783_v41 = vadd.f32 %v6072_v46, %v3747_v49  ;;  %v2337_v27 = vpack.c.b16 %v2321_v33, %v2320_v45 }
 0x399   : > { %v3815_v60 = vmax.f32 %v3783_v41, 0.0 }
 0x39a   : > { %v3683_v34 = vpop.f32.mrf.mxu1 }
 0x39b   : > { %v3684_v21 = vadd.f32 %v3683_v34, %v3595_v29  ;;  %v3612_v49 = vpop.f32.mrf.mxu0 }
 0x39d   : > { %v3748_v52 = vmul.f32 %v6066_v63, %v3684_v21  ;;  %v4154_v29 = vpop.f32.mrf.mxu3 }
 0x39f   : > { %v3784_v50 = vadd.f32 %v6072_v46, %v3748_v52 }
 0x3a0   : > { %4198 = vmatmul.bf16.gmra.mxu3 %v5055_v17 }
 0x3a1   : > { %v3816_v44 = vmax.f32 %v3784_v50, 0.0  ;;  %v3608_v50 = vadd.f32 %v3607_v22, %v5970_v55  ;;  %v6185_v22 = vld [vmem:[%s6451_s9] ss:$0 sm:$0xff] }
 0x3a2   : > { %v3686_v59 = vpop.f32.mrf.mxu1 }
 0x3a3   : > { %v3841_v56 = vpack.c.bf16 %v3816_v44, %v3815_v60  ;;  %v3687_v32 = vadd.f32 %v3686_v59, %v3598_v9  ;;  %v3614_v45 = vpop.f32.mrf.mxu0  ;;  %v6470_v44 = vld [vmem:[#allocation4_spill] sm:$0xff]  ;;  %v4233_v9 = vmul.f32 %v6165_v2, %v4149_v43 }
 0x3a5   : > { %3725 = vmatmul.bf16.gmra.mxu1 %v2337_v27  ;;  %3953 = vmatmul.bf16.gmra.mxu2 %v3841_v56  ;;  %v3749_v0 = vmul.f32 %v6066_v63, %v3687_v32  ;;  %v6158_v31 = vpop.f32.mrf.mxu3  ;;  %v6471_v27 = vld [vmem:[#allocation3_spill] sm:$0xff]  ;;  %v6174_v56 = vld [vmem:[%s6454_s12] ss:$0 sm:$0xff] }
 0x3a6   : > { %v3432_v59 = vadd.f32 %v6471_v27, %v6470_v44  ;;  %v6179_v32 = vld [vmem:[%s6450_s8] ss:$0 sm:$0xff] }
 0x3a7   : > { %v3785_v25 = vadd.f32 %v6072_v46, %v3749_v0  ;;  %v4269_v0 = vadd.f32 %v6174_v56, %v4233_v9 }
 0x3a8   : > { %v3521_v55 = vadd.f32 %v5976_v5, %v3432_v59 }
 0x3a9   : > { %v3817_v13 = vmax.f32 %v3785_v25, 0.0  ;;  %v5057_v25 = vld [vmem:[%s5179_s14 + $0x60] sm:$0xff] }
 0x3aa   : > { %v3688_v26 = vpop.f32.mrf.mxu1 }
 0x3ab   : > { %v3689_v58 = vadd.f32 %v3688_v26, %v3600_v39  ;;  %v3610_v39 = vadd.f32 %v3609_v35, %v3521_v55 }
 0x3ad   : > { %v3750_v7 = vmul.f32 %v6066_v63, %v3689_v58  ;;  %v6187_v43 = vpop.f32.mrf.mxu3 }
 0x3af   : > { %v3786_v36 = vadd.f32 %v6072_v46, %v3750_v7 }
 0x3b0   : > { %4203 = vmatmul.bf16.gmra.mxu3 %v5056_v42  ;;  %v3613_v42 = vadd.f32 %v3612_v49, %v5987_v12 }
 0x3b1   : > { %v3818_v10 = vmax.f32 %v3786_v36, 0.0  ;;  %v3617_v36 = vpop.f32.mrf.mxu0 }
 0x3b2   : > { %v3691_v57 = vpop.f32.mrf.mxu1 }
 0x3b3   : > { %v3842_v16 = vpack.c.bf16 %v3818_v10, %v3817_v13  ;;  %v3692_v38 = vadd.f32 %v3691_v57, %v3603_v14  ;;  %v4234_v14 = vmul.f32 %v6165_v2, %v4151_v62  ;;  %v3437_v62 = vadd.f32 %v5985_v54, %v5990_v53 }
 0x3b5   : > { %3958 = vmatmul.bf16.gmra.mxu2 %v3842_v16  ;;  %v3751_v18 = vmul.f32 %v6066_v63, %v3692_v38  ;;  %v6204_v28 = vpop.f32.mrf.mxu3 }
 0x3b7   : > { %v3787_v41 = vadd.f32 %v6072_v46, %v3751_v18 }
 0x3b9   : > { %v3819_v4 = vmax.f32 %v3787_v41, 0.0 }
 0x3ba   : > { %v3693_v34 = vpop.f32.mrf.mxu1 }
 0x3bb   : > { %v3694_v21 = vadd.f32 %v3693_v34, %v3605_v30 }
 0x3bd   : > { %v3752_v20 = vmul.f32 %v6066_v63, %v3694_v21  ;;  %v4270_v21 = vadd.f32 %v6174_v56, %v4234_v14  ;;  %v6215_v27 = vpop.f32.mrf.mxu3 }
 0x3bf   : > { %v3788_v19 = vadd.f32 %v6072_v46, %v3752_v20 }
 0x3c0   : > { %4208 = vmatmul.bf16.gmra.mxu3 %v5057_v25 }
 0x3c1   : > { %v3820_v52 = vmax.f32 %v3788_v19, 0.0 }
 0x3c2   : > { %v3696_v33 = vpop.f32.mrf.mxu1 }
 0x3c3   : > { %v3843_v60 = vpack.c.bf16 %v3820_v52, %v3819_v4  ;;  %v3697_v24 = vadd.f32 %v3696_v33, %v3608_v50  ;;  %v4235_v4 = vmul.f32 %v6165_v2, %v4154_v29  ;;  %v3619_v33 = vpop.f32.mrf.mxu0  ;;  %v6472_v50 = vld [vmem:[#allocation5_spill] sm:$0xff]  ;;  %v5058_v29 = vld [vmem:[%s5179_s14 + $0x68] sm:$0xff] }
 0x3c5   : > { %3963 = vmatmul.bf16.gmra.mxu2 %v3843_v60  ;;  %v3753_v26 = vmul.f32 %v6066_v63, %v3697_v24  ;;  %v3526_v60 = vadd.f32 %v6472_v50, %v3437_v62  ;;  %v4271_v59 = vadd.f32 %v6174_v56, %v4235_v4 }
 0x3c7   : > { %v3789_v13 = vadd.f32 %v6072_v46, %v3753_v26  ;;  %v3615_v49 = vadd.f32 %v3614_v45, %v3526_v60  ;;  %v4236_v26 = vmul.f32 %v6165_v2, %v6158_v31 }
 0x3c8   : > { %v3924_v3 = vpop.f32.mrf.mxu2 }
 0x3c9   : > { %v4008_v17 = vmul.f32 %v6179_v32, %v3924_v3  ;;  %v3821_v15 = vmax.f32 %v3789_v13, 0.0 }
 0x3ca   : > { %v3698_v58 = vpop.f32.mrf.mxu1 }
 0x3cb   : > { %v4044_v5 = vadd.f32 %v6185_v22, %v4008_v17  ;;  %v3699_v7 = vadd.f32 %v3698_v58, %v3610_v39  ;;  %v6228_v58 = vpop.f32.mrf.mxu3  ;;  %v3622_v25 = vpop.f32.mrf.mxu0 }
 0x3cd   : > { %v4301_v10 = vadd.f32 %v4269_v0, %v4044_v5  ;;  %v3754_v57 = vmul.f32 %v6066_v63, %v3699_v7 }
 0x3cf   : > { %v4333_v35 = vmax.f32 %v4301_v10, 0.0  ;;  %v3790_v16 = vadd.f32 %v6072_v46, %v3754_v57 }
 0x3d0   : > { %v3926_v38 = vpop.f32.mrf.mxu2  ;;  %4213 = vmatmul.bf16.gmra.mxu3 %v5058_v29 }
 0x3d1   : > { %4365 = vst [vmem:[%s6200_s18] sm:$0xff] %v4333_v35  ;;  %v3822_v30 = vmax.f32 %v3790_v16, 0.0  ;;  %v4009_v18 = vmul.f32 %v6179_v32, %v3926_v38  ;;  %v6473_v35 = vld [vmem:[#allocation7_spill] sm:$0xff]  ;;  %v4272_v16 = vadd.f32 %v6174_v56, %v4236_v26 }
 0x3d2   : > { %v3701_v34 = vpop.f32.mrf.mxu1  ;;  %v3618_v14 = vadd.f32 %v3617_v36, %v6473_v35 }
 0x3d3   : > { %v4045_v41 = vadd.f32 %v6185_v22, %v4009_v18  ;;  %v3844_v20 = vpack.c.bf16 %v3822_v30, %v3821_v15  ;;  %v3702_v52 = vadd.f32 %v3701_v34, %v3613_v42  ;;  %v6474_v15 = vld [vmem:[#allocation6_spill] sm:$0xff]  ;;  %v4237_v34 = vmul.f32 %v6165_v2, %v6187_v43  ;;  %v5059_v43 = vld [vmem:[%s5179_s14 + $0x70] sm:$0xff] }
 0x3d4   : > { %v3442_v30 = vadd.f32 %v6474_v15, %v6010_v1 }
 0x3d5   : > { %v4302_v19 = vadd.f32 %v4270_v21, %v4045_v41  ;;  %3968 = vmatmul.bf16.gmra.mxu2 %v3844_v20  ;;  %v3755_v9 = vmul.f32 %v6066_v63, %v3702_v52  ;;  %v6240_v20 = vpop.f32.mrf.mxu3  ;;  %v3624_v52 = vpop.f32.mrf.mxu0 }
 0x3d6   : > { %v3531_v21 = vadd.f32 %v6013_v23, %v3442_v30 }
 0x3d7   : > { %v4334_v44 = vmax.f32 %v4302_v19, 0.0  ;;  %v3791_v3 = vadd.f32 %v6072_v46, %v3755_v9  ;;  %v4273_v19 = vadd.f32 %v6174_v56, %v4237_v34 }
 0x3d8   : > { %v3929_v12 = vpop.f32.mrf.mxu2  ;;  %v3620_v62 = vadd.f32 %v3619_v33, %v3531_v21 }
 0x3d9   : > { %4366 = vst [vmem:[%s6200_s18 + $0x8] sm:$0xff] %v4334_v44  ;;  %v4010_v54 = vmul.f32 %v6179_v32, %v3929_v12  ;;  %v3823_v7 = vmax.f32 %v3791_v3, 0.0 }
 0x3da   : > { %v3703_v53 = vpop.f32.mrf.mxu1 }
 0x3db   : > { %v4046_v24 = vadd.f32 %v6185_v22, %v4010_v54  ;;  %v3704_v55 = vadd.f32 %v3703_v53, %v3615_v49 }
 0x3dd   : > { %v4303_v39 = vadd.f32 %v4271_v59, %v4046_v24  ;;  %v3756_v0 = vmul.f32 %v6066_v63, %v3704_v55  ;;  %v4238_v59 = vmul.f32 %v6165_v2, %v6204_v28  ;;  %v6253_v54 = vpop.f32.mrf.mxu3  ;;  %v3627_v28 = vpop.f32.mrf.mxu0 }
 0x3df   : > { %v4335_v45 = vmax.f32 %v4303_v39, 0.0  ;;  %v3792_v17 = vadd.f32 %v6072_v46, %v3756_v0  ;;  %v3623_v39 = vadd.f32 %v3622_v25, %v6018_v47  ;;  %v4274_v0 = vadd.f32 %v6174_v56, %v4238_v59 }
 0x3e0   : > { %v3931_v5 = vpop.f32.mrf.mxu2  ;;  %4218 = vmatmul.bf16.gmra.mxu3 %v5059_v43  ;;  %v6476_v43 = vld [vmem:[#allocation10_spill] sm:$0xff] }
 0x3e1   : > { %4367 = vst [vmem:[%s6200_s18 + $0x10] sm:$0xff] %v4335_v45  ;;  %v3824_v13 = vmax.f32 %v3792_v17, 0.0  ;;  %v4011_v10 = vmul.f32 %v6179_v32, %v3931_v5  ;;  %v3447_v17 = vadd.f32 %v6016_v37, %v6021_v61 }
 0x3e2   : > { %v3706_v57 = vpop.f32.mrf.mxu1 }
 0x3e3   : > { %v4047_v38 = vadd.f32 %v6185_v22, %v4011_v10  ;;  %v3845_v31 = vpack.c.bf16 %v3824_v13, %v3823_v7  ;;  %v3707_v42 = vadd.f32 %v3706_v57, %v3618_v14  ;;  %v4239_v7 = vmul.f32 %v6165_v2, %v6215_v27  ;;  %v6475_v10 = vld [vmem:[#allocation8_spill] sm:$0xff] }
 0x3e4   : > { %v3536_v57 = vadd.f32 %v6475_v10, %v3447_v17 }
 0x3e5   : > { %v4304_v18 = vadd.f32 %v4272_v16, %v4047_v38  ;;  %3973 = vmatmul.bf16.gmra.mxu2 %v3845_v31  ;;  %v3757_v4 = vmul.f32 %v6066_v63, %v3707_v42  ;;  %v6265_v47 = vpop.f32.mrf.mxu3  ;;  %v4275_v16 = vadd.f32 %v6174_v56, %v4239_v7  ;;  %v5060_v31 = vld [vmem:[%s5179_s14 + $0x78] sm:$0xff]  ;;  %v3629_v42 = vpop.f32.mrf.mxu0 }
 0x3e6   : > { %v3625_v14 = vadd.f32 %v3624_v52, %v3536_v57 }
 0x3e7   : > { %v4336_v41 = vmax.f32 %v4304_v18, 0.0  ;;  %v3793_v44 = vadd.f32 %v6072_v46, %v3757_v4 }
 0x3e8   : > { %v3934_v36 = vpop.f32.mrf.mxu2 }
 0x3e9   : > { %4368 = vst [vmem:[%s6200_s18 + $0x18] sm:$0xff] %v4336_v41  ;;  %v4012_v1 = vmul.f32 %v6179_v32, %v3934_v36  ;;  %v3825_v29 = vmax.f32 %v3793_v44, 0.0  ;;  %v4240_v41 = vmul.f32 %v6165_v2, %v6228_v58  ;;  %v6477_v58 = vld [vmem:[#allocation11_spill] sm:$0xff] }
 0x3ea   : > { %v3708_v50 = vpop.f32.mrf.mxu1 }
 0x3eb   : > { %v4048_v60 = vadd.f32 %v6185_v22, %v4012_v1  ;;  %v3709_v23 = vadd.f32 %v3708_v50, %v3620_v62 }
 0x3ed   : > { %v4305_v12 = vadd.f32 %v4273_v19, %v4048_v60  ;;  %v3758_v33 = vmul.f32 %v6066_v63, %v3709_v23  ;;  %v6278_v62 = vpop.f32.mrf.mxu3  ;;  %v3628_v60 = vadd.f32 %v3627_v28, %v6476_v43  ;;  %v4276_v23 = vadd.f32 %v6174_v56, %v4240_v41 }
 0x3ee   : > { %v4243_v41 = vmul.f32 %v6165_v2, %v6265_v47 }
 0x3ef   : > { %v4337_v49 = vmax.f32 %v4305_v12, 0.0  ;;  %v3794_v9 = vadd.f32 %v6072_v46, %v3758_v33  ;;  %v6478_v33 = vld [vmem:[#allocation9_spill] sm:$0xff] }
 0x3f0   : > { %v3936_v53 = vpop.f32.mrf.mxu2  ;;  %4223 = vmatmul.bf16.gmra.mxu3 %v5060_v31 }
 0x3f1   : > { %4369 = vst [vmem:[%s6200_s18 + $0x20] sm:$0xff] %v4337_v49  ;;  %v3826_v24 = vmax.f32 %v3794_v9, 0.0  ;;  %v4013_v55 = vmul.f32 %v6179_v32, %v3936_v53  ;;  %v3452_v49 = vadd.f32 %v6478_v33, %v6477_v58  ;;  %v4241_v9 = vmul.f32 %v6165_v2, %v6240_v20 }
 0x3f2   : > { %v3711_v3 = vpop.f32.mrf.mxu1  ;;  %v4244_v33 = vmul.f32 %v6165_v2, %v6278_v62 }
 0x3f3   : > { %v4049_v45 = vadd.f32 %v6185_v22, %v4013_v55  ;;  %v3846_v26 = vpack.c.bf16 %v3826_v24, %v3825_v29  ;;  %v3712_v13 = vadd.f32 %v3711_v3, %v3623_v39  ;;  %v6479_v29 = vld [vmem:[#allocation12_spill] sm:$0xff]  ;;  %v3632_v39 = vpop.f32.mrf.mxu0 }
 0x3f4   : > { %v3541_v24 = vadd.f32 %v6479_v29, %v3452_v49 }
 0x3f5   : > { %v4306_v5 = vadd.f32 %v4274_v0, %v4049_v45  ;;  %3978 = vmatmul.bf16.gmra.mxu2 %v3846_v26  ;;  %v3759_v38 = vmul.f32 %v6066_v63, %v3712_v13  ;;  %v6290_v3 = vpop.f32.mrf.mxu3  ;;  %v4277_v26 = vadd.f32 %v6174_v56, %v4241_v9 }
 0x3f6   : > { %v3630_v45 = vadd.f32 %v3629_v42, %v3541_v24  ;;  %v3457_v42 = vadd.f32 %v6047_v8, %v6051_v11 }
 0x3f7   : > { %v4338_v35 = vmax.f32 %v4306_v5, 0.0  ;;  %v3795_v30 = vadd.f32 %v6072_v46, %v3759_v38 }
 0x3f8   : > { %v3939_v25 = vpop.f32.mrf.mxu2 }
 0x3f9   : > { %4370 = vst [vmem:[%s6200_s18 + $0x28] sm:$0xff] %v4338_v35  ;;  %v4014_v37 = vmul.f32 %v6179_v32, %v3939_v25  ;;  %v3827_v4 = vmax.f32 %v3795_v30, 0.0  ;;  %v4242_v25 = vmul.f32 %v6165_v2, %v6253_v54  ;;  %v3633_v30 = vadd.f32 %v3632_v39, %v6045_v6  ;;  %v6480_v39 = vld [vmem:[#allocation13_spill] sm:$0xff] }
 0x3fa   : > { %v3713_v61 = vpop.f32.mrf.mxu1 }
 0x3fb   : > { %v4050_v27 = vadd.f32 %v6185_v22, %v4014_v37  ;;  %v3714_v15 = vadd.f32 %v3713_v61, %v3625_v14 }
 0x3fd   : > { %v4307_v18 = vadd.f32 %v4275_v16, %v4050_v27  ;;  %v3760_v34 = vmul.f32 %v6066_v63, %v3714_v15  ;;  %v6302_v16 = vpop.f32.mrf.mxu3  ;;  %v3634_v27 = vpop.f32.mrf.mxu0 }
 0x3ff   : > { %v4339_v21 = vmax.f32 %v4307_v18, 0.0  ;;  %v3796_v36 = vadd.f32 %v6072_v46, %v3760_v34  ;;  %v4278_v18 = vadd.f32 %v6174_v56, %v4242_v25 }
 0x400   : > { %v3941_v19 = vpop.f32.mrf.mxu2 }
 0x401   : > { %4371 = vst [vmem:[%s6200_s18 + $0x30] sm:$0xff] %v4339_v21  ;;  %v3828_v1 = vmax.f32 %v3796_v36, 0.0  ;;  %v4015_v52 = vmul.f32 %v6179_v32, %v3941_v19  ;;  %v3546_v19 = vadd.f32 %v6053_v48, %v3457_v42 }
 0x402   : > { %v3716_v50 = vpop.f32.mrf.mxu1 }
 0x403   : > { %v4051_v44 = vadd.f32 %v6185_v22, %v4015_v52  ;;  %v3847_v12 = vpack.c.bf16 %v3828_v1, %v3827_v4  ;;  %v3717_v53 = vadd.f32 %v3716_v50, %v3628_v60  ;;  %v3635_v6 = vadd.f32 %v3634_v27, %v3546_v19 }
 0x404   : > { %v4279_v50 = vadd.f32 %v6174_v56, %v4243_v41 }
 0x405   : > { %v4308_v59 = vadd.f32 %v4276_v23, %v4051_v44  ;;  %3983 = vmatmul.bf16.gmra.mxu2 %v3847_v12  ;;  %v3761_v28 = vmul.f32 %v6066_v63, %v3717_v53  ;;  %v4184_v1 = vpop.f32.mrf.mxu3  ;;  %v3637_v23 = vpop.f32.mrf.mxu0 }
 0x407   : > { %v4340_v55 = vmax.f32 %v4308_v59, 0.0  ;;  %v3797_v13 = vadd.f32 %v6072_v46, %v3761_v28 }
 0x408   : > { %v3944_v0 = vpop.f32.mrf.mxu2 }
 0x409   : > { %4372 = vst [vmem:[%s6200_s18 + $0x38] sm:$0xff] %v4340_v55  ;;  %v4016_v17 = vmul.f32 %v6179_v32, %v3944_v0  ;;  %v3829_v37 = vmax.f32 %v3797_v13, 0.0  ;;  %v3638_v0 = vadd.f32 %v3637_v23, %v6480_v39 }
 0x40a   : > { %v3718_v5 = vpop.f32.mrf.mxu1 }
 0x40b   : > { %v4052_v20 = vadd.f32 %v6185_v22, %v4016_v17  ;;  %v3719_v7 = vadd.f32 %v3718_v5, %v3630_v45  ;;  %v4280_v45 = vadd.f32 %v6174_v56, %v4244_v33  ;;  %v6481_v17 = vld [vmem:[#allocation14_spill] sm:$0xff] }
 0x40c   : > { %v3462_v62 = vadd.f32 %v6160_v51, %v6481_v17 }
 0x40d   : > { %v4309_v10 = vadd.f32 %v4277_v26, %v4052_v20  ;;  %v3762_v57 = vmul.f32 %v6066_v63, %v3719_v7  ;;  %v4186_v59 = vpop.f32.mrf.mxu3  ;;  %v4245_v20 = vmul.f32 %v6165_v2, %v6290_v3  ;;  %v3639_v13 = vpop.f32.mrf.mxu0 }
 0x40e   : > { %v4248_v23 = vmul.f32 %v6165_v2, %v4186_v59 }
 0x40f   : > { %v4341_v35 = vmax.f32 %v4309_v10, 0.0  ;;  %v3798_v14 = vadd.f32 %v6072_v46, %v3762_v57  ;;  %v3551_v10 = vadd.f32 %v6135_v40, %v3462_v62 }
 0x410   : > { %v3946_v38 = vpop.f32.mrf.mxu2 }
 0x411   : > { %4373 = vst [vmem:[%s6200_s18 + $0x40] sm:$0xff] %v4341_v35  ;;  %v3830_v61 = vmax.f32 %v3798_v14, 0.0  ;;  %v4017_v31 = vmul.f32 %v6179_v32, %v3946_v38  ;;  %v3640_v14 = vadd.f32 %v3639_v13, %v3551_v10  ;;  %v4281_v38 = vadd.f32 %v6174_v56, %v4245_v20 }
 0x412   : > { %v3721_v15 = vpop.f32.mrf.mxu1 }
 0x413   : > { %v4053_v34 = vadd.f32 %v6185_v22, %v4017_v31  ;;  %v3848_v54 = vpack.c.bf16 %v3830_v61, %v3829_v37  ;;  %v3722_v36 = vadd.f32 %v3721_v15, %v3633_v30 }
 0x415   : > { %v4310_v21 = vadd.f32 %v4278_v18, %v4053_v34  ;;  %3988 = vmatmul.bf16.gmra.mxu2 %v3848_v54  ;;  %v3763_v43 = vmul.f32 %v6066_v63, %v3722_v36  ;;  %v4189_v35 = vpop.f32.mrf.mxu3  ;;  %v4246_v18 = vmul.f32 %v6165_v2, %v6302_v16 }
 0x417   : > { %v4342_v4 = vmax.f32 %v4310_v21, 0.0  ;;  %v3799_v44 = vadd.f32 %v6072_v46, %v3763_v43  ;;  %v4282_v19 = vadd.f32 %v6174_v56, %v4246_v18 }
 0x418   : > { %v3949_v52 = vpop.f32.mrf.mxu2 }
 0x419   : > { %4374 = vst [vmem:[%s6200_s18 + $0x48] sm:$0xff] %v4342_v4  ;;  %v4018_v11 = vmul.f32 %v6179_v32, %v3949_v52  ;;  %v3831_v53 = vmax.f32 %v3799_v44, 0.0 }
 0x41a   : > { %v3723_v8 = vpop.f32.mrf.mxu1 }
 0x41b   : > { %v4054_v60 = vadd.f32 %v6185_v22, %v4018_v11  ;;  %v3724_v47 = vadd.f32 %v3723_v8, %v3635_v6  ;;  %v4247_v6 = vmul.f32 %v6165_v2, %v4184_v1 }
 0x41d   : > { %v4311_v48 = vadd.f32 %v4279_v50, %v4054_v60  ;;  %v3764_v12 = vmul.f32 %v6066_v63, %v3724_v47  ;;  %v4191_v42 = vpop.f32.mrf.mxu3 }
 0x41f   : > { %v4343_v58 = vmax.f32 %v4311_v48, 0.0  ;;  %v3800_v49 = vadd.f32 %v6072_v46, %v3764_v12  ;;  %v4284_v48 = vadd.f32 %v6174_v56, %v4248_v23 }
 0x420   : > { %v3951_v9 = vpop.f32.mrf.mxu2 }
 0x421   : > { %4375 = vst [vmem:[%s6200_s18 + $0x50] sm:$0xff] %v4343_v58  ;;  %v3832_v29 = vmax.f32 %v3800_v49, 0.0  ;;  %v4019_v24 = vmul.f32 %v6179_v32, %v3951_v9  ;;  %v4249_v49 = vmul.f32 %v6165_v2, %v4189_v35 }
 0x422   : > { %v3726_v55 = vpop.f32.mrf.mxu1 }
 0x423   : > { %v4055_v26 = vadd.f32 %v6185_v22, %v4019_v24  ;;  %v3849_v28 = vpack.c.bf16 %v3832_v29, %v3831_v53  ;;  %v3727_v7 = vadd.f32 %v3726_v55, %v3638_v0  ;;  %v4285_v29 = vadd.f32 %v6174_v56, %v4249_v49 }
 0x425   : > { %v4312_v5 = vadd.f32 %v4280_v45, %v4055_v26  ;;  %3993 = vmatmul.bf16.gmra.mxu2 %v3849_v28  ;;  %v3765_v37 = vmul.f32 %v6066_v63, %v3727_v7  ;;  %v4194_v11 = vpop.f32.mrf.mxu3  ;;  %v4250_v45 = vmul.f32 %v6165_v2, %v4191_v42 }
 0x426   : > { %v4251_v20 = vmul.f32 %v6165_v2, %v4194_v11 }
 0x427   : > { %v4344_v57 = vmax.f32 %v4312_v5, 0.0  ;;  %v3801_v27 = vadd.f32 %v6072_v46, %v3765_v37  ;;  %v4286_v17 = vadd.f32 %v6174_v56, %v4250_v45 }
 0x428   : > { %v3954_v25 = vpop.f32.mrf.mxu2 }
 0x429   : > { %4376 = vst [vmem:[%s6200_s18 + $0x58] sm:$0xff] %v4344_v57  ;;  %v4020_v51 = vmul.f32 %v6179_v32, %v3954_v25  ;;  %v3833_v21 = vmax.f32 %v3801_v27, 0.0  ;;  %v4287_v57 = vadd.f32 %v6174_v56, %v4251_v20 }
 0x42a   : > { %v3728_v61 = vpop.f32.mrf.mxu1 }
 0x42b   : > { %v4056_v3 = vadd.f32 %v6185_v22, %v4020_v51  ;;  %v3729_v31 = vadd.f32 %v3728_v61, %v3640_v14 }
 0x42d   : > { %v4313_v15 = vadd.f32 %v4281_v38, %v4056_v3  ;;  %v3766_v40 = vmul.f32 %v6066_v63, %v3729_v31  ;;  %v4196_v58 = vpop.f32.mrf.mxu3 }
 0x42e   : > { %v4252_v37 = vmul.f32 %v6165_v2, %v4196_v58 }
 0x42f   : > { %v4345_v30 = vmax.f32 %v4313_v15, 0.0  ;;  %v3802_v34 = vadd.f32 %v6072_v46, %v3766_v40  ;;  %v4283_v46 = vadd.f32 %v6174_v56, %v4247_v6 }
 0x430   : > { %v3956_v54 = vpop.f32.mrf.mxu2  ;;  %v4288_v31 = vadd.f32 %v6174_v56, %v4252_v37 }
 0x431   : > { %4377 = vst [vmem:[%s6200_s18 + $0x60] sm:$0xff] %v4345_v30  ;;  %v3834_v41 = vmax.f32 %v3802_v34, 0.0  ;;  %v4021_v36 = vmul.f32 %v6179_v32, %v3956_v54 }
 0x433   : > { %v4057_v4 = vadd.f32 %v6185_v22, %v4021_v36  ;;  %v3850_v63 = vpack.c.bf16 %v3834_v41, %v3833_v21 }
 0x435   : > { %v4314_v52 = vadd.f32 %v4282_v19, %v4057_v4  ;;  %3998 = vmatmul.bf16.gmra.mxu2 %v3850_v63  ;;  %v4199_v39 = vpop.f32.mrf.mxu3 }
 0x436   : > { %v4253_v40 = vmul.f32 %v6165_v2, %v4199_v39 }
 0x437   : > { %v4346_v16 = vmax.f32 %v4314_v52, 0.0 }
 0x438   : > { %v3959_v50 = vpop.f32.mrf.mxu2  ;;  %v4289_v34 = vadd.f32 %v6174_v56, %v4253_v40 }
 0x439   : > { %4378 = vst [vmem:[%s6200_s18 + $0x68] sm:$0xff] %v4346_v16  ;;  %v4022_v43 = vmul.f32 %v6179_v32, %v3959_v50 }
 0x43b   : > { %v4058_v8 = vadd.f32 %v6185_v22, %v4022_v43 }
 0x43d   : > { %v4315_v60 = vadd.f32 %v4283_v46, %v4058_v8  ;;  %v4201_v10 = vpop.f32.mrf.mxu3 }
 0x43e   : > { %v4254_v19 = vmul.f32 %v6165_v2, %v4201_v10 }
 0x43f   : > { %v4347_v47 = vmax.f32 %v4315_v60, 0.0 }
 0x440   : > { %v3961_v44 = vpop.f32.mrf.mxu2  ;;  %v4290_v52 = vadd.f32 %v6174_v56, %v4254_v19 }
 0x441   : > { %4379 = vst [vmem:[%s6200_s18 + $0x70] sm:$0xff] %v4347_v47  ;;  %v4023_v1 = vmul.f32 %v6179_v32, %v3961_v44 }
 0x443   : > { %v4059_v12 = vadd.f32 %v6185_v22, %v4023_v1 }
 0x445   : > { %v4316_v33 = vadd.f32 %v4284_v48, %v4059_v12  ;;  %v4204_v3 = vpop.f32.mrf.mxu3 }
 0x446   : > { %v4255_v50 = vmul.f32 %v6165_v2, %v4204_v3 }
 0x447   : > { %v4348_v9 = vmax.f32 %v4316_v33, 0.0 }
 0x448   : > { %v3964_v53 = vpop.f32.mrf.mxu2  ;;  %v4291_v8 = vadd.f32 %v6174_v56, %v4255_v50 }
 0x449   : > { %4380 = vst [vmem:[%s6200_s18 + $0x78] sm:$0xff] %v4348_v9  ;;  %v4024_v59 = vmul.f32 %v6179_v32, %v3964_v53 }
 0x44b   : > { %v4060_v24 = vadd.f32 %v6185_v22, %v4024_v59 }
 0x44d   : > { %v4317_v55 = vadd.f32 %v4285_v29, %v4060_v24  ;;  %v4206_v21 = vpop.f32.mrf.mxu3 }
 0x44e   : > { %v4256_v1 = vmul.f32 %v6165_v2, %v4206_v21 }
 0x44f   : > { %v4349_v0 = vmax.f32 %v4317_v55, 0.0 }
 0x450   : > { %v3966_v26 = vpop.f32.mrf.mxu2  ;;  %v4292_v33 = vadd.f32 %v6174_v56, %v4256_v1 }
 0x451   : > { %4381 = vst [vmem:[%s6200_s18 + $0x80] sm:$0xff] %v4349_v0  ;;  %v4025_v28 = vmul.f32 %v6179_v32, %v3966_v26 }
 0x453   : > { %v4061_v62 = vadd.f32 %v6185_v22, %v4025_v28 }
 0x455   : > { %v4318_v5 = vadd.f32 %v4286_v17, %v4061_v62  ;;  %v4209_v46 = vpop.f32.mrf.mxu3 }
 0x456   : > { %v4257_v53 = vmul.f32 %v6165_v2, %v4209_v46 }
 0x457   : > { %v4350_v7 = vmax.f32 %v4318_v5, 0.0 }
 0x458   : > { %v3969_v13 = vpop.f32.mrf.mxu2  ;;  %v4293_v24 = vadd.f32 %v6174_v56, %v4257_v53 }
 0x459   : > { %4382 = vst [vmem:[%s6200_s18 + $0x88] sm:$0xff] %v4350_v7  ;;  %v4026_v35 = vmul.f32 %v6179_v32, %v3969_v13 }
 0x45b   : > { %v4062_v25 = vadd.f32 %v6185_v22, %v4026_v35 }
 0x45d   : > { %v4319_v14 = vadd.f32 %v4287_v57, %v4062_v25  ;;  %v4211_v12 = vpop.f32.mrf.mxu3 }
 0x45e   : > { %v4258_v28 = vmul.f32 %v6165_v2, %v4211_v12 }
 0x45f   : > { %v4351_v38 = vmax.f32 %v4319_v14, 0.0 }
 0x460   : > { %v3971_v51 = vpop.f32.mrf.mxu2  ;;  %v4294_v5 = vadd.f32 %v6174_v56, %v4258_v28 }
 0x461   : > { %4383 = vst [vmem:[%s6200_s18 + $0x90] sm:$0xff] %v4351_v38  ;;  %v4027_v61 = vmul.f32 %v6179_v32, %v3971_v51 }
 0x463   : > { %v4063_v27 = vadd.f32 %v6185_v22, %v4027_v61 }
 0x465   : > { %v4320_v15 = vadd.f32 %v4288_v31, %v4063_v27  ;;  %v4214_v39 = vpop.f32.mrf.mxu3 }
 0x466   : > { %v4259_v10 = vmul.f32 %v6165_v2, %v4214_v39 }
 0x467   : > { %v4352_v30 = vmax.f32 %v4320_v15, 0.0 }
 0x468   : > { %v3974_v18 = vpop.f32.mrf.mxu2  ;;  %v4295_v25 = vadd.f32 %v6174_v56, %v4259_v10 }
 0x469   : > { %4384 = vst [vmem:[%s6200_s18 + $0x98] sm:$0xff] %v4352_v30  ;;  %v4028_v54 = vmul.f32 %v6179_v32, %v3974_v18 }
 0x46b   : > { %v4064_v42 = vadd.f32 %v6185_v22, %v4028_v54 }
 0x46d   : > { %v4321_v41 = vadd.f32 %v4289_v34, %v4064_v42  ;;  %v4216_v7 = vpop.f32.mrf.mxu3 }
 0x46e   : > { %v4260_v3 = vmul.f32 %v6165_v2, %v4216_v7 }
 0x46f   : > { %v4353_v36 = vmax.f32 %v4321_v41, 0.0 }
 0x470   : > { %v3976_v4 = vpop.f32.mrf.mxu2  ;;  %v4296_v15 = vadd.f32 %v6174_v56, %v4260_v3 }
 0x471   : > { %4385 = vst [vmem:[%s6200_s18 + $0xa0] sm:$0xff] %v4353_v36  ;;  %v4029_v63 = vmul.f32 %v6179_v32, %v3976_v4 }
 0x473   : > { %v4065_v6 = vadd.f32 %v6185_v22, %v4029_v63 }
 0x475   : > { %v4322_v16 = vadd.f32 %v4290_v52, %v4065_v6  ;;  %v4219_v51 = vpop.f32.mrf.mxu3 }
 0x476   : > { %v4261_v18 = vmul.f32 %v6165_v2, %v4219_v51 }
 0x477   : > { %v4354_v43 = vmax.f32 %v4322_v16, 0.0 }
 0x478   : > { %v3979_v11 = vpop.f32.mrf.mxu2  ;;  %v4297_v21 = vadd.f32 %v6174_v56, %v4261_v18 }
 0x479   : > { %4386 = vst [vmem:[%s6200_s18 + $0xa8] sm:$0xff] %v4354_v43  ;;  %v4030_v60 = vmul.f32 %v6179_v32, %v3979_v11 }
 0x47b   : > { %v4066_v47 = vadd.f32 %v6185_v22, %v4030_v60 }
 0x47d   : > { %v4323_v23 = vadd.f32 %v4291_v8, %v4066_v47  ;;  %v4221_v42 = vpop.f32.mrf.mxu3 }
 0x47e   : > { %v4262_v63 = vmul.f32 %v6165_v2, %v4221_v42 }
 0x47f   : > { %v4355_v44 = vmax.f32 %v4323_v23, 0.0 }
 0x480   : > { %v3981_v48 = vpop.f32.mrf.mxu2  ;;  %v4298_v50 = vadd.f32 %v6174_v56, %v4262_v63 }
 0x481   : > { %4387 = vst [vmem:[%s6200_s18 + $0xb0] sm:$0xff] %v4355_v44  ;;  %v4031_v58 = vmul.f32 %v6179_v32, %v3981_v48 }
 0x483   : > { %v4067_v49 = vadd.f32 %v6185_v22, %v4031_v58 }
 0x485   : > { %v4324_v9 = vadd.f32 %v4292_v33, %v4067_v49  ;;  %v4224_v16 = vpop.f32.mrf.mxu3 }
 0x486   : > { %v4263_v11 = vmul.f32 %v6165_v2, %v4224_v16 }
 0x487   : > { %v4356_v29 = vmax.f32 %v4324_v9, 0.0 }
 0x488   : > { %v3984_v59 = vpop.f32.mrf.mxu2  ;;  %v4299_v47 = vadd.f32 %v6174_v56, %v4263_v11 }
 0x489   : > { %4388 = vst [vmem:[%s6200_s18 + $0xb8] sm:$0xff] %v4356_v29  ;;  %v4032_v55 = vmul.f32 %v6179_v32, %v3984_v59 }
 0x48b   : > { %v4068_v0 = vadd.f32 %v6185_v22, %v4032_v55 }
 0x48d   : > { %v4325_v45 = vadd.f32 %v4293_v24, %v4068_v0  ;;  %v4226_v1 = vpop.f32.mrf.mxu3 }
 0x48e   : > { %v4264_v58 = vmul.f32 %v6165_v2, %v4226_v1 }
 0x48f   : > { %v4357_v26 = vmax.f32 %v4325_v45, 0.0 }
 0x490   : > { %v3986_v17 = vpop.f32.mrf.mxu2  ;;  %v4300_v9 = vadd.f32 %v6174_v56, %v4264_v58 }
 0x491   : > { %4389 = vst [vmem:[%s6200_s18 + $0xc0] sm:$0xff] %v4357_v26  ;;  %v4033_v62 = vmul.f32 %v6179_v32, %v3986_v17 }
 0x493   : > { %v4069_v20 = vadd.f32 %v6185_v22, %v4033_v62 }
 0x495   : > { %v4326_v13 = vadd.f32 %v4294_v5, %v4069_v20 }
 0x497   : > { %v4358_v57 = vmax.f32 %v4326_v13, 0.0 }
 0x498   : > { %v3989_v35 = vpop.f32.mrf.mxu2 }
 0x499   : > { %4390 = vst [vmem:[%s6200_s18 + $0xc8] sm:$0xff] %v4358_v57  ;;  %v4034_v14 = vmul.f32 %v6179_v32, %v3989_v35 }
 0x49b   : > { %v4070_v38 = vadd.f32 %v6185_v22, %v4034_v14 }
 0x49d   : > { %v4327_v37 = vadd.f32 %v4295_v25, %v4070_v38 }
 0x49f   : > { %v4359_v61 = vmax.f32 %v4327_v37, 0.0 }
 0x4a0   : > { %v3991_v31 = vpop.f32.mrf.mxu2 }
 0x4a1   : > { %4391 = vst [vmem:[%s6200_s18 + $0xd0] sm:$0xff] %v4359_v61  ;;  %v4035_v27 = vmul.f32 %v6179_v32, %v3991_v31 }
 0x4a3   : > { %v4071_v40 = vadd.f32 %v6185_v22, %v4035_v27 }
 0x4a5   : > { %v4328_v30 = vadd.f32 %v4296_v15, %v4071_v40 }
 0x4a7   : > { %v4360_v34 = vmax.f32 %v4328_v30, 0.0 }
 0x4a8   : > { %v3994_v54 = vpop.f32.mrf.mxu2 }
 0x4a9   : > { %4392 = vst [vmem:[%s6200_s18 + $0xd8] sm:$0xff] %v4360_v34  ;;  %v4036_v41 = vmul.f32 %v6179_v32, %v3994_v54 }
 0x4ab   : > { %v4072_v36 = vadd.f32 %v6185_v22, %v4036_v41 }
 0x4ad   : > { %v4329_v19 = vadd.f32 %v4297_v21, %v4072_v36 }
 0x4af   : > { %v4361_v4 = vmax.f32 %v4329_v19, 0.0 }
 0x4b0   : > { %v3996_v52 = vpop.f32.mrf.mxu2 }
 0x4b1   : > { %4393 = vst [vmem:[%s6200_s18 + $0xe0] sm:$0xff] %v4361_v4  ;;  %v4037_v6 = vmul.f32 %v6179_v32, %v3996_v52 }
 0x4b3   : > { %v4073_v46 = vadd.f32 %v6185_v22, %v4037_v6 }
 0x4b5   : > { %v4330_v43 = vadd.f32 %v4298_v50, %v4073_v46 }
 0x4b7   : > { %v4362_v8 = vmax.f32 %v4330_v43, 0.0 }
 0x4b8   : > { %v3999_v60 = vpop.f32.mrf.mxu2 }
 0x4b9   : > { %4394 = vst [vmem:[%s6200_s18 + $0xe8] sm:$0xff] %v4362_v8  ;;  %v4038_v23 = vmul.f32 %v6179_v32, %v3999_v60 }
 0x4bb   : > { %v4074_v44 = vadd.f32 %v6185_v22, %v4038_v23 }
 0x4bd   : > { %v4331_v48 = vadd.f32 %v4299_v47, %v4074_v44 }
 0x4bf   : > { %v4363_v12 = vmax.f32 %v4331_v48, 0.0 }
 0x4c0   : > { %v4001_v33 = vpop.f32.mrf.mxu2 }
 0x4c1   : > { %4395 = vst [vmem:[%s6200_s18 + $0xf0] sm:$0xff] %v4363_v12  ;;  %v4039_v49 = vmul.f32 %v6179_v32, %v4001_v33 }
 0x4c3   : > { %v4075_v53 = vadd.f32 %v6185_v22, %v4039_v49 }
 0x4c5   : > { %v4332_v29 = vadd.f32 %v4300_v9, %v4075_v53 }
 0x4c7   : > { %v4364_v59 = vmax.f32 %v4332_v29, 0.0 }
 0x4c9   : > { %4396 = vst [vmem:[%s6200_s18 + $0xf8] sm:$0xff] %v4364_v59 }
 0x4ca PF: > { %s23_s25 = sadd.s32 1, %s5067_s25  }
 0x4cb   : > { %p20_p4 = scmp.ge.s32.totalorder %s23_s25, 4  }
 0x4cd   :  { %22 = sbr.rel (!%p20_p4) target bundleno = 1 (0x1), region = 104 }

</bundles_post_ra>
